<compile_context>
chip_gen: v7x
topology: tpu7x:2x2x1
jax: 0.10.0
libtpu: 0.0.40
codegen_flags: <defaults>
</compile_context>

<pallas_src>
import jax
import jax.numpy as jnp
from jax.experimental import pallas as pl
from jax.experimental.pallas import tpu as pltpu


# ----------------------- Kernel 1: conv1 + pool1 + conv2 + pool2 -----------------------
#
# conv1 input: host-glue im2col, rows ordered h*28 + w, 9 taps (dh*3+dw) on lanes 0..8.
# conv2 input: zero-padded "expanded slab" of the pooled activations, pitch 16
#   (row = h*16 + w over a 16x16 zero-bordered 14x14 map, channels on lanes), so tap (dh, dw)
#   is the contiguous slice starting at dh*16 + dw.  Output rows with w = 14, 15 are garbage
#   but are provably never read by the stride-2 pool (it only reads w = 2*w2 + j <= 13).

_H = 28               # conv1 output height / width
_R1 = _H * _H         # 784 conv1 output rows (h*28 + w)
_P2 = 16              # conv2 slab pitch (14 + 2)
_R2 = 14 * _P2        # 224 conv2 output rows (h*16 + w)
_X2_ROWS = 17 * _P2   # 272 conv2 padded-input slab rows (16 used + 1 spare zero row)
_C1_CHUNK = 112       # conv1 M-chunk (784 = 7 * 112, multiple of 8 -> aligned stores)
_C2_CHUNK = 112       # conv2 M-chunk (224 = 2 * 112); keeps the accumulator at 14 vregs


def _conv_pool_kernel(x1_ref, w1_ref, b1_ref, w2_ref, b2_ref, out_ref,
                      y1_ref, x2_ref, y2_ref):
    n_img = x1_ref.shape[0]

    # Zero the conv2 slab once per grid step; only its interior is rewritten per image, the
    # zero borders provide the conv padding.
    x2_ref[...] = jnp.zeros_like(x2_ref)

    for bb in range(n_img):
        # ---- conv1: 1 -> 32 ch, 3x3, pad 1 (MXU im2col matmul, 112-row chunks) ----
        for c0 in range(0, _R1, _C1_CHUNK):
            xa = x1_ref[bb, c0:c0 + _C1_CHUNK, :]                    # (112, 16)
            y = jnp.dot(xa, w1_ref[...],
                        preferred_element_type=jnp.float32) + b1_ref[...]
            y1_ref[c0:c0 + _C1_CHUNK, :] = jnp.maximum(y, 0.0)       # ReLU

        # ---- pool1: 2x2 stride 2, fused with zero-padding into conv2's pitch-16 slab ----
        for h2 in range(14):
            base = 2 * h2 * _H
            p = jnp.maximum(
                jnp.maximum(y1_ref[pl.ds(base, 14, 2), :],
                            y1_ref[pl.ds(base + 1, 14, 2), :]),
                jnp.maximum(y1_ref[pl.ds(base + _H, 14, 2), :],
                            y1_ref[pl.ds(base + _H + 1, 14, 2), :]))
            r0 = (h2 + 1) * _P2 + 1                                  # interior (h2+1, 1..14)
            x2_ref[r0:r0 + 14, :] = p

        # ---- conv2: 32 -> 64 ch, 3x3, pad 1 (MXU, 9 shifted-slab taps, register acc) ----
        for c0 in range(0, _R2, _C2_CHUNK):
            acc = jnp.zeros((_C2_CHUNK, 64), jnp.float32) + b2_ref[...]
            for t in range(9):
                off = (t // 3) * _P2 + (t % 3)
                xa = x2_ref[c0 + off:c0 + off + _C2_CHUNK, :]        # (112, 32)
                acc = acc + jnp.dot(xa, w2_ref[t * 32:(t + 1) * 32, :],
                                    preferred_element_type=jnp.float32)
            y2_ref[c0:c0 + _C2_CHUNK, :] = jnp.maximum(acc, 0.0)     # ReLU

        # ---- pool2: 2x2 stride 2 -> (49, 64) features, rows h2*7 + w2, C on lanes ----
        for h2 in range(7):
            base = 2 * h2 * _P2
            p = jnp.maximum(
                jnp.maximum(y2_ref[pl.ds(base, 7, 2), :],
                            y2_ref[pl.ds(base + 1, 7, 2), :]),
                jnp.maximum(y2_ref[pl.ds(base + _P2, 7, 2), :],
                            y2_ref[pl.ds(base + _P2 + 1, 7, 2), :]))
            out_ref[bb, 7 * h2:7 * h2 + 7, :] = p.astype(out_ref.dtype)


def conv_stage(x1col, w1, b1, w2, b2, *, block_b=None):
    """Fused conv1+pool1+conv2+pool2; `block_b` images per grid step."""
    B = x1col.shape[0]
    if block_b is None:
        # Amortize grid-step overhead but keep >= 2 parallel steps so v7x's 2nd core is used.
        block_b = 8 if B >= 16 else max(1, B // 2)
    block_b = max(1, min(block_b, B))
    return pl.pallas_call(
        _conv_pool_kernel,
        out_shape=jax.ShapeDtypeStruct((B, 49, 64), jnp.bfloat16),   # bf16 feats -> cheap fc DMA
        grid_spec=pltpu.PrefetchScalarGridSpec(
            num_scalar_prefetch=0,
            grid=(pl.cdiv(B, block_b),),
            in_specs=[
                pl.BlockSpec((block_b, _R1, 16), lambda i: (i, 0, 0)),  # conv1 im2col block
                pl.BlockSpec((16, 32), lambda i: (0, 0)),               # conv1 weight (tap, Cout)
                pl.BlockSpec((1, 32), lambda i: (0, 0)),
                pl.BlockSpec((288, 64), lambda i: (0, 0)),              # conv2 weight (tap*Cin, Cout)
                pl.BlockSpec((1, 64), lambda i: (0, 0)),
            ],
            out_specs=pl.BlockSpec((block_b, 49, 64), lambda i: (i, 0, 0)),
            scratch_shapes=[
                pltpu.VMEM((_R1, 32), jnp.float32),        # conv1 ReLU output (one image)
                pltpu.VMEM((_X2_ROWS, 32), jnp.float32),   # conv2 zero-padded input slab
                pltpu.VMEM((_R2, 64), jnp.float32),        # conv2 ReLU output (one image)
            ],
        ),
        compiler_params=pltpu.CompilerParams(
            dimension_semantics=("parallel",),
            vmem_limit_bytes=32 * 1024 * 1024,
        ),
    )(x1col, w1, b1, w2, b2)


# ------------------------------ Kernel 2: fc1 + ReLU + fc2 ------------------------------

def _fc_kernel(x_ref, w1_ref, b1_ref, w2_ref, b2_ref, o_ref, h_ref):
    # bf16 activations x bf16 weights, f32 accumulation on the MXU.
    h = jnp.dot(x_ref[...], w1_ref[...], preferred_element_type=jnp.float32) + b1_ref[...]
    h_ref[...] = jnp.maximum(h, 0.0).astype(h_ref.dtype)            # ReLU, staged in VMEM (bf16)
    o_ref[...] = (jnp.dot(h_ref[...], w2_ref[...], preferred_element_type=jnp.float32)
                  + b2_ref[...]).astype(o_ref.dtype)


def fc_stage(x_flat, wf1, bf1, wf2, bf2, *, block_b=256):
    B, K = x_flat.shape
    tb = min(block_b, B)      # 256-row batch tiles (review); == B (full dim) for small batches
    return pl.pallas_call(
        _fc_kernel,
        out_shape=jax.ShapeDtypeStruct((B, 62), jnp.float32),
        grid_spec=pltpu.PrefetchScalarGridSpec(
            num_scalar_prefetch=0,
            grid=(pl.cdiv(B, tb),),
            in_specs=[
                pl.BlockSpec((tb, K), lambda i: (i, 0)),
                pl.BlockSpec((K, 128), lambda i: (0, 0)),    # fc1 weight (bf16, pre-permuted)
                pl.BlockSpec((1, 128), lambda i: (0, 0)),
                pl.BlockSpec((128, 62), lambda i: (0, 0)),   # fc2 weight (bf16, pre-transposed)
                pl.BlockSpec((1, 62), lambda i: (0, 0)),
            ],
            out_specs=pl.BlockSpec((tb, 62), lambda i: (i, 0)),
            scratch_shapes=[pltpu.VMEM((tb, 128), jnp.bfloat16)],    # fc1 hidden activations
        ),
        compiler_params=pltpu.CompilerParams(
            dimension_semantics=("parallel",),
            vmem_limit_bytes=32 * 1024 * 1024,
        ),
    )(x_flat, wf1, bf1, wf2, bf2)


# ------------------------------------ parameters ------------------------------------

def init_params(key):
    """Deterministic PyTorch-style (uniform +-1/sqrt(fan_in)) synthetic parameters."""
    ks = jax.random.split(key, 8)

    def u(k, shape, fan_in):
        bound = 1.0 / jnp.sqrt(float(fan_in))
        return jax.random.uniform(k, shape, jnp.float32, -bound, bound)

    return dict(
        conv1_w=u(ks[0], (32, 1, 3, 3), 1 * 9),
        conv1_b=u(ks[1], (32,), 1 * 9),
        conv2_w=u(ks[2], (64, 32, 3, 3), 32 * 9),
        conv2_b=u(ks[3], (64,), 32 * 9),
        fc1_w=u(ks[4], (128, 64 * 7 * 7), 64 * 7 * 7),
        fc1_b=u(ks[5], (128,), 64 * 7 * 7),
        fc2_w=u(ks[6], (62, 128), 128),
        fc2_b=u(ks[7], (62,), 128),
    )


def prepare_params(params):
    """One-time re-layout of PyTorch-format weights into kernel-ready matrices (off hot path)."""
    # Conv weights: (Cout, Cin, 3, 3) -> ((kh*3 + kw)*Cin + cin, Cout).
    w1 = jnp.transpose(params["conv1_w"], (2, 3, 1, 0)).reshape(9, 32)
    w1 = jnp.pad(w1, ((0, 7), (0, 0)))                                 # (16, 32): taps + 7 zero rows
    w2 = jnp.transpose(params["conv2_w"], (2, 3, 1, 0)).reshape(9 * 32, 64)
    # fc1: PyTorch flattens (C, H, W); the conv stage emits rows ordered (h*7 + w) with C on
    # lanes, so permute K once here instead of transposing activations at runtime.  bf16 storage
    # halves the dominant fc weight DMA and runs the MXU at native bf16 rate (review).
    wf1 = jnp.transpose(params["fc1_w"].reshape(128, 64, 7, 7),
                        (2, 3, 1, 0)).reshape(3136, 128).astype(jnp.bfloat16)
    return dict(
        w1=w1, b1=params["conv1_b"].reshape(1, 32),
        w2=w2, b2=params["conv2_b"].reshape(1, 64),
        wf1=wf1, bf1=params["fc1_b"].reshape(1, 128),
        wf2=params["fc2_w"].T.astype(jnp.bfloat16), bf2=params["fc2_b"].reshape(1, 62),
    )


# ------------------------------------- forward --------------------------------------

def emnist_forward(prepped, x_nchw):
    """Forward pass matching EMNIST_Classifier.forward (inference semantics)."""
    B = x_nchw.shape[0]
    img = x_nchw.reshape(B, 28, 28)
    # conv1 im2col in XLA glue (zero-pad 1 px, 9 shifted 28x28 windows, pad taps to 16 lanes).
    xpad = jnp.pad(img, ((0, 0), (1, 1), (1, 1)))                    # (B, 30, 30)
    taps = [xpad[:, dh:dh + 28, dw:dw + 28] for dh in range(3) for dw in range(3)]
    x1col = jnp.stack(taps, axis=-1).reshape(B, _R1, 9)
    x1col = jnp.pad(x1col, ((0, 0), (0, 0), (0, 7)))                 # (B, 784, 16)

    feats = conv_stage(x1col, prepped["w1"], prepped["b1"], prepped["w2"], prepped["b2"])
    xf = feats.reshape(B, 49 * 64)                                   # bf16, ~6 KB/image XLA copy
    return fc_stage(xf, prepped["wf1"], prepped["bf1"], prepped["wf2"], prepped["bf2"])


def emnist_reference(params, x_nchw):
    """Pure-XLA reference (PyTorch semantics, mirroring the kernel's intentional bf16 fc path)."""
    hi = jax.lax.Precision.HIGHEST

    def conv(x, w, b):
        y = jax.lax.conv_general_dilated(
            x, w, window_strides=(1, 1), padding=((1, 1), (1, 1)),
            dimension_numbers=("NCHW", "OIHW", "NCHW"), precision=hi)
        return y + b[None, :, None, None]

    def pool(x):
        return jax.lax.reduce_window(x, -jnp.inf, jax.lax.max,
                                     (1, 1, 2, 2), (1, 1, 2, 2), "VALID")

    x = pool(jnp.maximum(conv(x_nchw, params["conv1_w"], params["conv1_b"]), 0.0))
    x = pool(jnp.maximum(conv(x, params["conv2_w"], params["conv2_b"]), 0.0))
    x = x.reshape(x.shape[0], 64 * 7 * 7)            # PyTorch .view(-1, 64*7*7): (C, H, W) order
    xb = x.astype(jnp.bfloat16)                       # kernel stores features in bf16
    w1b = params["fc1_w"].T.astype(jnp.bfloat16)
    h = jnp.maximum(jnp.dot(xb, w1b, preferred_element_type=jnp.float32,
                            precision=hi) + params["fc1_b"], 0.0)
    w2b = params["fc2_w"].T.astype(jnp.bfloat16)
    return jnp.dot(h.astype(jnp.bfloat16), w2b, preferred_element_type=jnp.float32,
                   precision=hi) + params["fc2_b"]


if __name__ == "__main__":
    key = jax.random.PRNGKey(0)
    pkey, xkey, xkey2 = jax.random.split(key, 3)
    params = init_params(pkey)
    prepped = prepare_params(params)               # one-time weight re-layout

    fwd = jax.jit(emnist_forward)
    ref = jax.jit(emnist_reference)

    # Small-batch check (B=2): conv grid runs 2 parallel steps of 1 image each.
    x = jax.random.normal(xkey, (2, 1, 28, 28), dtype=jnp.float32)
    logits = jax.block_until_ready(fwd(prepped, x))
    assert logits.shape == (2, 62), logits.shape
    assert bool(jnp.all(jnp.isfinite(logits)))
    err = float(jnp.max(jnp.abs(logits - ref(params, x))))
    assert err < 2e-3, f"B=2 mismatch vs reference: max abs err = {err}"

    # Batch-blocked check (B=8 -> 2 grid steps of 4 images) to exercise the blocked path.
    x8 = jax.random.normal(xkey2, (8, 1, 28, 28), dtype=jnp.float32)
    logits8 = jax.block_until_ready(fwd(prepped, x8))
    assert logits8.shape == (8, 62), logits8.shape
    err8 = float(jnp.max(jnp.abs(logits8 - ref(params, x8))))
    assert err8 < 2e-3, f"B=8 mismatch vs reference: max abs err = {err8}"

    print("KERNEL_OK")
</pallas_src>

<mosaic_0001>
module attributes {stable_mosaic.version = 11 : i64} {
  func.func @_fc_kernel(%arg0: i32, %arg1: memref<2x3136xbf16, #tpu.memory_space<vmem>>, %arg2: memref<3136x128xbf16, #tpu.memory_space<vmem>>, %arg3: memref<1x128xf32, #tpu.memory_space<vmem>>, %arg4: memref<128x62xbf16, #tpu.memory_space<vmem>>, %arg5: memref<1x62xf32, #tpu.memory_space<vmem>>, %arg6: memref<2x62xf32, #tpu.memory_space<vmem>>, %arg7: memref<2x128xbf16, #tpu.memory_space<vmem>>) attributes {dimension_semantics = [#tpu.dimension_semantics<parallel>], iteration_bounds = array<i64: 1>, scalar_prefetch = 0 : i64, scratch_operands = 1 : i64, tpu.core_type = #tpu.core_type<tc>, window_params = [{transform_indices = @transform_0, window_bounds = array<i64: 2, 3136>}, {pipeline_mode = #tpu.pipeline_mode<synchronous>, transform_indices = @transform_1, window_bounds = array<i64: 3136, 128>}, {pipeline_mode = #tpu.pipeline_mode<synchronous>, transform_indices = @transform_2, window_bounds = array<i64: 1, 128>}, {pipeline_mode = #tpu.pipeline_mode<synchronous>, transform_indices = @transform_3, window_bounds = array<i64: 128, 62>}, {pipeline_mode = #tpu.pipeline_mode<synchronous>, transform_indices = @transform_4, window_bounds = array<i64: 1, 62>}, {transform_indices = @transform_5, window_bounds = array<i64: 2, 62>}]} {
    %c0 = arith.constant 0 : index
    %c0_0 = arith.constant 0 : index
    %0 = vector.load %arg1[%c0, %c0_0] : memref<2x3136xbf16, #tpu.memory_space<vmem>>, vector<2x3136xbf16>
    %c0_1 = arith.constant 0 : index
    %c0_2 = arith.constant 0 : index
    %1 = vector.load %arg2[%c0_1, %c0_2] : memref<3136x128xbf16, #tpu.memory_space<vmem>>, vector<3136x128xbf16>
    %cst = arith.constant dense<0.000000e+00> : vector<2x128xf32>
    %2 = tpu.matmul %0, %1, %cst {dimension_numbers = #tpu.dot_dimension_numbers<[1], [0], [0], [1], [0, 0, 1, 1], [], []>} : vector<2x3136xbf16>, vector<3136x128xbf16>, vector<2x128xf32> -> vector<2x128xf32>
    %c0_3 = arith.constant 0 : index
    %c0_4 = arith.constant 0 : index
    %3 = vector.load %arg3[%c0_3, %c0_4] : memref<1x128xf32, #tpu.memory_space<vmem>>, vector<1x128xf32>
    %4 = vector.broadcast %3 : vector<1x128xf32> to vector<2x128xf32>
    %5 = arith.addf %2, %4 : vector<2x128xf32>
    %cst_5 = arith.constant 0.000000e+00 : f32
    %6 = vector.broadcast %cst_5 : f32 to vector<2x128xf32>
    %7 = arith.maximumf %5, %6 : vector<2x128xf32>
    %8 = arith.truncf %7 : vector<2x128xf32> to vector<2x128xbf16>
    %c0_6 = arith.constant 0 : index
    %c0_7 = arith.constant 0 : index
    %9 = vector.load %arg7[%c0_6, %c0_7] : memref<2x128xbf16, #tpu.memory_space<vmem>>, vector<2x128xbf16>
    tpu.vector_store %arg7[%c0_6, %c0_7], %8 {strides = array<i32>} : memref<2x128xbf16, #tpu.memory_space<vmem>>, vector<2x128xbf16>,
    %c0_8 = arith.constant 0 : index
    %c0_9 = arith.constant 0 : index
    %10 = vector.load %arg7[%c0_8, %c0_9] : memref<2x128xbf16, #tpu.memory_space<vmem>>, vector<2x128xbf16>
    %c0_10 = arith.constant 0 : index
    %c0_11 = arith.constant 0 : index
    %11 = vector.load %arg4[%c0_10, %c0_11] : memref<128x62xbf16, #tpu.memory_space<vmem>>, vector<128x62xbf16>
    %cst_12 = arith.constant dense<0.000000e+00> : vector<2x62xf32>
    %12 = tpu.matmul %10, %11, %cst_12 {dimension_numbers = #tpu.dot_dimension_numbers<[1], [0], [0], [1], [0, 0, 1, 1], [], []>} : vector<2x128xbf16>, vector<128x62xbf16>, vector<2x62xf32> -> vector<2x62xf32>
    %c0_13 = arith.constant 0 : index
    %c0_14 = arith.constant 0 : index
    %13 = vector.load %arg5[%c0_13, %c0_14] : memref<1x62xf32, #tpu.memory_space<vmem>>, vector<1x62xf32>
    %14 = vector.broadcast %13 : vector<1x62xf32> to vector<2x62xf32>
    %15 = arith.addf %12, %14 : vector<2x62xf32>
    %c0_15 = arith.constant 0 : index
    %c0_16 = arith.constant 0 : index
    %16 = vector.load %arg6[%c0_15, %c0_16] : memref<2x62xf32, #tpu.memory_space<vmem>>, vector<2x62xf32>
    tpu.vector_store %arg6[%c0_15, %c0_16], %15 {strides = array<i32>} : memref<2x62xf32, #tpu.memory_space<vmem>>, vector<2x62xf32>,
    return
  }
  func.func @transform_0(%arg0: i32) -> (i32, i32) {
    %c0_i32 = arith.constant 0 : i32
    %c0_i32_0 = arith.constant 0 : i32
    return %arg0, %c0_i32 : i32, i32
  }
  func.func @transform_1(%arg0: i32) -> (i32, i32) {
    %c0_i32 = arith.constant 0 : i32
    %c0_i32_0 = arith.constant 0 : i32
    %c0_i32_1 = arith.constant 0 : i32
    return %c0_i32, %c0_i32_0 : i32, i32
  }
  func.func @transform_2(%arg0: i32) -> (i32, i32) {
    %c0_i32 = arith.constant 0 : i32
    %c0_i32_0 = arith.constant 0 : i32
    %c0_i32_1 = arith.constant 0 : i32
    return %c0_i32, %c0_i32_0 : i32, i32
  }
  func.func @transform_3(%arg0: i32) -> (i32, i32) {
    %c0_i32 = arith.constant 0 : i32
    %c0_i32_0 = arith.constant 0 : i32
    %c0_i32_1 = arith.constant 0 : i32
    return %c0_i32, %c0_i32_0 : i32, i32
  }
  func.func @transform_4(%arg0: i32) -> (i32, i32) {
    %c0_i32 = arith.constant 0 : i32
    %c0_i32_0 = arith.constant 0 : i32
    %c0_i32_1 = arith.constant 0 : i32
    return %c0_i32, %c0_i32_0 : i32, i32
  }
  func.func @transform_5(%arg0: i32) -> (i32, i32) {
    %c0_i32 = arith.constant 0 : i32
    %c0_i32_0 = arith.constant 0 : i32
    return %arg0, %c0_i32 : i32, i32
  }
}

module attributes {stable_mosaic.version = 11 : i64} {
  func.func @_conv_pool_kernel(%arg0: i32, %arg1: memref<1x784x16xf32, #tpu.memory_space<vmem>>, %arg2: memref<16x32xf32, #tpu.memory_space<vmem>>, %arg3: memref<1x32xf32, #tpu.memory_space<vmem>>, %arg4: memref<288x64xf32, #tpu.memory_space<vmem>>, %arg5: memref<1x64xf32, #tpu.memory_space<vmem>>, %arg6: memref<1x49x64xbf16, #tpu.memory_space<vmem>>, %arg7: memref<784x32xf32, #tpu.memory_space<vmem>>, %arg8: memref<272x32xf32, #tpu.memory_space<vmem>>, %arg9: memref<224x64xf32, #tpu.memory_space<vmem>>) attributes {dimension_semantics = [#tpu.dimension_semantics<parallel>], iteration_bounds = array<i64: 2>, scalar_prefetch = 0 : i64, scratch_operands = 3 : i64, tpu.core_type = #tpu.core_type<tc>, window_params = [{transform_indices = @transform_0, window_bounds = array<i64: 1, 784, 16>}, {pipeline_mode = #tpu.pipeline_mode<synchronous>, transform_indices = @transform_1, window_bounds = array<i64: 16, 32>}, {pipeline_mode = #tpu.pipeline_mode<synchronous>, transform_indices = @transform_2, window_bounds = array<i64: 1, 32>}, {pipeline_mode = #tpu.pipeline_mode<synchronous>, transform_indices = @transform_3, window_bounds = array<i64: 288, 64>}, {pipeline_mode = #tpu.pipeline_mode<synchronous>, transform_indices = @transform_4, window_bounds = array<i64: 1, 64>}, {transform_indices = @transform_5, window_bounds = array<i64: 1, 49, 64>}]} {
    %cst = arith.constant 0.000000e+00 : f32
    %0 = vector.broadcast %cst : f32 to vector<272x32xf32>
    %c0 = arith.constant 0 : index
    %c0_0 = arith.constant 0 : index
    %1 = vector.load %arg8[%c0, %c0_0] : memref<272x32xf32, #tpu.memory_space<vmem>>, vector<272x32xf32>
    tpu.vector_store %arg8[%c0, %c0_0], %0 {strides = array<i32>} : memref<272x32xf32, #tpu.memory_space<vmem>>, vector<272x32xf32>,
    %c0_1 = arith.constant 0 : index
    %c0_2 = arith.constant 0 : index
    %c0_3 = arith.constant 0 : index
    %2 = vector.load %arg1[%c0_1, %c0_2, %c0_3] : memref<1x784x16xf32, #tpu.memory_space<vmem>>, vector<1x112x16xf32>
    %3 = vector.shape_cast %2 : vector<1x112x16xf32> to vector<112x16xf32>
    %c0_4 = arith.constant 0 : index
    %c0_5 = arith.constant 0 : index
    %4 = vector.load %arg2[%c0_4, %c0_5] : memref<16x32xf32, #tpu.memory_space<vmem>>, vector<16x32xf32>
    %cst_6 = arith.constant dense<0.000000e+00> : vector<112x32xf32>
    %5 = tpu.matmul %3, %4, %cst_6 {dimension_numbers = #tpu.dot_dimension_numbers<[1], [0], [0], [1], [0, 0, 1, 1], [], []>} : vector<112x16xf32>, vector<16x32xf32>, vector<112x32xf32> -> vector<112x32xf32>
    %c0_7 = arith.constant 0 : index
    %c0_8 = arith.constant 0 : index
    %6 = vector.load %arg3[%c0_7, %c0_8] : memref<1x32xf32, #tpu.memory_space<vmem>>, vector<1x32xf32>
    %7 = vector.broadcast %6 : vector<1x32xf32> to vector<112x32xf32>
    %8 = arith.addf %5, %7 : vector<112x32xf32>
    %cst_9 = arith.constant 0.000000e+00 : f32
    %9 = vector.broadcast %cst_9 : f32 to vector<112x32xf32>
    %10 = arith.maximumf %8, %9 : vector<112x32xf32>
    %c0_10 = arith.constant 0 : index
    %c0_11 = arith.constant 0 : index
    %11 = vector.load %arg7[%c0_10, %c0_11] : memref<784x32xf32, #tpu.memory_space<vmem>>, vector<112x32xf32>
    tpu.vector_store %arg7[%c0_10, %c0_11], %10 {strides = array<i32>} : memref<784x32xf32, #tpu.memory_space<vmem>>, vector<112x32xf32>,
    %c0_12 = arith.constant 0 : index
    %c112 = arith.constant 112 : index
    %c0_13 = arith.constant 0 : index
    %12 = vector.load %arg1[%c0_12, %c112, %c0_13] : memref<1x784x16xf32, #tpu.memory_space<vmem>>, vector<1x112x16xf32>
    %13 = vector.shape_cast %12 : vector<1x112x16xf32> to vector<112x16xf32>
    %c0_14 = arith.constant 0 : index
    %c0_15 = arith.constant 0 : index
    %14 = vector.load %arg2[%c0_14, %c0_15] : memref<16x32xf32, #tpu.memory_space<vmem>>, vector<16x32xf32>
    %cst_16 = arith.constant dense<0.000000e+00> : vector<112x32xf32>
    %15 = tpu.matmul %13, %14, %cst_16 {dimension_numbers = #tpu.dot_dimension_numbers<[1], [0], [0], [1], [0, 0, 1, 1], [], []>} : vector<112x16xf32>, vector<16x32xf32>, vector<112x32xf32> -> vector<112x32xf32>
    %c0_17 = arith.constant 0 : index
    %c0_18 = arith.constant 0 : index
    %16 = vector.load %arg3[%c0_17, %c0_18] : memref<1x32xf32, #tpu.memory_space<vmem>>, vector<1x32xf32>
    %17 = vector.broadcast %16 : vector<1x32xf32> to vector<112x32xf32>
    %18 = arith.addf %15, %17 : vector<112x32xf32>
    %cst_19 = arith.constant 0.000000e+00 : f32
    %19 = vector.broadcast %cst_19 : f32 to vector<112x32xf32>
    %20 = arith.maximumf %18, %19 : vector<112x32xf32>
    %c112_20 = arith.constant 112 : index
    %c0_21 = arith.constant 0 : index
    %21 = vector.load %arg7[%c112_20, %c0_21] : memref<784x32xf32, #tpu.memory_space<vmem>>, vector<112x32xf32>
    tpu.vector_store %arg7[%c112_20, %c0_21], %20 {strides = array<i32>} : memref<784x32xf32, #tpu.memory_space<vmem>>, vector<112x32xf32>,
    %c0_22 = arith.constant 0 : index
    %c224 = arith.constant 224 : index
    %c0_23 = arith.constant 0 : index
    %22 = vector.load %arg1[%c0_22, %c224, %c0_23] : memref<1x784x16xf32, #tpu.memory_space<vmem>>, vector<1x112x16xf32>
    %23 = vector.shape_cast %22 : vector<1x112x16xf32> to vector<112x16xf32>
    %c0_24 = arith.constant 0 : index
    %c0_25 = arith.constant 0 : index
    %24 = vector.load %arg2[%c0_24, %c0_25] : memref<16x32xf32, #tpu.memory_space<vmem>>, vector<16x32xf32>
    %cst_26 = arith.constant dense<0.000000e+00> : vector<112x32xf32>
    %25 = tpu.matmul %23, %24, %cst_26 {dimension_numbers = #tpu.dot_dimension_numbers<[1], [0], [0], [1], [0, 0, 1, 1], [], []>} : vector<112x16xf32>, vector<16x32xf32>, vector<112x32xf32> -> vector<112x32xf32>
    %c0_27 = arith.constant 0 : index
    %c0_28 = arith.constant 0 : index
    %26 = vector.load %arg3[%c0_27, %c0_28] : memref<1x32xf32, #tpu.memory_space<vmem>>, vector<1x32xf32>
    %27 = vector.broadcast %26 : vector<1x32xf32> to vector<112x32xf32>
    %28 = arith.addf %25, %27 : vector<112x32xf32>
    %cst_29 = arith.constant 0.000000e+00 : f32
    %29 = vector.broadcast %cst_29 : f32 to vector<112x32xf32>
    %30 = arith.maximumf %28, %29 : vector<112x32xf32>
    %c224_30 = arith.constant 224 : index
    %c0_31 = arith.constant 0 : index
    %31 = vector.load %arg7[%c224_30, %c0_31] : memref<784x32xf32, #tpu.memory_space<vmem>>, vector<112x32xf32>
    tpu.vector_store %arg7[%c224_30, %c0_31], %30 {strides = array<i32>} : memref<784x32xf32, #tpu.memory_space<vmem>>, vector<112x32xf32>,
    %c0_32 = arith.constant 0 : index
    %c336 = arith.constant 336 : index
    %c0_33 = arith.constant 0 : index
    %32 = vector.load %arg1[%c0_32, %c336, %c0_33] : memref<1x784x16xf32, #tpu.memory_space<vmem>>, vector<1x112x16xf32>
    %33 = vector.shape_cast %32 : vector<1x112x16xf32> to vector<112x16xf32>
    %c0_34 = arith.constant 0 : index
    %c0_35 = arith.constant 0 : index
    %34 = vector.load %arg2[%c0_34, %c0_35] : memref<16x32xf32, #tpu.memory_space<vmem>>, vector<16x32xf32>
    %cst_36 = arith.constant dense<0.000000e+00> : vector<112x32xf32>
    %35 = tpu.matmul %33, %34, %cst_36 {dimension_numbers = #tpu.dot_dimension_numbers<[1], [0], [0], [1], [0, 0, 1, 1], [], []>} : vector<112x16xf32>, vector<16x32xf32>, vector<112x32xf32> -> vector<112x32xf32>
    %c0_37 = arith.constant 0 : index
    %c0_38 = arith.constant 0 : index
    %36 = vector.load %arg3[%c0_37, %c0_38] : memref<1x32xf32, #tpu.memory_space<vmem>>, vector<1x32xf32>
    %37 = vector.broadcast %36 : vector<1x32xf32> to vector<112x32xf32>
    %38 = arith.addf %35, %37 : vector<112x32xf32>
    %cst_39 = arith.constant 0.000000e+00 : f32
    %39 = vector.broadcast %cst_39 : f32 to vector<112x32xf32>
    %40 = arith.maximumf %38, %39 : vector<112x32xf32>
    %c336_40 = arith.constant 336 : index
    %c0_41 = arith.constant 0 : index
    %41 = vector.load %arg7[%c336_40, %c0_41] : memref<784x32xf32, #tpu.memory_space<vmem>>, vector<112x32xf32>
    tpu.vector_store %arg7[%c336_40, %c0_41], %40 {strides = array<i32>} : memref<784x32xf32, #tpu.memory_space<vmem>>, vector<112x32xf32>,
    %c0_42 = arith.constant 0 : index
    %c448 = arith.constant 448 : index
    %c0_43 = arith.constant 0 : index
    %42 = vector.load %arg1[%c0_42, %c448, %c0_43] : memref<1x784x16xf32, #tpu.memory_space<vmem>>, vector<1x112x16xf32>
    %43 = vector.shape_cast %42 : vector<1x112x16xf32> to vector<112x16xf32>
    %c0_44 = arith.constant 0 : index
    %c0_45 = arith.constant 0 : index
    %44 = vector.load %arg2[%c0_44, %c0_45] : memref<16x32xf32, #tpu.memory_space<vmem>>, vector<16x32xf32>
    %cst_46 = arith.constant dense<0.000000e+00> : vector<112x32xf32>
    %45 = tpu.matmul %43, %44, %cst_46 {dimension_numbers = #tpu.dot_dimension_numbers<[1], [0], [0], [1], [0, 0, 1, 1], [], []>} : vector<112x16xf32>, vector<16x32xf32>, vector<112x32xf32> -> vector<112x32xf32>
    %c0_47 = arith.constant 0 : index
    %c0_48 = arith.constant 0 : index
    %46 = vector.load %arg3[%c0_47, %c0_48] : memref<1x32xf32, #tpu.memory_space<vmem>>, vector<1x32xf32>
    %47 = vector.broadcast %46 : vector<1x32xf32> to vector<112x32xf32>
    %48 = arith.addf %45, %47 : vector<112x32xf32>
    %cst_49 = arith.constant 0.000000e+00 : f32
    %49 = vector.broadcast %cst_49 : f32 to vector<112x32xf32>
    %50 = arith.maximumf %48, %49 : vector<112x32xf32>
    %c448_50 = arith.constant 448 : index
    %c0_51 = arith.constant 0 : index
    %51 = vector.load %arg7[%c448_50, %c0_51] : memref<784x32xf32, #tpu.memory_space<vmem>>, vector<112x32xf32>
    tpu.vector_store %arg7[%c448_50, %c0_51], %50 {strides = array<i32>} : memref<784x32xf32, #tpu.memory_space<vmem>>, vector<112x32xf32>,
    %c0_52 = arith.constant 0 : index
    %c560 = arith.constant 560 : index
    %c0_53 = arith.constant 0 : index
    %52 = vector.load %arg1[%c0_52, %c560, %c0_53] : memref<1x784x16xf32, #tpu.memory_space<vmem>>, vector<1x112x16xf32>
    %53 = vector.shape_cast %52 : vector<1x112x16xf32> to vector<112x16xf32>
    %c0_54 = arith.constant 0 : index
    %c0_55 = arith.constant 0 : index
    %54 = vector.load %arg2[%c0_54, %c0_55] : memref<16x32xf32, #tpu.memory_space<vmem>>, vector<16x32xf32>
    %cst_56 = arith.constant dense<0.000000e+00> : vector<112x32xf32>
    %55 = tpu.matmul %53, %54, %cst_56 {dimension_numbers = #tpu.dot_dimension_numbers<[1], [0], [0], [1], [0, 0, 1, 1], [], []>} : vector<112x16xf32>, vector<16x32xf32>, vector<112x32xf32> -> vector<112x32xf32>
    %c0_57 = arith.constant 0 : index
    %c0_58 = arith.constant 0 : index
    %56 = vector.load %arg3[%c0_57, %c0_58] : memref<1x32xf32, #tpu.memory_space<vmem>>, vector<1x32xf32>
    %57 = vector.broadcast %56 : vector<1x32xf32> to vector<112x32xf32>
    %58 = arith.addf %55, %57 : vector<112x32xf32>
    %cst_59 = arith.constant 0.000000e+00 : f32
    %59 = vector.broadcast %cst_59 : f32 to vector<112x32xf32>
    %60 = arith.maximumf %58, %59 : vector<112x32xf32>
    %c560_60 = arith.constant 560 : index
    %c0_61 = arith.constant 0 : index
    %61 = vector.load %arg7[%c560_60, %c0_61] : memref<784x32xf32, #tpu.memory_space<vmem>>, vector<112x32xf32>
    tpu.vector_store %arg7[%c560_60, %c0_61], %60 {strides = array<i32>} : memref<784x32xf32, #tpu.memory_space<vmem>>, vector<112x32xf32>,
    %c0_62 = arith.constant 0 : index
    %c672 = arith.constant 672 : index
    %c0_63 = arith.constant 0 : index
    %62 = vector.load %arg1[%c0_62, %c672, %c0_63] : memref<1x784x16xf32, #tpu.memory_space<vmem>>, vector<1x112x16xf32>
    %63 = vector.shape_cast %62 : vector<1x112x16xf32> to vector<112x16xf32>
    %c0_64 = arith.constant 0 : index
    %c0_65 = arith.constant 0 : index
    %64 = vector.load %arg2[%c0_64, %c0_65] : memref<16x32xf32, #tpu.memory_space<vmem>>, vector<16x32xf32>
    %cst_66 = arith.constant dense<0.000000e+00> : vector<112x32xf32>
    %65 = tpu.matmul %63, %64, %cst_66 {dimension_numbers = #tpu.dot_dimension_numbers<[1], [0], [0], [1], [0, 0, 1, 1], [], []>} : vector<112x16xf32>, vector<16x32xf32>, vector<112x32xf32> -> vector<112x32xf32>
    %c0_67 = arith.constant 0 : index
    %c0_68 = arith.constant 0 : index
    %66 = vector.load %arg3[%c0_67, %c0_68] : memref<1x32xf32, #tpu.memory_space<vmem>>, vector<1x32xf32>
    %67 = vector.broadcast %66 : vector<1x32xf32> to vector<112x32xf32>
    %68 = arith.addf %65, %67 : vector<112x32xf32>
    %cst_69 = arith.constant 0.000000e+00 : f32
    %69 = vector.broadcast %cst_69 : f32 to vector<112x32xf32>
    %70 = arith.maximumf %68, %69 : vector<112x32xf32>
    %c672_70 = arith.constant 672 : index
    %c0_71 = arith.constant 0 : index
    %71 = vector.load %arg7[%c672_70, %c0_71] : memref<784x32xf32, #tpu.memory_space<vmem>>, vector<112x32xf32>
    tpu.vector_store %arg7[%c672_70, %c0_71], %70 {strides = array<i32>} : memref<784x32xf32, #tpu.memory_space<vmem>>, vector<112x32xf32>,
    %c0_72 = arith.constant 0 : index
    %c0_73 = arith.constant 0 : index
    %72 = tpu.strided_load %arg7[%c0_72, %c0_73] {strides = array<i32: 2, 1>} : memref<784x32xf32, #tpu.memory_space<vmem>>, vector<14x32xf32>
    %c1 = arith.constant 1 : index
    %c0_74 = arith.constant 0 : index
    %73 = tpu.strided_load %arg7[%c1, %c0_74] {strides = array<i32: 2, 1>} : memref<784x32xf32, #tpu.memory_space<vmem>>, vector<14x32xf32>
    %74 = arith.maximumf %72, %73 : vector<14x32xf32>
    %c28 = arith.constant 28 : index
    %c0_75 = arith.constant 0 : index
    %75 = tpu.strided_load %arg7[%c28, %c0_75] {strides = array<i32: 2, 1>} : memref<784x32xf32, #tpu.memory_space<vmem>>, vector<14x32xf32>
    %c29 = arith.constant 29 : index
    %c0_76 = arith.constant 0 : index
    %76 = tpu.strided_load %arg7[%c29, %c0_76] {strides = array<i32: 2, 1>} : memref<784x32xf32, #tpu.memory_space<vmem>>, vector<14x32xf32>
    %77 = arith.maximumf %75, %76 : vector<14x32xf32>
    %78 = arith.maximumf %74, %77 : vector<14x32xf32>
    %c17 = arith.constant 17 : index
    %c0_77 = arith.constant 0 : index
    %79 = vector.load %arg8[%c17, %c0_77] : memref<272x32xf32, #tpu.memory_space<vmem>>, vector<14x32xf32>
    tpu.vector_store %arg8[%c17, %c0_77], %78 {strides = array<i32>} : memref<272x32xf32, #tpu.memory_space<vmem>>, vector<14x32xf32>,
    %c56 = arith.constant 56 : index
    %c0_78 = arith.constant 0 : index
    %80 = tpu.strided_load %arg7[%c56, %c0_78] {strides = array<i32: 2, 1>} : memref<784x32xf32, #tpu.memory_space<vmem>>, vector<14x32xf32>
    %c57 = arith.constant 57 : index
    %c0_79 = arith.constant 0 : index
    %81 = tpu.strided_load %arg7[%c57, %c0_79] {strides = array<i32: 2, 1>} : memref<784x32xf32, #tpu.memory_space<vmem>>, vector<14x32xf32>
    %82 = arith.maximumf %80, %81 : vector<14x32xf32>
    %c84 = arith.constant 84 : index
    %c0_80 = arith.constant 0 : index
    %83 = tpu.strided_load %arg7[%c84, %c0_80] {strides = array<i32: 2, 1>} : memref<784x32xf32, #tpu.memory_space<vmem>>, vector<14x32xf32>
    %c85 = arith.constant 85 : index
    %c0_81 = arith.constant 0 : index
    %84 = tpu.strided_load %arg7[%c85, %c0_81] {strides = array<i32: 2, 1>} : memref<784x32xf32, #tpu.memory_space<vmem>>, vector<14x32xf32>
    %85 = arith.maximumf %83, %84 : vector<14x32xf32>
    %86 = arith.maximumf %82, %85 : vector<14x32xf32>
    %c33 = arith.constant 33 : index
    %c0_82 = arith.constant 0 : index
    %87 = vector.load %arg8[%c33, %c0_82] : memref<272x32xf32, #tpu.memory_space<vmem>>, vector<14x32xf32>
    tpu.vector_store %arg8[%c33, %c0_82], %86 {strides = array<i32>} : memref<272x32xf32, #tpu.memory_space<vmem>>, vector<14x32xf32>,
    %c112_83 = arith.constant 112 : index
    %c0_84 = arith.constant 0 : index
    %88 = tpu.strided_load %arg7[%c112_83, %c0_84] {strides = array<i32: 2, 1>} : memref<784x32xf32, #tpu.memory_space<vmem>>, vector<14x32xf32>
    %c113 = arith.constant 113 : index
    %c0_85 = arith.constant 0 : index
    %89 = tpu.strided_load %arg7[%c113, %c0_85] {strides = array<i32: 2, 1>} : memref<784x32xf32, #tpu.memory_space<vmem>>, vector<14x32xf32>
    %90 = arith.maximumf %88, %89 : vector<14x32xf32>
    %c140 = arith.constant 140 : index
    %c0_86 = arith.constant 0 : index
    %91 = tpu.strided_load %arg7[%c140, %c0_86] {strides = array<i32: 2, 1>} : memref<784x32xf32, #tpu.memory_space<vmem>>, vector<14x32xf32>
    %c141 = arith.constant 141 : index
    %c0_87 = arith.constant 0 : index
    %92 = tpu.strided_load %arg7[%c141, %c0_87] {strides = array<i32: 2, 1>} : memref<784x32xf32, #tpu.memory_space<vmem>>, vector<14x32xf32>
    %93 = arith.maximumf %91, %92 : vector<14x32xf32>
    %94 = arith.maximumf %90, %93 : vector<14x32xf32>
    %c49 = arith.constant 49 : index
    %c0_88 = arith.constant 0 : index
    %95 = vector.load %arg8[%c49, %c0_88] : memref<272x32xf32, #tpu.memory_space<vmem>>, vector<14x32xf32>
    tpu.vector_store %arg8[%c49, %c0_88], %94 {strides = array<i32>} : memref<272x32xf32, #tpu.memory_space<vmem>>, vector<14x32xf32>,
    %c168 = arith.constant 168 : index
    %c0_89 = arith.constant 0 : index
    %96 = tpu.strided_load %arg7[%c168, %c0_89] {strides = array<i32: 2, 1>} : memref<784x32xf32, #tpu.memory_space<vmem>>, vector<14x32xf32>
    %c169 = arith.constant 169 : index
    %c0_90 = arith.constant 0 : index
    %97 = tpu.strided_load %arg7[%c169, %c0_90] {strides = array<i32: 2, 1>} : memref<784x32xf32, #tpu.memory_space<vmem>>, vector<14x32xf32>
    %98 = arith.maximumf %96, %97 : vector<14x32xf32>
    %c196 = arith.constant 196 : index
    %c0_91 = arith.constant 0 : index
    %99 = tpu.strided_load %arg7[%c196, %c0_91] {strides = array<i32: 2, 1>} : memref<784x32xf32, #tpu.memory_space<vmem>>, vector<14x32xf32>
    %c197 = arith.constant 197 : index
    %c0_92 = arith.constant 0 : index
    %100 = tpu.strided_load %arg7[%c197, %c0_92] {strides = array<i32: 2, 1>} : memref<784x32xf32, #tpu.memory_space<vmem>>, vector<14x32xf32>
    %101 = arith.maximumf %99, %100 : vector<14x32xf32>
    %102 = arith.maximumf %98, %101 : vector<14x32xf32>
    %c65 = arith.constant 65 : index
    %c0_93 = arith.constant 0 : index
    %103 = vector.load %arg8[%c65, %c0_93] : memref<272x32xf32, #tpu.memory_space<vmem>>, vector<14x32xf32>
    tpu.vector_store %arg8[%c65, %c0_93], %102 {strides = array<i32>} : memref<272x32xf32, #tpu.memory_space<vmem>>, vector<14x32xf32>,
    %c224_94 = arith.constant 224 : index
    %c0_95 = arith.constant 0 : index
    %104 = tpu.strided_load %arg7[%c224_94, %c0_95] {strides = array<i32: 2, 1>} : memref<784x32xf32, #tpu.memory_space<vmem>>, vector<14x32xf32>
    %c225 = arith.constant 225 : index
    %c0_96 = arith.constant 0 : index
    %105 = tpu.strided_load %arg7[%c225, %c0_96] {strides = array<i32: 2, 1>} : memref<784x32xf32, #tpu.memory_space<vmem>>, vector<14x32xf32>
    %106 = arith.maximumf %104, %105 : vector<14x32xf32>
    %c252 = arith.constant 252 : index
    %c0_97 = arith.constant 0 : index
    %107 = tpu.strided_load %arg7[%c252, %c0_97] {strides = array<i32: 2, 1>} : memref<784x32xf32, #tpu.memory_space<vmem>>, vector<14x32xf32>
    %c253 = arith.constant 253 : index
    %c0_98 = arith.constant 0 : index
    %108 = tpu.strided_load %arg7[%c253, %c0_98] {strides = array<i32: 2, 1>} : memref<784x32xf32, #tpu.memory_space<vmem>>, vector<14x32xf32>
    %109 = arith.maximumf %107, %108 : vector<14x32xf32>
    %110 = arith.maximumf %106, %109 : vector<14x32xf32>
    %c81 = arith.constant 81 : index
    %c0_99 = arith.constant 0 : index
    %111 = vector.load %arg8[%c81, %c0_99] : memref<272x32xf32, #tpu.memory_space<vmem>>, vector<14x32xf32>
    tpu.vector_store %arg8[%c81, %c0_99], %110 {strides = array<i32>} : memref<272x32xf32, #tpu.memory_space<vmem>>, vector<14x32xf32>,
    %c280 = arith.constant 280 : index
    %c0_100 = arith.constant 0 : index
    %112 = tpu.strided_load %arg7[%c280, %c0_100] {strides = array<i32: 2, 1>} : memref<784x32xf32, #tpu.memory_space<vmem>>, vector<14x32xf32>
    %c281 = arith.constant 281 : index
    %c0_101 = arith.constant 0 : index
    %113 = tpu.strided_load %arg7[%c281, %c0_101] {strides = array<i32: 2, 1>} : memref<784x32xf32, #tpu.memory_space<vmem>>, vector<14x32xf32>
    %114 = arith.maximumf %112, %113 : vector<14x32xf32>
    %c308 = arith.constant 308 : index
    %c0_102 = arith.constant 0 : index
    %115 = tpu.strided_load %arg7[%c308, %c0_102] {strides = array<i32: 2, 1>} : memref<784x32xf32, #tpu.memory_space<vmem>>, vector<14x32xf32>
    %c309 = arith.constant 309 : index
    %c0_103 = arith.constant 0 : index
    %116 = tpu.strided_load %arg7[%c309, %c0_103] {strides = array<i32: 2, 1>} : memref<784x32xf32, #tpu.memory_space<vmem>>, vector<14x32xf32>
    %117 = arith.maximumf %115, %116 : vector<14x32xf32>
    %118 = arith.maximumf %114, %117 : vector<14x32xf32>
    %c97 = arith.constant 97 : index
    %c0_104 = arith.constant 0 : index
    %119 = vector.load %arg8[%c97, %c0_104] : memref<272x32xf32, #tpu.memory_space<vmem>>, vector<14x32xf32>
    tpu.vector_store %arg8[%c97, %c0_104], %118 {strides = array<i32>} : memref<272x32xf32, #tpu.memory_space<vmem>>, vector<14x32xf32>,
    %c336_105 = arith.constant 336 : index
    %c0_106 = arith.constant 0 : index
    %120 = tpu.strided_load %arg7[%c336_105, %c0_106] {strides = array<i32: 2, 1>} : memref<784x32xf32, #tpu.memory_space<vmem>>, vector<14x32xf32>
    %c337 = arith.constant 337 : index
    %c0_107 = arith.constant 0 : index
    %121 = tpu.strided_load %arg7[%c337, %c0_107] {strides = array<i32: 2, 1>} : memref<784x32xf32, #tpu.memory_space<vmem>>, vector<14x32xf32>
    %122 = arith.maximumf %120, %121 : vector<14x32xf32>
    %c364 = arith.constant 364 : index
    %c0_108 = arith.constant 0 : index
    %123 = tpu.strided_load %arg7[%c364, %c0_108] {strides = array<i32: 2, 1>} : memref<784x32xf32, #tpu.memory_space<vmem>>, vector<14x32xf32>
    %c365 = arith.constant 365 : index
    %c0_109 = arith.constant 0 : index
    %124 = tpu.strided_load %arg7[%c365, %c0_109] {strides = array<i32: 2, 1>} : memref<784x32xf32, #tpu.memory_space<vmem>>, vector<14x32xf32>
    %125 = arith.maximumf %123, %124 : vector<14x32xf32>
    %126 = arith.maximumf %122, %125 : vector<14x32xf32>
    %c113_110 = arith.constant 113 : index
    %c0_111 = arith.constant 0 : index
    %127 = vector.load %arg8[%c113_110, %c0_111] : memref<272x32xf32, #tpu.memory_space<vmem>>, vector<14x32xf32>
    tpu.vector_store %arg8[%c113_110, %c0_111], %126 {strides = array<i32>} : memref<272x32xf32, #tpu.memory_space<vmem>>, vector<14x32xf32>,
    %c392 = arith.constant 392 : index
    %c0_112 = arith.constant 0 : index
    %128 = tpu.strided_load %arg7[%c392, %c0_112] {strides = array<i32: 2, 1>} : memref<784x32xf32, #tpu.memory_space<vmem>>, vector<14x32xf32>
    %c393 = arith.constant 393 : index
    %c0_113 = arith.constant 0 : index
    %129 = tpu.strided_load %arg7[%c393, %c0_113] {strides = array<i32: 2, 1>} : memref<784x32xf32, #tpu.memory_space<vmem>>, vector<14x32xf32>
    %130 = arith.maximumf %128, %129 : vector<14x32xf32>
    %c420 = arith.constant 420 : index
    %c0_114 = arith.constant 0 : index
    %131 = tpu.strided_load %arg7[%c420, %c0_114] {strides = array<i32: 2, 1>} : memref<784x32xf32, #tpu.memory_space<vmem>>, vector<14x32xf32>
    %c421 = arith.constant 421 : index
    %c0_115 = arith.constant 0 : index
    %132 = tpu.strided_load %arg7[%c421, %c0_115] {strides = array<i32: 2, 1>} : memref<784x32xf32, #tpu.memory_space<vmem>>, vector<14x32xf32>
    %133 = arith.maximumf %131, %132 : vector<14x32xf32>
    %134 = arith.maximumf %130, %133 : vector<14x32xf32>
    %c129 = arith.constant 129 : index
    %c0_116 = arith.constant 0 : index
    %135 = vector.load %arg8[%c129, %c0_116] : memref<272x32xf32, #tpu.memory_space<vmem>>, vector<14x32xf32>
    tpu.vector_store %arg8[%c129, %c0_116], %134 {strides = array<i32>} : memref<272x32xf32, #tpu.memory_space<vmem>>, vector<14x32xf32>,
    %c448_117 = arith.constant 448 : index
    %c0_118 = arith.constant 0 : index
    %136 = tpu.strided_load %arg7[%c448_117, %c0_118] {strides = array<i32: 2, 1>} : memref<784x32xf32, #tpu.memory_space<vmem>>, vector<14x32xf32>
    %c449 = arith.constant 449 : index
    %c0_119 = arith.constant 0 : index
    %137 = tpu.strided_load %arg7[%c449, %c0_119] {strides = array<i32: 2, 1>} : memref<784x32xf32, #tpu.memory_space<vmem>>, vector<14x32xf32>
    %138 = arith.maximumf %136, %137 : vector<14x32xf32>
    %c476 = arith.constant 476 : index
    %c0_120 = arith.constant 0 : index
    %139 = tpu.strided_load %arg7[%c476, %c0_120] {strides = array<i32: 2, 1>} : memref<784x32xf32, #tpu.memory_space<vmem>>, vector<14x32xf32>
    %c477 = arith.constant 477 : index
    %c0_121 = arith.constant 0 : index
    %140 = tpu.strided_load %arg7[%c477, %c0_121] {strides = array<i32: 2, 1>} : memref<784x32xf32, #tpu.memory_space<vmem>>, vector<14x32xf32>
    %141 = arith.maximumf %139, %140 : vector<14x32xf32>
    %142 = arith.maximumf %138, %141 : vector<14x32xf32>
    %c145 = arith.constant 145 : index
    %c0_122 = arith.constant 0 : index
    %143 = vector.load %arg8[%c145, %c0_122] : memref<272x32xf32, #tpu.memory_space<vmem>>, vector<14x32xf32>
    tpu.vector_store %arg8[%c145, %c0_122], %142 {strides = array<i32>} : memref<272x32xf32, #tpu.memory_space<vmem>>, vector<14x32xf32>,
    %c504 = arith.constant 504 : index
    %c0_123 = arith.constant 0 : index
    %144 = tpu.strided_load %arg7[%c504, %c0_123] {strides = array<i32: 2, 1>} : memref<784x32xf32, #tpu.memory_space<vmem>>, vector<14x32xf32>
    %c505 = arith.constant 505 : index
    %c0_124 = arith.constant 0 : index
    %145 = tpu.strided_load %arg7[%c505, %c0_124] {strides = array<i32: 2, 1>} : memref<784x32xf32, #tpu.memory_space<vmem>>, vector<14x32xf32>
    %146 = arith.maximumf %144, %145 : vector<14x32xf32>
    %c532 = arith.constant 532 : index
    %c0_125 = arith.constant 0 : index
    %147 = tpu.strided_load %arg7[%c532, %c0_125] {strides = array<i32: 2, 1>} : memref<784x32xf32, #tpu.memory_space<vmem>>, vector<14x32xf32>
    %c533 = arith.constant 533 : index
    %c0_126 = arith.constant 0 : index
    %148 = tpu.strided_load %arg7[%c533, %c0_126] {strides = array<i32: 2, 1>} : memref<784x32xf32, #tpu.memory_space<vmem>>, vector<14x32xf32>
    %149 = arith.maximumf %147, %148 : vector<14x32xf32>
    %150 = arith.maximumf %146, %149 : vector<14x32xf32>
    %c161 = arith.constant 161 : index
    %c0_127 = arith.constant 0 : index
    %151 = vector.load %arg8[%c161, %c0_127] : memref<272x32xf32, #tpu.memory_space<vmem>>, vector<14x32xf32>
    tpu.vector_store %arg8[%c161, %c0_127], %150 {strides = array<i32>} : memref<272x32xf32, #tpu.memory_space<vmem>>, vector<14x32xf32>,
    %c560_128 = arith.constant 560 : index
    %c0_129 = arith.constant 0 : index
    %152 = tpu.strided_load %arg7[%c560_128, %c0_129] {strides = array<i32: 2, 1>} : memref<784x32xf32, #tpu.memory_space<vmem>>, vector<14x32xf32>
    %c561 = arith.constant 561 : index
    %c0_130 = arith.constant 0 : index
    %153 = tpu.strided_load %arg7[%c561, %c0_130] {strides = array<i32: 2, 1>} : memref<784x32xf32, #tpu.memory_space<vmem>>, vector<14x32xf32>
    %154 = arith.maximumf %152, %153 : vector<14x32xf32>
    %c588 = arith.constant 588 : index
    %c0_131 = arith.constant 0 : index
    %155 = tpu.strided_load %arg7[%c588, %c0_131] {strides = array<i32: 2, 1>} : memref<784x32xf32, #tpu.memory_space<vmem>>, vector<14x32xf32>
    %c589 = arith.constant 589 : index
    %c0_132 = arith.constant 0 : index
    %156 = tpu.strided_load %arg7[%c589, %c0_132] {strides = array<i32: 2, 1>} : memref<784x32xf32, #tpu.memory_space<vmem>>, vector<14x32xf32>
    %157 = arith.maximumf %155, %156 : vector<14x32xf32>
    %158 = arith.maximumf %154, %157 : vector<14x32xf32>
    %c177 = arith.constant 177 : index
    %c0_133 = arith.constant 0 : index
    %159 = vector.load %arg8[%c177, %c0_133] : memref<272x32xf32, #tpu.memory_space<vmem>>, vector<14x32xf32>
    tpu.vector_store %arg8[%c177, %c0_133], %158 {strides = array<i32>} : memref<272x32xf32, #tpu.memory_space<vmem>>, vector<14x32xf32>,
    %c616 = arith.constant 616 : index
    %c0_134 = arith.constant 0 : index
    %160 = tpu.strided_load %arg7[%c616, %c0_134] {strides = array<i32: 2, 1>} : memref<784x32xf32, #tpu.memory_space<vmem>>, vector<14x32xf32>
    %c617 = arith.constant 617 : index
    %c0_135 = arith.constant 0 : index
    %161 = tpu.strided_load %arg7[%c617, %c0_135] {strides = array<i32: 2, 1>} : memref<784x32xf32, #tpu.memory_space<vmem>>, vector<14x32xf32>
    %162 = arith.maximumf %160, %161 : vector<14x32xf32>
    %c644 = arith.constant 644 : index
    %c0_136 = arith.constant 0 : index
    %163 = tpu.strided_load %arg7[%c644, %c0_136] {strides = array<i32: 2, 1>} : memref<784x32xf32, #tpu.memory_space<vmem>>, vector<14x32xf32>
    %c645 = arith.constant 645 : index
    %c0_137 = arith.constant 0 : index
    %164 = tpu.strided_load %arg7[%c645, %c0_137] {strides = array<i32: 2, 1>} : memref<784x32xf32, #tpu.memory_space<vmem>>, vector<14x32xf32>
    %165 = arith.maximumf %163, %164 : vector<14x32xf32>
    %166 = arith.maximumf %162, %165 : vector<14x32xf32>
    %c193 = arith.constant 193 : index
    %c0_138 = arith.constant 0 : index
    %167 = vector.load %arg8[%c193, %c0_138] : memref<272x32xf32, #tpu.memory_space<vmem>>, vector<14x32xf32>
    tpu.vector_store %arg8[%c193, %c0_138], %166 {strides = array<i32>} : memref<272x32xf32, #tpu.memory_space<vmem>>, vector<14x32xf32>,
    %c672_139 = arith.constant 672 : index
    %c0_140 = arith.constant 0 : index
    %168 = tpu.strided_load %arg7[%c672_139, %c0_140] {strides = array<i32: 2, 1>} : memref<784x32xf32, #tpu.memory_space<vmem>>, vector<14x32xf32>
    %c673 = arith.constant 673 : index
    %c0_141 = arith.constant 0 : index
    %169 = tpu.strided_load %arg7[%c673, %c0_141] {strides = array<i32: 2, 1>} : memref<784x32xf32, #tpu.memory_space<vmem>>, vector<14x32xf32>
    %170 = arith.maximumf %168, %169 : vector<14x32xf32>
    %c700 = arith.constant 700 : index
    %c0_142 = arith.constant 0 : index
    %171 = tpu.strided_load %arg7[%c700, %c0_142] {strides = array<i32: 2, 1>} : memref<784x32xf32, #tpu.memory_space<vmem>>, vector<14x32xf32>
    %c701 = arith.constant 701 : index
    %c0_143 = arith.constant 0 : index
    %172 = tpu.strided_load %arg7[%c701, %c0_143] {strides = array<i32: 2, 1>} : memref<784x32xf32, #tpu.memory_space<vmem>>, vector<14x32xf32>
    %173 = arith.maximumf %171, %172 : vector<14x32xf32>
    %174 = arith.maximumf %170, %173 : vector<14x32xf32>
    %c209 = arith.constant 209 : index
    %c0_144 = arith.constant 0 : index
    %175 = vector.load %arg8[%c209, %c0_144] : memref<272x32xf32, #tpu.memory_space<vmem>>, vector<14x32xf32>
    tpu.vector_store %arg8[%c209, %c0_144], %174 {strides = array<i32>} : memref<272x32xf32, #tpu.memory_space<vmem>>, vector<14x32xf32>,
    %c728 = arith.constant 728 : index
    %c0_145 = arith.constant 0 : index
    %176 = tpu.strided_load %arg7[%c728, %c0_145] {strides = array<i32: 2, 1>} : memref<784x32xf32, #tpu.memory_space<vmem>>, vector<14x32xf32>
    %c729 = arith.constant 729 : index
    %c0_146 = arith.constant 0 : index
    %177 = tpu.strided_load %arg7[%c729, %c0_146] {strides = array<i32: 2, 1>} : memref<784x32xf32, #tpu.memory_space<vmem>>, vector<14x32xf32>
    %178 = arith.maximumf %176, %177 : vector<14x32xf32>
    %c756 = arith.constant 756 : index
    %c0_147 = arith.constant 0 : index
    %179 = tpu.strided_load %arg7[%c756, %c0_147] {strides = array<i32: 2, 1>} : memref<784x32xf32, #tpu.memory_space<vmem>>, vector<14x32xf32>
    %c757 = arith.constant 757 : index
    %c0_148 = arith.constant 0 : index
    %180 = tpu.strided_load %arg7[%c757, %c0_148] {strides = array<i32: 2, 1>} : memref<784x32xf32, #tpu.memory_space<vmem>>, vector<14x32xf32>
    %181 = arith.maximumf %179, %180 : vector<14x32xf32>
    %182 = arith.maximumf %178, %181 : vector<14x32xf32>
    %c225_149 = arith.constant 225 : index
    %c0_150 = arith.constant 0 : index
    %183 = vector.load %arg8[%c225_149, %c0_150] : memref<272x32xf32, #tpu.memory_space<vmem>>, vector<14x32xf32>
    tpu.vector_store %arg8[%c225_149, %c0_150], %182 {strides = array<i32>} : memref<272x32xf32, #tpu.memory_space<vmem>>, vector<14x32xf32>,
    %cst_151 = arith.constant 0.000000e+00 : f32
    %184 = vector.broadcast %cst_151 : f32 to vector<112x64xf32>
    %c0_152 = arith.constant 0 : index
    %c0_153 = arith.constant 0 : index
    %185 = vector.load %arg5[%c0_152, %c0_153] : memref<1x64xf32, #tpu.memory_space<vmem>>, vector<1x64xf32>
    %186 = vector.broadcast %185 : vector<1x64xf32> to vector<112x64xf32>
    %187 = arith.addf %184, %186 : vector<112x64xf32>
    %c0_154 = arith.constant 0 : index
    %c0_155 = arith.constant 0 : index
    %188 = vector.load %arg8[%c0_154, %c0_155] : memref<272x32xf32, #tpu.memory_space<vmem>>, vector<112x32xf32>
    %c0_156 = arith.constant 0 : index
    %c0_157 = arith.constant 0 : index
    %189 = vector.load %arg4[%c0_156, %c0_157] : memref<288x64xf32, #tpu.memory_space<vmem>>, vector<32x64xf32>
    %cst_158 = arith.constant dense<0.000000e+00> : vector<112x64xf32>
    %190 = tpu.matmul %188, %189, %cst_158 {dimension_numbers = #tpu.dot_dimension_numbers<[1], [0], [0], [1], [0, 0, 1, 1], [], []>} : vector<112x32xf32>, vector<32x64xf32>, vector<112x64xf32> -> vector<112x64xf32>
    %191 = arith.addf %187, %190 : vector<112x64xf32>
    %c1_159 = arith.constant 1 : index
    %c0_160 = arith.constant 0 : index
    %192 = vector.load %arg8[%c1_159, %c0_160] : memref<272x32xf32, #tpu.memory_space<vmem>>, vector<112x32xf32>
    %c32 = arith.constant 32 : index
    %c0_161 = arith.constant 0 : index
    %193 = vector.load %arg4[%c32, %c0_161] : memref<288x64xf32, #tpu.memory_space<vmem>>, vector<32x64xf32>
    %cst_162 = arith.constant dense<0.000000e+00> : vector<112x64xf32>
    %194 = tpu.matmul %192, %193, %cst_162 {dimension_numbers = #tpu.dot_dimension_numbers<[1], [0], [0], [1], [0, 0, 1, 1], [], []>} : vector<112x32xf32>, vector<32x64xf32>, vector<112x64xf32> -> vector<112x64xf32>
    %195 = arith.addf %191, %194 : vector<112x64xf32>
    %c2 = arith.constant 2 : index
    %c0_163 = arith.constant 0 : index
    %196 = vector.load %arg8[%c2, %c0_163] : memref<272x32xf32, #tpu.memory_space<vmem>>, vector<112x32xf32>
    %c64 = arith.constant 64 : index
    %c0_164 = arith.constant 0 : index
    %197 = vector.load %arg4[%c64, %c0_164] : memref<288x64xf32, #tpu.memory_space<vmem>>, vector<32x64xf32>
    %cst_165 = arith.constant dense<0.000000e+00> : vector<112x64xf32>
    %198 = tpu.matmul %196, %197, %cst_165 {dimension_numbers = #tpu.dot_dimension_numbers<[1], [0], [0], [1], [0, 0, 1, 1], [], []>} : vector<112x32xf32>, vector<32x64xf32>, vector<112x64xf32> -> vector<112x64xf32>
    %199 = arith.addf %195, %198 : vector<112x64xf32>
    %c16 = arith.constant 16 : index
    %c0_166 = arith.constant 0 : index
    %200 = vector.load %arg8[%c16, %c0_166] : memref<272x32xf32, #tpu.memory_space<vmem>>, vector<112x32xf32>
    %c96 = arith.constant 96 : index
    %c0_167 = arith.constant 0 : index
    %201 = vector.load %arg4[%c96, %c0_167] : memref<288x64xf32, #tpu.memory_space<vmem>>, vector<32x64xf32>
    %cst_168 = arith.constant dense<0.000000e+00> : vector<112x64xf32>
    %202 = tpu.matmul %200, %201, %cst_168 {dimension_numbers = #tpu.dot_dimension_numbers<[1], [0], [0], [1], [0, 0, 1, 1], [], []>} : vector<112x32xf32>, vector<32x64xf32>, vector<112x64xf32> -> vector<112x64xf32>
    %203 = arith.addf %199, %202 : vector<112x64xf32>
    %c17_169 = arith.constant 17 : index
    %c0_170 = arith.constant 0 : index
    %204 = vector.load %arg8[%c17_169, %c0_170] : memref<272x32xf32, #tpu.memory_space<vmem>>, vector<112x32xf32>
    %c128 = arith.constant 128 : index
    %c0_171 = arith.constant 0 : index
    %205 = vector.load %arg4[%c128, %c0_171] : memref<288x64xf32, #tpu.memory_space<vmem>>, vector<32x64xf32>
    %cst_172 = arith.constant dense<0.000000e+00> : vector<112x64xf32>
    %206 = tpu.matmul %204, %205, %cst_172 {dimension_numbers = #tpu.dot_dimension_numbers<[1], [0], [0], [1], [0, 0, 1, 1], [], []>} : vector<112x32xf32>, vector<32x64xf32>, vector<112x64xf32> -> vector<112x64xf32>
    %207 = arith.addf %203, %206 : vector<112x64xf32>
    %c18 = arith.constant 18 : index
    %c0_173 = arith.constant 0 : index
    %208 = vector.load %arg8[%c18, %c0_173] : memref<272x32xf32, #tpu.memory_space<vmem>>, vector<112x32xf32>
    %c160 = arith.constant 160 : index
    %c0_174 = arith.constant 0 : index
    %209 = vector.load %arg4[%c160, %c0_174] : memref<288x64xf32, #tpu.memory_space<vmem>>, vector<32x64xf32>
    %cst_175 = arith.constant dense<0.000000e+00> : vector<112x64xf32>
    %210 = tpu.matmul %208, %209, %cst_175 {dimension_numbers = #tpu.dot_dimension_numbers<[1], [0], [0], [1], [0, 0, 1, 1], [], []>} : vector<112x32xf32>, vector<32x64xf32>, vector<112x64xf32> -> vector<112x64xf32>
    %211 = arith.addf %207, %210 : vector<112x64xf32>
    %c32_176 = arith.constant 32 : index
    %c0_177 = arith.constant 0 : index
    %212 = vector.load %arg8[%c32_176, %c0_177] : memref<272x32xf32, #tpu.memory_space<vmem>>, vector<112x32xf32>
    %c192 = arith.constant 192 : index
    %c0_178 = arith.constant 0 : index
    %213 = vector.load %arg4[%c192, %c0_178] : memref<288x64xf32, #tpu.memory_space<vmem>>, vector<32x64xf32>
    %cst_179 = arith.constant dense<0.000000e+00> : vector<112x64xf32>
    %214 = tpu.matmul %212, %213, %cst_179 {dimension_numbers = #tpu.dot_dimension_numbers<[1], [0], [0], [1], [0, 0, 1, 1], [], []>} : vector<112x32xf32>, vector<32x64xf32>, vector<112x64xf32> -> vector<112x64xf32>
    %215 = arith.addf %211, %214 : vector<112x64xf32>
    %c33_180 = arith.constant 33 : index
    %c0_181 = arith.constant 0 : index
    %216 = vector.load %arg8[%c33_180, %c0_181] : memref<272x32xf32, #tpu.memory_space<vmem>>, vector<112x32xf32>
    %c224_182 = arith.constant 224 : index
    %c0_183 = arith.constant 0 : index
    %217 = vector.load %arg4[%c224_182, %c0_183] : memref<288x64xf32, #tpu.memory_space<vmem>>, vector<32x64xf32>
    %cst_184 = arith.constant dense<0.000000e+00> : vector<112x64xf32>
    %218 = tpu.matmul %216, %217, %cst_184 {dimension_numbers = #tpu.dot_dimension_numbers<[1], [0], [0], [1], [0, 0, 1, 1], [], []>} : vector<112x32xf32>, vector<32x64xf32>, vector<112x64xf32> -> vector<112x64xf32>
    %219 = arith.addf %215, %218 : vector<112x64xf32>
    %c34 = arith.constant 34 : index
    %c0_185 = arith.constant 0 : index
    %220 = vector.load %arg8[%c34, %c0_185] : memref<272x32xf32, #tpu.memory_space<vmem>>, vector<112x32xf32>
    %c256 = arith.constant 256 : index
    %c0_186 = arith.constant 0 : index
    %221 = vector.load %arg4[%c256, %c0_186] : memref<288x64xf32, #tpu.memory_space<vmem>>, vector<32x64xf32>
    %cst_187 = arith.constant dense<0.000000e+00> : vector<112x64xf32>
    %222 = tpu.matmul %220, %221, %cst_187 {dimension_numbers = #tpu.dot_dimension_numbers<[1], [0], [0], [1], [0, 0, 1, 1], [], []>} : vector<112x32xf32>, vector<32x64xf32>, vector<112x64xf32> -> vector<112x64xf32>
    %223 = arith.addf %219, %222 : vector<112x64xf32>
    %cst_188 = arith.constant 0.000000e+00 : f32
    %224 = vector.broadcast %cst_188 : f32 to vector<112x64xf32>
    %225 = arith.maximumf %223, %224 : vector<112x64xf32>
    %c0_189 = arith.constant 0 : index
    %c0_190 = arith.constant 0 : index
    %226 = vector.load %arg9[%c0_189, %c0_190] : memref<224x64xf32, #tpu.memory_space<vmem>>, vector<112x64xf32>
    tpu.vector_store %arg9[%c0_189, %c0_190], %225 {strides = array<i32>} : memref<224x64xf32, #tpu.memory_space<vmem>>, vector<112x64xf32>,
    %cst_191 = arith.constant 0.000000e+00 : f32
    %227 = vector.broadcast %cst_191 : f32 to vector<112x64xf32>
    %c0_192 = arith.constant 0 : index
    %c0_193 = arith.constant 0 : index
    %228 = vector.load %arg5[%c0_192, %c0_193] : memref<1x64xf32, #tpu.memory_space<vmem>>, vector<1x64xf32>
    %229 = vector.broadcast %228 : vector<1x64xf32> to vector<112x64xf32>
    %230 = arith.addf %227, %229 : vector<112x64xf32>
    %c112_194 = arith.constant 112 : index
    %c0_195 = arith.constant 0 : index
    %231 = vector.load %arg8[%c112_194, %c0_195] : memref<272x32xf32, #tpu.memory_space<vmem>>, vector<112x32xf32>
    %c0_196 = arith.constant 0 : index
    %c0_197 = arith.constant 0 : index
    %232 = vector.load %arg4[%c0_196, %c0_197] : memref<288x64xf32, #tpu.memory_space<vmem>>, vector<32x64xf32>
    %cst_198 = arith.constant dense<0.000000e+00> : vector<112x64xf32>
    %233 = tpu.matmul %231, %232, %cst_198 {dimension_numbers = #tpu.dot_dimension_numbers<[1], [0], [0], [1], [0, 0, 1, 1], [], []>} : vector<112x32xf32>, vector<32x64xf32>, vector<112x64xf32> -> vector<112x64xf32>
    %234 = arith.addf %230, %233 : vector<112x64xf32>
    %c113_199 = arith.constant 113 : index
    %c0_200 = arith.constant 0 : index
    %235 = vector.load %arg8[%c113_199, %c0_200] : memref<272x32xf32, #tpu.memory_space<vmem>>, vector<112x32xf32>
    %c32_201 = arith.constant 32 : index
    %c0_202 = arith.constant 0 : index
    %236 = vector.load %arg4[%c32_201, %c0_202] : memref<288x64xf32, #tpu.memory_space<vmem>>, vector<32x64xf32>
    %cst_203 = arith.constant dense<0.000000e+00> : vector<112x64xf32>
    %237 = tpu.matmul %235, %236, %cst_203 {dimension_numbers = #tpu.dot_dimension_numbers<[1], [0], [0], [1], [0, 0, 1, 1], [], []>} : vector<112x32xf32>, vector<32x64xf32>, vector<112x64xf32> -> vector<112x64xf32>
    %238 = arith.addf %234, %237 : vector<112x64xf32>
    %c114 = arith.constant 114 : index
    %c0_204 = arith.constant 0 : index
    %239 = vector.load %arg8[%c114, %c0_204] : memref<272x32xf32, #tpu.memory_space<vmem>>, vector<112x32xf32>
    %c64_205 = arith.constant 64 : index
    %c0_206 = arith.constant 0 : index
    %240 = vector.load %arg4[%c64_205, %c0_206] : memref<288x64xf32, #tpu.memory_space<vmem>>, vector<32x64xf32>
    %cst_207 = arith.constant dense<0.000000e+00> : vector<112x64xf32>
    %241 = tpu.matmul %239, %240, %cst_207 {dimension_numbers = #tpu.dot_dimension_numbers<[1], [0], [0], [1], [0, 0, 1, 1], [], []>} : vector<112x32xf32>, vector<32x64xf32>, vector<112x64xf32> -> vector<112x64xf32>
    %242 = arith.addf %238, %241 : vector<112x64xf32>
    %c128_208 = arith.constant 128 : index
    %c0_209 = arith.constant 0 : index
    %243 = vector.load %arg8[%c128_208, %c0_209] : memref<272x32xf32, #tpu.memory_space<vmem>>, vector<112x32xf32>
    %c96_210 = arith.constant 96 : index
    %c0_211 = arith.constant 0 : index
    %244 = vector.load %arg4[%c96_210, %c0_211] : memref<288x64xf32, #tpu.memory_space<vmem>>, vector<32x64xf32>
    %cst_212 = arith.constant dense<0.000000e+00> : vector<112x64xf32>
    %245 = tpu.matmul %243, %244, %cst_212 {dimension_numbers = #tpu.dot_dimension_numbers<[1], [0], [0], [1], [0, 0, 1, 1], [], []>} : vector<112x32xf32>, vector<32x64xf32>, vector<112x64xf32> -> vector<112x64xf32>
    %246 = arith.addf %242, %245 : vector<112x64xf32>
    %c129_213 = arith.constant 129 : index
    %c0_214 = arith.constant 0 : index
    %247 = vector.load %arg8[%c129_213, %c0_214] : memref<272x32xf32, #tpu.memory_space<vmem>>, vector<112x32xf32>
    %c128_215 = arith.constant 128 : index
    %c0_216 = arith.constant 0 : index
    %248 = vector.load %arg4[%c128_215, %c0_216] : memref<288x64xf32, #tpu.memory_space<vmem>>, vector<32x64xf32>
    %cst_217 = arith.constant dense<0.000000e+00> : vector<112x64xf32>
    %249 = tpu.matmul %247, %248, %cst_217 {dimension_numbers = #tpu.dot_dimension_numbers<[1], [0], [0], [1], [0, 0, 1, 1], [], []>} : vector<112x32xf32>, vector<32x64xf32>, vector<112x64xf32> -> vector<112x64xf32>
    %250 = arith.addf %246, %249 : vector<112x64xf32>
    %c130 = arith.constant 130 : index
    %c0_218 = arith.constant 0 : index
    %251 = vector.load %arg8[%c130, %c0_218] : memref<272x32xf32, #tpu.memory_space<vmem>>, vector<112x32xf32>
    %c160_219 = arith.constant 160 : index
    %c0_220 = arith.constant 0 : index
    %252 = vector.load %arg4[%c160_219, %c0_220] : memref<288x64xf32, #tpu.memory_space<vmem>>, vector<32x64xf32>
    %cst_221 = arith.constant dense<0.000000e+00> : vector<112x64xf32>
    %253 = tpu.matmul %251, %252, %cst_221 {dimension_numbers = #tpu.dot_dimension_numbers<[1], [0], [0], [1], [0, 0, 1, 1], [], []>} : vector<112x32xf32>, vector<32x64xf32>, vector<112x64xf32> -> vector<112x64xf32>
    %254 = arith.addf %250, %253 : vector<112x64xf32>
    %c144 = arith.constant 144 : index
    %c0_222 = arith.constant 0 : index
    %255 = vector.load %arg8[%c144, %c0_222] : memref<272x32xf32, #tpu.memory_space<vmem>>, vector<112x32xf32>
    %c192_223 = arith.constant 192 : index
    %c0_224 = arith.constant 0 : index
    %256 = vector.load %arg4[%c192_223, %c0_224] : memref<288x64xf32, #tpu.memory_space<vmem>>, vector<32x64xf32>
    %cst_225 = arith.constant dense<0.000000e+00> : vector<112x64xf32>
    %257 = tpu.matmul %255, %256, %cst_225 {dimension_numbers = #tpu.dot_dimension_numbers<[1], [0], [0], [1], [0, 0, 1, 1], [], []>} : vector<112x32xf32>, vector<32x64xf32>, vector<112x64xf32> -> vector<112x64xf32>
    %258 = arith.addf %254, %257 : vector<112x64xf32>
    %c145_226 = arith.constant 145 : index
    %c0_227 = arith.constant 0 : index
    %259 = vector.load %arg8[%c145_226, %c0_227] : memref<272x32xf32, #tpu.memory_space<vmem>>, vector<112x32xf32>
    %c224_228 = arith.constant 224 : index
    %c0_229 = arith.constant 0 : index
    %260 = vector.load %arg4[%c224_228, %c0_229] : memref<288x64xf32, #tpu.memory_space<vmem>>, vector<32x64xf32>
    %cst_230 = arith.constant dense<0.000000e+00> : vector<112x64xf32>
    %261 = tpu.matmul %259, %260, %cst_230 {dimension_numbers = #tpu.dot_dimension_numbers<[1], [0], [0], [1], [0, 0, 1, 1], [], []>} : vector<112x32xf32>, vector<32x64xf32>, vector<112x64xf32> -> vector<112x64xf32>
    %262 = arith.addf %258, %261 : vector<112x64xf32>
    %c146 = arith.constant 146 : index
    %c0_231 = arith.constant 0 : index
    %263 = vector.load %arg8[%c146, %c0_231] : memref<272x32xf32, #tpu.memory_space<vmem>>, vector<112x32xf32>
    %c256_232 = arith.constant 256 : index
    %c0_233 = arith.constant 0 : index
    %264 = vector.load %arg4[%c256_232, %c0_233] : memref<288x64xf32, #tpu.memory_space<vmem>>, vector<32x64xf32>
    %cst_234 = arith.constant dense<0.000000e+00> : vector<112x64xf32>
    %265 = tpu.matmul %263, %264, %cst_234 {dimension_numbers = #tpu.dot_dimension_numbers<[1], [0], [0], [1], [0, 0, 1, 1], [], []>} : vector<112x32xf32>, vector<32x64xf32>, vector<112x64xf32> -> vector<112x64xf32>
    %266 = arith.addf %262, %265 : vector<112x64xf32>
    %cst_235 = arith.constant 0.000000e+00 : f32
    %267 = vector.broadcast %cst_235 : f32 to vector<112x64xf32>
    %268 = arith.maximumf %266, %267 : vector<112x64xf32>
    %c112_236 = arith.constant 112 : index
    %c0_237 = arith.constant 0 : index
    %269 = vector.load %arg9[%c112_236, %c0_237] : memref<224x64xf32, #tpu.memory_space<vmem>>, vector<112x64xf32>
    tpu.vector_store %arg9[%c112_236, %c0_237], %268 {strides = array<i32>} : memref<224x64xf32, #tpu.memory_space<vmem>>, vector<112x64xf32>,
    %c0_238 = arith.constant 0 : index
    %c0_239 = arith.constant 0 : index
    %270 = tpu.strided_load %arg9[%c0_238, %c0_239] {strides = array<i32: 2, 1>} : memref<224x64xf32, #tpu.memory_space<vmem>>, vector<7x64xf32>
    %c1_240 = arith.constant 1 : index
    %c0_241 = arith.constant 0 : index
    %271 = tpu.strided_load %arg9[%c1_240, %c0_241] {strides = array<i32: 2, 1>} : memref<224x64xf32, #tpu.memory_space<vmem>>, vector<7x64xf32>
    %272 = arith.maximumf %270, %271 : vector<7x64xf32>
    %c16_242 = arith.constant 16 : index
    %c0_243 = arith.constant 0 : index
    %273 = tpu.strided_load %arg9[%c16_242, %c0_243] {strides = array<i32: 2, 1>} : memref<224x64xf32, #tpu.memory_space<vmem>>, vector<7x64xf32>
    %c17_244 = arith.constant 17 : index
    %c0_245 = arith.constant 0 : index
    %274 = tpu.strided_load %arg9[%c17_244, %c0_245] {strides = array<i32: 2, 1>} : memref<224x64xf32, #tpu.memory_space<vmem>>, vector<7x64xf32>
    %275 = arith.maximumf %273, %274 : vector<7x64xf32>
    %276 = arith.maximumf %272, %275 : vector<7x64xf32>
    %277 = arith.truncf %276 : vector<7x64xf32> to vector<7x64xbf16>
    %c0_246 = arith.constant 0 : index
    %c0_247 = arith.constant 0 : index
    %c0_248 = arith.constant 0 : index
    %278 = vector.load %arg6[%c0_246, %c0_247, %c0_248] : memref<1x49x64xbf16, #tpu.memory_space<vmem>>, vector<1x7x64xbf16>
    %279 = vector.shape_cast %278 : vector<1x7x64xbf16> to vector<7x64xbf16>
    %280 = vector.shape_cast %277 : vector<7x64xbf16> to vector<1x7x64xbf16>
    tpu.vector_store %arg6[%c0_246, %c0_247, %c0_248], %280 {strides = array<i32>} : memref<1x49x64xbf16, #tpu.memory_space<vmem>>, vector<1x7x64xbf16>,
    %c32_249 = arith.constant 32 : index
    %c0_250 = arith.constant 0 : index
    %281 = tpu.strided_load %arg9[%c32_249, %c0_250] {strides = array<i32: 2, 1>} : memref<224x64xf32, #tpu.memory_space<vmem>>, vector<7x64xf32>
    %c33_251 = arith.constant 33 : index
    %c0_252 = arith.constant 0 : index
    %282 = tpu.strided_load %arg9[%c33_251, %c0_252] {strides = array<i32: 2, 1>} : memref<224x64xf32, #tpu.memory_space<vmem>>, vector<7x64xf32>
    %283 = arith.maximumf %281, %282 : vector<7x64xf32>
    %c48 = arith.constant 48 : index
    %c0_253 = arith.constant 0 : index
    %284 = tpu.strided_load %arg9[%c48, %c0_253] {strides = array<i32: 2, 1>} : memref<224x64xf32, #tpu.memory_space<vmem>>, vector<7x64xf32>
    %c49_254 = arith.constant 49 : index
    %c0_255 = arith.constant 0 : index
    %285 = tpu.strided_load %arg9[%c49_254, %c0_255] {strides = array<i32: 2, 1>} : memref<224x64xf32, #tpu.memory_space<vmem>>, vector<7x64xf32>
    %286 = arith.maximumf %284, %285 : vector<7x64xf32>
    %287 = arith.maximumf %283, %286 : vector<7x64xf32>
    %288 = arith.truncf %287 : vector<7x64xf32> to vector<7x64xbf16>
    %c0_256 = arith.constant 0 : index
    %c7 = arith.constant 7 : index
    %c0_257 = arith.constant 0 : index
    %289 = vector.load %arg6[%c0_256, %c7, %c0_257] : memref<1x49x64xbf16, #tpu.memory_space<vmem>>, vector<1x7x64xbf16>
    %290 = vector.shape_cast %289 : vector<1x7x64xbf16> to vector<7x64xbf16>
    %291 = vector.shape_cast %288 : vector<7x64xbf16> to vector<1x7x64xbf16>
    tpu.vector_store %arg6[%c0_256, %c7, %c0_257], %291 {strides = array<i32>} : memref<1x49x64xbf16, #tpu.memory_space<vmem>>, vector<1x7x64xbf16>,
    %c64_258 = arith.constant 64 : index
    %c0_259 = arith.constant 0 : index
    %292 = tpu.strided_load %arg9[%c64_258, %c0_259] {strides = array<i32: 2, 1>} : memref<224x64xf32, #tpu.memory_space<vmem>>, vector<7x64xf32>
    %c65_260 = arith.constant 65 : index
    %c0_261 = arith.constant 0 : index
    %293 = tpu.strided_load %arg9[%c65_260, %c0_261] {strides = array<i32: 2, 1>} : memref<224x64xf32, #tpu.memory_space<vmem>>, vector<7x64xf32>
    %294 = arith.maximumf %292, %293 : vector<7x64xf32>
    %c80 = arith.constant 80 : index
    %c0_262 = arith.constant 0 : index
    %295 = tpu.strided_load %arg9[%c80, %c0_262] {strides = array<i32: 2, 1>} : memref<224x64xf32, #tpu.memory_space<vmem>>, vector<7x64xf32>
    %c81_263 = arith.constant 81 : index
    %c0_264 = arith.constant 0 : index
    %296 = tpu.strided_load %arg9[%c81_263, %c0_264] {strides = array<i32: 2, 1>} : memref<224x64xf32, #tpu.memory_space<vmem>>, vector<7x64xf32>
    %297 = arith.maximumf %295, %296 : vector<7x64xf32>
    %298 = arith.maximumf %294, %297 : vector<7x64xf32>
    %299 = arith.truncf %298 : vector<7x64xf32> to vector<7x64xbf16>
    %c0_265 = arith.constant 0 : index
    %c14 = arith.constant 14 : index
    %c0_266 = arith.constant 0 : index
    %300 = vector.load %arg6[%c0_265, %c14, %c0_266] : memref<1x49x64xbf16, #tpu.memory_space<vmem>>, vector<1x7x64xbf16>
    %301 = vector.shape_cast %300 : vector<1x7x64xbf16> to vector<7x64xbf16>
    %302 = vector.shape_cast %299 : vector<7x64xbf16> to vector<1x7x64xbf16>
    tpu.vector_store %arg6[%c0_265, %c14, %c0_266], %302 {strides = array<i32>} : memref<1x49x64xbf16, #tpu.memory_space<vmem>>, vector<1x7x64xbf16>,
    %c96_267 = arith.constant 96 : index
    %c0_268 = arith.constant 0 : index
    %303 = tpu.strided_load %arg9[%c96_267, %c0_268] {strides = array<i32: 2, 1>} : memref<224x64xf32, #tpu.memory_space<vmem>>, vector<7x64xf32>
    %c97_269 = arith.constant 97 : index
    %c0_270 = arith.constant 0 : index
    %304 = tpu.strided_load %arg9[%c97_269, %c0_270] {strides = array<i32: 2, 1>} : memref<224x64xf32, #tpu.memory_space<vmem>>, vector<7x64xf32>
    %305 = arith.maximumf %303, %304 : vector<7x64xf32>
    %c112_271 = arith.constant 112 : index
    %c0_272 = arith.constant 0 : index
    %306 = tpu.strided_load %arg9[%c112_271, %c0_272] {strides = array<i32: 2, 1>} : memref<224x64xf32, #tpu.memory_space<vmem>>, vector<7x64xf32>
    %c113_273 = arith.constant 113 : index
    %c0_274 = arith.constant 0 : index
    %307 = tpu.strided_load %arg9[%c113_273, %c0_274] {strides = array<i32: 2, 1>} : memref<224x64xf32, #tpu.memory_space<vmem>>, vector<7x64xf32>
    %308 = arith.maximumf %306, %307 : vector<7x64xf32>
    %309 = arith.maximumf %305, %308 : vector<7x64xf32>
    %310 = arith.truncf %309 : vector<7x64xf32> to vector<7x64xbf16>
    %c0_275 = arith.constant 0 : index
    %c21 = arith.constant 21 : index
    %c0_276 = arith.constant 0 : index
    %311 = vector.load %arg6[%c0_275, %c21, %c0_276] : memref<1x49x64xbf16, #tpu.memory_space<vmem>>, vector<1x7x64xbf16>
    %312 = vector.shape_cast %311 : vector<1x7x64xbf16> to vector<7x64xbf16>
    %313 = vector.shape_cast %310 : vector<7x64xbf16> to vector<1x7x64xbf16>
    tpu.vector_store %arg6[%c0_275, %c21, %c0_276], %313 {strides = array<i32>} : memref<1x49x64xbf16, #tpu.memory_space<vmem>>, vector<1x7x64xbf16>,
    %c128_277 = arith.constant 128 : index
    %c0_278 = arith.constant 0 : index
    %314 = tpu.strided_load %arg9[%c128_277, %c0_278] {strides = array<i32: 2, 1>} : memref<224x64xf32, #tpu.memory_space<vmem>>, vector<7x64xf32>
    %c129_279 = arith.constant 129 : index
    %c0_280 = arith.constant 0 : index
    %315 = tpu.strided_load %arg9[%c129_279, %c0_280] {strides = array<i32: 2, 1>} : memref<224x64xf32, #tpu.memory_space<vmem>>, vector<7x64xf32>
    %316 = arith.maximumf %314, %315 : vector<7x64xf32>
    %c144_281 = arith.constant 144 : index
    %c0_282 = arith.constant 0 : index
    %317 = tpu.strided_load %arg9[%c144_281, %c0_282] {strides = array<i32: 2, 1>} : memref<224x64xf32, #tpu.memory_space<vmem>>, vector<7x64xf32>
    %c145_283 = arith.constant 145 : index
    %c0_284 = arith.constant 0 : index
    %318 = tpu.strided_load %arg9[%c145_283, %c0_284] {strides = array<i32: 2, 1>} : memref<224x64xf32, #tpu.memory_space<vmem>>, vector<7x64xf32>
    %319 = arith.maximumf %317, %318 : vector<7x64xf32>
    %320 = arith.maximumf %316, %319 : vector<7x64xf32>
    %321 = arith.truncf %320 : vector<7x64xf32> to vector<7x64xbf16>
    %c0_285 = arith.constant 0 : index
    %c28_286 = arith.constant 28 : index
    %c0_287 = arith.constant 0 : index
    %322 = vector.load %arg6[%c0_285, %c28_286, %c0_287] : memref<1x49x64xbf16, #tpu.memory_space<vmem>>, vector<1x7x64xbf16>
    %323 = vector.shape_cast %322 : vector<1x7x64xbf16> to vector<7x64xbf16>
    %324 = vector.shape_cast %321 : vector<7x64xbf16> to vector<1x7x64xbf16>
    tpu.vector_store %arg6[%c0_285, %c28_286, %c0_287], %324 {strides = array<i32>} : memref<1x49x64xbf16, #tpu.memory_space<vmem>>, vector<1x7x64xbf16>,
    %c160_288 = arith.constant 160 : index
    %c0_289 = arith.constant 0 : index
    %325 = tpu.strided_load %arg9[%c160_288, %c0_289] {strides = array<i32: 2, 1>} : memref<224x64xf32, #tpu.memory_space<vmem>>, vector<7x64xf32>
    %c161_290 = arith.constant 161 : index
    %c0_291 = arith.constant 0 : index
    %326 = tpu.strided_load %arg9[%c161_290, %c0_291] {strides = array<i32: 2, 1>} : memref<224x64xf32, #tpu.memory_space<vmem>>, vector<7x64xf32>
    %327 = arith.maximumf %325, %326 : vector<7x64xf32>
    %c176 = arith.constant 176 : index
    %c0_292 = arith.constant 0 : index
    %328 = tpu.strided_load %arg9[%c176, %c0_292] {strides = array<i32: 2, 1>} : memref<224x64xf32, #tpu.memory_space<vmem>>, vector<7x64xf32>
    %c177_293 = arith.constant 177 : index
    %c0_294 = arith.constant 0 : index
    %329 = tpu.strided_load %arg9[%c177_293, %c0_294] {strides = array<i32: 2, 1>} : memref<224x64xf32, #tpu.memory_space<vmem>>, vector<7x64xf32>
    %330 = arith.maximumf %328, %329 : vector<7x64xf32>
    %331 = arith.maximumf %327, %330 : vector<7x64xf32>
    %332 = arith.truncf %331 : vector<7x64xf32> to vector<7x64xbf16>
    %c0_295 = arith.constant 0 : index
    %c35 = arith.constant 35 : index
    %c0_296 = arith.constant 0 : index
    %333 = vector.load %arg6[%c0_295, %c35, %c0_296] : memref<1x49x64xbf16, #tpu.memory_space<vmem>>, vector<1x7x64xbf16>
    %334 = vector.shape_cast %333 : vector<1x7x64xbf16> to vector<7x64xbf16>
    %335 = vector.shape_cast %332 : vector<7x64xbf16> to vector<1x7x64xbf16>
    tpu.vector_store %arg6[%c0_295, %c35, %c0_296], %335 {strides = array<i32>} : memref<1x49x64xbf16, #tpu.memory_space<vmem>>, vector<1x7x64xbf16>,
    %c192_297 = arith.constant 192 : index
    %c0_298 = arith.constant 0 : index
    %336 = tpu.strided_load %arg9[%c192_297, %c0_298] {strides = array<i32: 2, 1>} : memref<224x64xf32, #tpu.memory_space<vmem>>, vector<7x64xf32>
    %c193_299 = arith.constant 193 : index
    %c0_300 = arith.constant 0 : index
    %337 = tpu.strided_load %arg9[%c193_299, %c0_300] {strides = array<i32: 2, 1>} : memref<224x64xf32, #tpu.memory_space<vmem>>, vector<7x64xf32>
    %338 = arith.maximumf %336, %337 : vector<7x64xf32>
    %c208 = arith.constant 208 : index
    %c0_301 = arith.constant 0 : index
    %339 = tpu.strided_load %arg9[%c208, %c0_301] {strides = array<i32: 2, 1>} : memref<224x64xf32, #tpu.memory_space<vmem>>, vector<7x64xf32>
    %c209_302 = arith.constant 209 : index
    %c0_303 = arith.constant 0 : index
    %340 = tpu.strided_load %arg9[%c209_302, %c0_303] {strides = array<i32: 2, 1>} : memref<224x64xf32, #tpu.memory_space<vmem>>, vector<7x64xf32>
    %341 = arith.maximumf %339, %340 : vector<7x64xf32>
    %342 = arith.maximumf %338, %341 : vector<7x64xf32>
    %343 = arith.truncf %342 : vector<7x64xf32> to vector<7x64xbf16>
    %c0_304 = arith.constant 0 : index
    %c42 = arith.constant 42 : index
    %c0_305 = arith.constant 0 : index
    %344 = vector.load %arg6[%c0_304, %c42, %c0_305] : memref<1x49x64xbf16, #tpu.memory_space<vmem>>, vector<1x7x64xbf16>
    %345 = vector.shape_cast %344 : vector<1x7x64xbf16> to vector<7x64xbf16>
    %346 = vector.shape_cast %343 : vector<7x64xbf16> to vector<1x7x64xbf16>
    tpu.vector_store %arg6[%c0_304, %c42, %c0_305], %346 {strides = array<i32>} : memref<1x49x64xbf16, #tpu.memory_space<vmem>>, vector<1x7x64xbf16>,
    return
  }
  func.func @transform_0(%arg0: i32) -> (i32, i32, i32) {
    %c0_i32 = arith.constant 0 : i32
    %c0_i32_0 = arith.constant 0 : i32
    %c0_i32_1 = arith.constant 0 : i32
    return %arg0, %c0_i32, %c0_i32_0 : i32, i32, i32
  }
  func.func @transform_1(%arg0: i32) -> (i32, i32) {
    %c0_i32 = arith.constant 0 : i32
    %c0_i32_0 = arith.constant 0 : i32
    %c0_i32_1 = arith.constant 0 : i32
    return %c0_i32, %c0_i32_0 : i32, i32
  }
  func.func @transform_2(%arg0: i32) -> (i32, i32) {
    %c0_i32 = arith.constant 0 : i32
    %c0_i32_0 = arith.constant 0 : i32
    %c0_i32_1 = arith.constant 0 : i32
    return %c0_i32, %c0_i32_0 : i32, i32
  }
  func.func @transform_3(%arg0: i32) -> (i32, i32) {
    %c0_i32 = arith.constant 0 : i32
    %c0_i32_0 = arith.constant 0 : i32
    %c0_i32_1 = arith.constant 0 : i32
    return %c0_i32, %c0_i32_0 : i32, i32
  }
  func.func @transform_4(%arg0: i32) -> (i32, i32) {
    %c0_i32 = arith.constant 0 : i32
    %c0_i32_0 = arith.constant 0 : i32
    %c0_i32_1 = arith.constant 0 : i32
    return %c0_i32, %c0_i32_0 : i32, i32
  }
  func.func @transform_5(%arg0: i32) -> (i32, i32, i32) {
    %c0_i32 = arith.constant 0 : i32
    %c0_i32_0 = arith.constant 0 : i32
    %c0_i32_1 = arith.constant 0 : i32
    return %arg0, %c0_i32, %c0_i32_0 : i32, i32, i32
  }
}

</mosaic_0001>

<bundles_post_ra>
// kernel: emnist_forward.3
= control target key start
LH: loop header
LB: loop body
LE: loop exit
PB: predicated region body
PF: predicated region fallthrough
CT: control target
= control target key end

     0   :  { %v433_v27 = vlaneseq  ;;  %v3198_v35 = vmov 1966171168   ;;  %s3924_s0 = inlined_call_operand.vmem [shape: bf16[2,3136], index: 0, kind: input, shape index: {}]   ;;  %s3925_s1 = inlined_call_operand.vmem [shape: bf16[3136,128], index: 1, kind: input, shape index: {}]   ;;  %s3926_s2 = inlined_call_operand.vmem [shape: f32[1,128], index: 2, kind: input, shape index: {}]   ;;  %s3927_s3 = inlined_call_operand.vmem [shape: bf16[128,62], index: 3, kind: input, shape index: {}]   ;;  %s3928_s4 = inlined_call_operand.vmem [shape: f32[1,62], index: 4, kind: input, shape index: {}]   ;;  %s3929_s5 = inlined_call_operand.hbm [shape: f32[2,62], index: 5, kind: output, shape index: {}]  }
   0x1   :  { %v2967_v0 = vld [vmem:[%s3925_s1 + $0x40] sm:$0xff]   ;;  %v2971_v4 = vld [vmem:[%s3925_s1 + $0x48] sm:$0xff]   ;;  %v2975_v8 = vld [vmem:[%s3925_s1 + $0x50] sm:$0xff]   ;;  %v431_v36 = vunpack.c.l.s4 %v3198_v35 }
   0x2   :  { %v2968_v1 = vld [vmem:[%s3925_s1] sm:$0xff]   ;;  %2653 = vmatprep.subr.bf16.mxu0 %v2967_v0  ;;  %v2972_v5 = vld [vmem:[%s3925_s1 + $0x8] sm:$0xff]   ;;  %v2976_v9 = vld [vmem:[%s3925_s1 + $0x10] sm:$0xff]   ;;  %v434_v32 = vshrl.u32 %v433_v27, 7 }
   0x3   :  { %v2969_v2 = vld [vmem:[%s3925_s1 + $0xc0] sm:$0xff]   ;;  %2654 = vmatpush3.bf16.msra.mxu0 %v2968_v1  ;;  %v2973_v6 = vld [vmem:[%s3925_s1 + $0xc8] sm:$0xff]   ;;  %v2977_v10 = vld [vmem:[%s3925_s1 + $0xd0] sm:$0xff]   ;;  %v432_v39 = vunpack.c.0.s8 %v431_v36 }
   0x4   :  { %v2970_v3 = vld [vmem:[%s3925_s1 + $0x80] sm:$0xff]   ;;  %2675 = vmatprep.subr.bf16.mxu1 %v2969_v2  ;;  %2655 = vmatprep.subr.bf16.mxu0 %v2971_v4  ;;  %v2974_v7 = vld [vmem:[%s3925_s1 + $0x88] sm:$0xff]   ;;  %v2978_v11 = vld [vmem:[%s3925_s1 + $0x90] sm:$0xff]  }
   0x5   :  { %2676 = vmatpush3.bf16.msra.mxu1 %v2970_v3  ;;  %v2979_v12 = vld [vmem:[%s3925_s1 + $0x58] sm:$0xff]   ;;  %v2983_v16 = vld [vmem:[%s3925_s1 + $0x60] sm:$0xff]   ;;  %v2987_v20 = vld [vmem:[%s3925_s1 + $0x68] sm:$0xff]   ;;  %v3337_v41 = vsub.s32 %v432_v39, %v434_v32 }
   0x6   :  { %2677 = vmatprep.subr.bf16.mxu1 %v2973_v6  ;;  %v2980_v13 = vld [vmem:[%s3925_s1 + $0x18] sm:$0xff]   ;;  %v2984_v17 = vld [vmem:[%s3925_s1 + $0x20] sm:$0xff]   ;;  %v2988_v21 = vld [vmem:[%s3925_s1 + $0x28] sm:$0xff]  }
   0x7   :  { %2656 = vmatpush3.bf16.msra.mxu0 %v2972_v5  ;;  %v2981_v14 = vld [vmem:[%s3925_s1 + $0xd8] sm:$0xff]   ;;  %v2985_v18 = vld [vmem:[%s3925_s1 + $0xe0] sm:$0xff]   ;;  %v2989_v22 = vld [vmem:[%s3925_s1 + $0xe8] sm:$0xff]  }
   0x8   :  { %2657 = vmatprep.subr.bf16.mxu0 %v2975_v8  ;;  %v2982_v15 = vld [vmem:[%s3925_s1 + $0x98] sm:$0xff]   ;;  %v2986_v19 = vld [vmem:[%s3925_s1 + $0xa0] sm:$0xff]   ;;  %v2990_v23 = vld [vmem:[%s3925_s1 + $0xa8] sm:$0xff]  }
   0x9   :  { %2678 = vmatpush3.bf16.msra.mxu1 %v2974_v7  ;;  %v2991_v24 = vld [vmem:[%s3925_s1 + $0x70] sm:$0xff]   ;;  %v2995_v29 = vld [vmem:[%s3925_s1 + $0x78] sm:$0xff]   ;;  %v22_v33 = vld [vmem:[%s3924_s0] sm:$0xff] }
   0xa   :  { %2679 = vmatprep.subr.bf16.mxu1 %v2977_v10  ;;  %v2992_v25 = vld [vmem:[%s3925_s1 + $0x30] sm:$0xff]   ;;  %v2996_v30 = vld [vmem:[%s3925_s1 + $0x38] sm:$0xff]   ;;  %v3000_v37 = vld [vmem:[%s3925_s1 + $0x140] sm:$0xff]   ;;  %v429_v38 = vcombine.high %v22_v33, %v22_v33  ;;  %v436_v42 = vrot.slane %v22_v33, %v3337_v41 }
   0xb   :  { %2658 = vmatpush3.bf16.msra.mxu0 %v2976_v9  ;;  %v2993_v26 = vld [vmem:[%s3925_s1 + $0xf0] sm:$0xff]   ;;  %v2997_v31 = vld [vmem:[%s3925_s1 + $0xf8] sm:$0xff]   ;;  %v3002_v40 = vld [vmem:[%s3925_s1 + $0x1c0] sm:$0xff]  }
   0xc   :  { %2659 = vmatprep.subr.bf16.mxu0 %v2979_v12  ;;  %v2994_v28 = vld [vmem:[%s3925_s1 + $0xb0] sm:$0xff]   ;;  %v2999_v34 = vld [vmem:[%s3925_s1 + $0xb8] sm:$0xff]   ;;  %v3341_v43 = vrot.slane %v429_v38, %v3337_v41  ;;  %v444_v44 = vcombine.high %v436_v42, %v436_v42  ;;  %v452_v45 = vrot.slane %v436_v42, %v3337_v41  ;;  %v3001_v48 = vld [vmem:[%s3925_s1 + $0x100] sm:$0xff]  }
   0xd   :  { %2680 = vmatpush3.bf16.msra.mxu1 %v2978_v11  ;;  %v3004_v51 = vld [vmem:[%s3925_s1 + $0x148] sm:$0xff]   ;;  %v3003_v53 = vld [vmem:[%s3925_s1 + $0x180] sm:$0xff]   ;;  %v3008_v57 = vld [vmem:[%s3925_s1 + $0x150] sm:$0xff]  }
   0xe   :  { %2681 = vmatprep.subr.bf16.mxu1 %v2981_v14  ;;  %v445_v46 = vcombine.high %v3341_v43, %v3341_v43  ;;  %v466_v47 = vrot.slane %v444_v44, %v3337_v41  ;;  %v474_v50 = vcombine.high %v452_v45, %v452_v45  ;;  %v3006_v54 = vld [vmem:[%s3925_s1 + $0x1c8] sm:$0xff]   ;;  %v3010_v59 = vld [vmem:[%s3925_s1 + $0x1d0] sm:$0xff]   ;;  %v3012_v61 = vld [vmem:[%s3925_s1 + $0x158] sm:$0xff]  }
   0xf   :  { %2660 = vmatpush3.bf16.msra.mxu0 %v2980_v13  ;;  %v3005_v56 = vld [vmem:[%s3925_s1 + $0x108] sm:$0xff]   ;;  %v3009_v60 = vld [vmem:[%s3925_s1 + $0x110] sm:$0xff]   ;;  %v3014_v63 = vld [vmem:[%s3925_s1 + $0x1d8] sm:$0xff]  }
  0x10   :  { %2661 = vmatprep.subr.bf16.mxu0 %v2983_v16  ;;  %v473_v49 = vrot.slane %v445_v46, %v3337_v41  ;;  %1826 = vmatprep.mubr.bf16.mxu0 %v466_v47  ;;  %v476_v52 = vcombine.high %v466_v47, %v466_v47  ;;  %v3007_v58 = vld [vmem:[%s3925_s1 + $0x188] sm:$0xff]   ;;  %v3011_v62 = vld [vmem:[%s3925_s1 + $0x190] sm:$0xff]   ;;  %v3013_v0 = vld [vmem:[%s3925_s1 + $0x118] sm:$0xff]  }
  0x11   :  { %2682 = vmatpush3.bf16.msra.mxu1 %v2982_v15  ;;  %v3016_v1 = vld [vmem:[%s3925_s1 + $0x160] sm:$0xff]   ;;  %v3015_v2 = vld [vmem:[%s3925_s1 + $0x198] sm:$0xff]   ;;  %v3020_v5 = vld [vmem:[%s3925_s1 + $0x168] sm:$0xff]  }
  0x12   :  { %2683 = vmatprep.subr.bf16.mxu1 %v2985_v18  ;;  %v477_v55 = vcombine.high %v473_v49, %v473_v49  ;;  %1866 = vmatprep.mubr.bf16.mxu1 %v476_v52  ;;  %v3018_v3 = vld [vmem:[%s3925_s1 + $0x1e0] sm:$0xff]   ;;  %v3022_v7 = vld [vmem:[%s3925_s1 + $0x1e8] sm:$0xff]   ;;  %v3024_v9 = vld [vmem:[%s3925_s1 + $0x170] sm:$0xff]  }
  0x13   :  { %2662 = vmatpush3.bf16.msra.mxu0 %v2984_v17  ;;  %v3017_v4 = vld [vmem:[%s3925_s1 + $0x120] sm:$0xff]   ;;  %v3021_v8 = vld [vmem:[%s3925_s1 + $0x128] sm:$0xff]   ;;  %v3026_v11 = vld [vmem:[%s3925_s1 + $0x1f0] sm:$0xff]   ;;  %v459_v17 = vrot.slane %v3341_v43, %v3337_v41 }
  0x14   :  { %2663 = vmatprep.subr.bf16.mxu0 %v2987_v20  ;;  %v3019_v6 = vld [vmem:[%s3925_s1 + $0x1a0] sm:$0xff]   ;;  %v3023_v10 = vld [vmem:[%s3925_s1 + $0x1a8] sm:$0xff]   ;;  %v3025_v12 = vld [vmem:[%s3925_s1 + $0x130] sm:$0xff]  }
  0x15   :  { %2684 = vmatpush3.bf16.msra.mxu1 %v2986_v19  ;;  %v3028_v13 = vld [vmem:[%s3925_s1 + $0x178] sm:$0xff]   ;;  %v3027_v14 = vld [vmem:[%s3925_s1 + $0x1b0] sm:$0xff]   ;;  %v3032_v18 = vld [vmem:[%s3925_s1 + $0x240] sm:$0xff]  }
  0x16   :  { %2685 = vmatprep.subr.bf16.mxu1 %v2989_v22  ;;  %v3030_v15 = vld [vmem:[%s3925_s1 + $0x1f8] sm:$0xff]   ;;  %v3034_v20 = vld [vmem:[%s3925_s1 + $0x2c0] sm:$0xff]   ;;  %v475_v22 = vcombine.high %v459_v17, %v459_v17  ;;  %v3040_v27 = vld [vmem:[%s3925_s1 + $0x250] sm:$0xff]  }
  0x17   :  { %2664 = vmatpush3.bf16.msra.mxu0 %v2988_v21  ;;  %v3029_v16 = vld [vmem:[%s3925_s1 + $0x138] sm:$0xff]   ;;  %v3033_v21 = vld [vmem:[%s3925_s1 + $0x200] sm:$0xff]   ;;  %v3043_v32 = vld [vmem:[%s3925_s1 + $0x290] sm:$0xff]  }
  0x18   :  { %2665 = vmatprep.subr.bf16.mxu0 %v2991_v24  ;;  %v3031_v19 = vld [vmem:[%s3925_s1 + $0x1b8] sm:$0xff]   ;;  %v3035_v24 = vld [vmem:[%s3925_s1 + $0x280] sm:$0xff]   ;;  %v3052_v39 = vld [vmem:[%s3925_s1 + $0x268] sm:$0xff]  }
  0x19   :  { %2686 = vmatpush3.bf16.msra.mxu1 %v2990_v23  ;;  %v3036_v23 = vld [vmem:[%s3925_s1 + $0x248] sm:$0xff]   ;;  %v3046_v33 = vld [vmem:[%s3925_s1 + $0x2d8] sm:$0xff]   ;;  %v3048_v35 = vld [vmem:[%s3925_s1 + $0x260] sm:$0xff]  }
  0x1a   :  { %2687 = vmatprep.subr.bf16.mxu1 %v2993_v26  ;;  %v3037_v26 = vld [vmem:[%s3925_s1 + $0x208] sm:$0xff]   ;;  %v3047_v36 = vld [vmem:[%s3925_s1 + $0x298] sm:$0xff]   ;;  %v3049_v38 = vld [vmem:[%s3925_s1 + $0x220] sm:$0xff]  }
  0x1b   :  { %2666 = vmatpush3.bf16.msra.mxu0 %v2992_v25  ;;  %v3038_v25 = vld [vmem:[%s3925_s1 + $0x2c8] sm:$0xff]   ;;  %v3056_v44 = vld [vmem:[%s3925_s1 + $0x270] sm:$0xff]  }
  0x1c   :  { %2667 = vmatprep.subr.bf16.mxu0 %v2995_v29  ;;  %v3042_v29 = vld [vmem:[%s3925_s1 + $0x2d0] sm:$0xff]   ;;  %v3054_v42 = vld [vmem:[%s3925_s1 + $0x2e8] sm:$0xff]  }
  0x1d   :  { %2688 = vmatpush3.bf16.msra.mxu1 %v2994_v28  ;;  %v3039_v28 = vld [vmem:[%s3925_s1 + $0x288] sm:$0xff]  }
  0x1e   :  { %2689 = vmatprep.subr.bf16.mxu1 %v2997_v31  ;;  %v3044_v31 = vld [vmem:[%s3925_s1 + $0x258] sm:$0xff]   ;;  %v3053_v43 = vld [vmem:[%s3925_s1 + $0x228] sm:$0xff]  }
  0x1f   :  { %2668 = vmatpush3.bf16.msra.mxu0 %v2996_v30  ;;  %v3041_v30 = vld [vmem:[%s3925_s1 + $0x210] sm:$0xff]   ;;  %v3055_v46 = vld [vmem:[%s3925_s1 + $0x2a8] sm:$0xff]  }
  0x20   :  { %2697 = vmatprep.subr.bf16.mxu0 %v3000_v37  ;;  %v3050_v37 = vld [vmem:[%s3925_s1 + $0x2e0] sm:$0xff]  }
  0x21   :  { %2690 = vmatpush3.bf16.msra.mxu1 %v2999_v34  ;;  %v3045_v34 = vld [vmem:[%s3925_s1 + $0x218] sm:$0xff]  }
  0x22   :  { %2719 = vmatprep.subr.bf16.mxu1 %v3002_v40  ;;  %1827 = vmatmul.mubr.bf16.vlgmr.msra.gmra.mrb[0].mxu0 %v452_v45  ;;  %v3051_v40 = vld [vmem:[%s3925_s1 + $0x2a0] sm:$0xff]   ;;  %v23_v45 = vld [vmem:[%s3924_s0 + $0x8] sm:$0xff] }
  0x23   :  { %2698 = vmatpush3.bf16.msra.mxu0 %v3001_v48  ;;  %1906 = vmatprep.mubr.bf16.mxu0 %v473_v49  ;;  %v485_v47 = vrot.slane %v23_v45, %v3337_v41  ;;  %v478_v48 = vcombine.high %v23_v45, %v23_v45  ;;  %v3058_v49 = vld [vmem:[%s3925_s1 + $0x2f0] sm:$0xff]  }
  0x24   :  { %1867 = vmatmul.mubr.bf16.vlgmr.msra.gmra.mrb[0].mxu1 %v474_v50  ;;  %2699 = vmatprep.subr.bf16.mxu0 %v3004_v51  ;;  %v3057_v50 = vld [vmem:[%s3925_s1 + $0x230] sm:$0xff]  }
  0x25   :  { %2720 = vmatpush3.bf16.msra.mxu1 %v3003_v53  ;;  %1946 = vmatprep.mubr.bf16.mxu1 %v477_v55  ;;  %v493_v51 = vcombine.high %v485_v47, %v485_v47  ;;  %v3526_v52 = vrot.slane %v478_v48, %v3337_v41  ;;  %v3060_v53 = vld [vmem:[%s3925_s1 + $0x278] sm:$0xff]   ;;  %v3107_v45 = vld [vmem:[%s3925_s1 + $0x4d0] sm:$0xff]  }
  0x26   :  { %2721 = vmatprep.subr.bf16.mxu1 %v3006_v54  ;;  %v3059_v54 = vld [vmem:[%s3925_s1 + $0x2b0] sm:$0xff]  }
  0x27   :  { %2700 = vmatpush3.bf16.msra.mxu0 %v3005_v56  ;;  %v515_v55 = vrot.slane %v493_v51, %v3337_v41  ;;  %v494_v56 = vcombine.high %v3526_v52, %v3526_v52  ;;  %v3108_v48 = vld [vmem:[%s3925_s1 + $0x490] sm:$0xff]   ;;  %v3113_v51 = vld [vmem:[%s3925_s1 + $0x460] sm:$0xff]  }
  0x28   :  { %2701 = vmatprep.subr.bf16.mxu0 %v3008_v57  ;;  %v3062_v57 = vld [vmem:[%s3925_s1 + $0x2f8] sm:$0xff]  }
  0x29   :  { %2722 = vmatpush3.bf16.msra.mxu1 %v3007_v58  ;;  %v3061_v58 = vld [vmem:[%s3925_s1 + $0x238] sm:$0xff]  }
  0x2a   :  { %2723 = vmatprep.subr.bf16.mxu1 %v3010_v59  ;;  %v525_v59 = vcombine.high %v515_v55, %v515_v55 }
  0x2b   :  { %2702 = vmatpush3.bf16.msra.mxu0 %v3009_v60  ;;  %v501_v60 = vrot.slane %v485_v47, %v3337_v41  ;;  %v3109_v47 = vld [vmem:[%s3925_s1 + $0x458] sm:$0xff]  }
  0x2c   :  { %2703 = vmatprep.subr.bf16.mxu0 %v3012_v61  ;;  %v3064_v61 = vld [vmem:[%s3925_s1 + $0x340] sm:$0xff]  }
  0x2d   :  { %2724 = vmatpush3.bf16.msra.mxu1 %v3011_v62  ;;  %v3063_v62 = vld [vmem:[%s3925_s1 + $0x2b8] sm:$0xff]  }
  0x2e   :  { %2725 = vmatprep.subr.bf16.mxu1 %v3014_v63  ;;  %v522_v63 = vrot.slane %v494_v56, %v3337_v41  ;;  %v3116_v56 = vld [vmem:[%s3925_s1 + $0x4a0] sm:$0xff]  }
  0x2f   :  { %2704 = vmatpush3.bf16.msra.mxu0 %v3013_v0  ;;  %v3066_v0 = vld [vmem:[%s3925_s1 + $0x3c0] sm:$0xff]  }
  0x30   :  { %2705 = vmatprep.subr.bf16.mxu0 %v3016_v1  ;;  %v3065_v1 = vld [vmem:[%s3925_s1 + $0x300] sm:$0xff]  }
  0x31   :  { %2726 = vmatpush3.bf16.msra.mxu1 %v3015_v2  ;;  %v523_v2 = vcombine.high %v501_v60, %v501_v60 }
  0x32   :  { %2727 = vmatprep.subr.bf16.mxu1 %v3018_v3  ;;  %v3068_v3 = vld [vmem:[%s3925_s1 + $0x348] sm:$0xff]  }
  0x33   :  { %2706 = vmatpush3.bf16.msra.mxu0 %v3017_v4  ;;  %v3067_v4 = vld [vmem:[%s3925_s1 + $0x380] sm:$0xff]  }
  0x34   :  { %2707 = vmatprep.subr.bf16.mxu0 %v3020_v5  ;;  %v526_v5 = vcombine.high %v522_v63, %v522_v63 }
  0x35   :  { %2728 = vmatpush3.bf16.msra.mxu1 %v3019_v6  ;;  %v3070_v6 = vld [vmem:[%s3925_s1 + $0x3c8] sm:$0xff]  }
  0x36   :  { %2729 = vmatprep.subr.bf16.mxu1 %v3022_v7  ;;  %v3069_v7 = vld [vmem:[%s3925_s1 + $0x308] sm:$0xff]  }
  0x37   :  { %2708 = vmatpush3.bf16.msra.mxu0 %v3021_v8  ;;  %v3072_v8 = vld [vmem:[%s3925_s1 + $0x350] sm:$0xff]  }
  0x38   :  { %2709 = vmatprep.subr.bf16.mxu0 %v3024_v9  ;;  %v3071_v9 = vld [vmem:[%s3925_s1 + $0x388] sm:$0xff]  }
  0x39   :  { %2730 = vmatpush3.bf16.msra.mxu1 %v3023_v10  ;;  %v3074_v10 = vld [vmem:[%s3925_s1 + $0x3d0] sm:$0xff]  }
  0x3a   :  { %2731 = vmatprep.subr.bf16.mxu1 %v3026_v11  ;;  %v3073_v11 = vld [vmem:[%s3925_s1 + $0x310] sm:$0xff]  }
  0x3b   :  { %2710 = vmatpush3.bf16.msra.mxu0 %v3025_v12  ;;  %v3076_v12 = vld [vmem:[%s3925_s1 + $0x358] sm:$0xff]  }
  0x3c   :  { %2711 = vmatprep.subr.bf16.mxu0 %v3028_v13  ;;  %v3075_v13 = vld [vmem:[%s3925_s1 + $0x390] sm:$0xff]  }
  0x3d   :  { %2732 = vmatpush3.bf16.msra.mxu1 %v3027_v14  ;;  %v3078_v14 = vld [vmem:[%s3925_s1 + $0x3d8] sm:$0xff]  }
  0x3e   :  { %2733 = vmatprep.subr.bf16.mxu1 %v3030_v15  ;;  %v3077_v15 = vld [vmem:[%s3925_s1 + $0x318] sm:$0xff]  }
  0x3f   :  { %2712 = vmatpush3.bf16.msra.mxu0 %v3029_v16  ;;  %v3080_v16 = vld [vmem:[%s3925_s1 + $0x360] sm:$0xff]  }
  0x40   :  { %2741 = vmatprep.subr.bf16.mxu0 %v3032_v18  ;;  %v3082_v18 = vld [vmem:[%s3925_s1 + $0x3e0] sm:$0xff]  }
  0x41   :  { %2734 = vmatpush3.bf16.msra.mxu1 %v3031_v19  ;;  %v3081_v19 = vld [vmem:[%s3925_s1 + $0x320] sm:$0xff]  }
  0x42   :  { %1907 = vmatmul.mubr.bf16.vlgmr.msra.gmra.mrb[4].mxu0 %v459_v17  ;;  %2763 = vmatprep.subr.bf16.mxu1 %v3034_v20  ;;  %v3079_v17 = vld [vmem:[%s3925_s1 + $0x398] sm:$0xff]   ;;  %v3084_v20 = vld [vmem:[%s3925_s1 + $0x368] sm:$0xff]  }
  0x43   :  { %2742 = vmatpush3.bf16.msra.mxu0 %v3033_v21  ;;  %1986 = vmatprep.mubr.bf16.mxu0 %v515_v55  ;;  %v3083_v21 = vld [vmem:[%s3925_s1 + $0x3a0] sm:$0xff]   ;;  %v3117_v55 = vld [vmem:[%s3925_s1 + $0x468] sm:$0xff]  }
  0x44   :  { %1947 = vmatmul.mubr.bf16.vlgmr.msra.gmra.mrb[4].mxu1 %v475_v22  ;;  %2743 = vmatprep.subr.bf16.mxu0 %v3036_v23  ;;  %v3086_v22 = vld [vmem:[%s3925_s1 + $0x3e8] sm:$0xff]  }
  0x45   :  { %2764 = vmatpush3.bf16.msra.mxu1 %v3035_v24  ;;  %2026 = vmatprep.mubr.bf16.mxu1 %v525_v59  ;;  %v3085_v23 = vld [vmem:[%s3925_s1 + $0x328] sm:$0xff]   ;;  %v3088_v24 = vld [vmem:[%s3925_s1 + $0x370] sm:$0xff]  }
  0x46   :  { %2765 = vmatprep.subr.bf16.mxu1 %v3038_v25  ;;  %v3087_v25 = vld [vmem:[%s3925_s1 + $0x3a8] sm:$0xff]   ;;  %v3121_v59 = vld [vmem:[%s3925_s1 + $0x470] sm:$0xff]  }
  0x47   :  { %2744 = vmatpush3.bf16.msra.mxu0 %v3037_v26  ;;  %v3090_v26 = vld [vmem:[%s3925_s1 + $0x3f0] sm:$0xff]  }
  0x48   :  { %2745 = vmatprep.subr.bf16.mxu0 %v3040_v27  ;;  %v3089_v27 = vld [vmem:[%s3925_s1 + $0x330] sm:$0xff]  }
  0x49   :  { %2766 = vmatpush3.bf16.msra.mxu1 %v3039_v28  ;;  %v3092_v28 = vld [vmem:[%s3925_s1 + $0x378] sm:$0xff]  }
  0x4a   :  { %2767 = vmatprep.subr.bf16.mxu1 %v3042_v29  ;;  %v3091_v29 = vld [vmem:[%s3925_s1 + $0x3b0] sm:$0xff]  }
  0x4b   :  { %2746 = vmatpush3.bf16.msra.mxu0 %v3041_v30  ;;  %v3094_v30 = vld [vmem:[%s3925_s1 + $0x3f8] sm:$0xff]  }
  0x4c   :  { %2747 = vmatprep.subr.bf16.mxu0 %v3044_v31  ;;  %v3093_v31 = vld [vmem:[%s3925_s1 + $0x338] sm:$0xff]  }
  0x4d   :  { %2768 = vmatpush3.bf16.msra.mxu1 %v3043_v32  ;;  %v508_v32 = vrot.slane %v3526_v52, %v3337_v41  ;;  %v3112_v52 = vld [vmem:[%s3925_s1 + $0x498] sm:$0xff]  }
  0x4e   :  { %2769 = vmatprep.subr.bf16.mxu1 %v3046_v33  ;;  %v3097_v33 = vld [vmem:[%s3925_s1 + $0x440] sm:$0xff]  }
  0x4f   :  { %2748 = vmatpush3.bf16.msra.mxu0 %v3045_v34  ;;  %v3096_v34 = vld [vmem:[%s3925_s1 + $0x3b8] sm:$0xff]  }
  0x50   :  { %2749 = vmatprep.subr.bf16.mxu0 %v3048_v35  ;;  %v3099_v35 = vld [vmem:[%s3925_s1 + $0x4c0] sm:$0xff]  }
  0x51   :  { %2770 = vmatpush3.bf16.msra.mxu1 %v3047_v36  ;;  %v3098_v36 = vld [vmem:[%s3925_s1 + $0x400] sm:$0xff]  }
  0x52   :  { %2771 = vmatprep.subr.bf16.mxu1 %v3050_v37  ;;  %v524_v37 = vcombine.high %v508_v32, %v508_v32 }
  0x53   :  { %2750 = vmatpush3.bf16.msra.mxu0 %v3049_v38  ;;  %v3101_v38 = vld [vmem:[%s3925_s1 + $0x448] sm:$0xff]  }
  0x54   :  { %2751 = vmatprep.subr.bf16.mxu0 %v3052_v39  ;;  %v3100_v39 = vld [vmem:[%s3925_s1 + $0x480] sm:$0xff]  }
  0x55   :  { %2772 = vmatpush3.bf16.msra.mxu1 %v3051_v40  ;;  %v3103_v40 = vld [vmem:[%s3925_s1 + $0x4c8] sm:$0xff]  }
  0x56   :  { %2773 = vmatprep.subr.bf16.mxu1 %v3054_v42  ;;  %v3102_v42 = vld [vmem:[%s3925_s1 + $0x408] sm:$0xff]  }
  0x57   :  { %2752 = vmatpush3.bf16.msra.mxu0 %v3053_v43  ;;  %v3105_v43 = vld [vmem:[%s3925_s1 + $0x450] sm:$0xff]  }
  0x58   :  { %2753 = vmatprep.subr.bf16.mxu0 %v3056_v44  ;;  %v3104_v44 = vld [vmem:[%s3925_s1 + $0x488] sm:$0xff]  }
  0x59   :  { %2774 = vmatpush3.bf16.msra.mxu1 %v3055_v46  ;;  %v3106_v46 = vld [vmem:[%s3925_s1 + $0x410] sm:$0xff]  }
  0x5a   :  { %2775 = vmatprep.subr.bf16.mxu1 %v3058_v49  ;;  %v3111_v49 = vld [vmem:[%s3925_s1 + $0x4d8] sm:$0xff]  }
  0x5b   :  { %2754 = vmatpush3.bf16.msra.mxu0 %v3057_v50  ;;  %v3110_v50 = vld [vmem:[%s3925_s1 + $0x418] sm:$0xff]  }
  0x5c   :  { %2755 = vmatprep.subr.bf16.mxu0 %v3060_v53  ;;  %v3115_v53 = vld [vmem:[%s3925_s1 + $0x4e0] sm:$0xff]  }
  0x5d   :  { %2776 = vmatpush3.bf16.msra.mxu1 %v3059_v54  ;;  %v3114_v54 = vld [vmem:[%s3925_s1 + $0x420] sm:$0xff]  }
  0x5e   :  { %2777 = vmatprep.subr.bf16.mxu1 %v3062_v57  ;;  %v3119_v57 = vld [vmem:[%s3925_s1 + $0x4e8] sm:$0xff]  }
  0x5f   :  { %2756 = vmatpush3.bf16.msra.mxu0 %v3061_v58  ;;  %v3118_v58 = vld [vmem:[%s3925_s1 + $0x428] sm:$0xff]  }
  0x60   :  { %2785 = vmatprep.subr.bf16.mxu0 %v3064_v61  ;;  %v3120_v61 = vld [vmem:[%s3925_s1 + $0x4a8] sm:$0xff]  }
  0x61   :  { %2778 = vmatpush3.bf16.msra.mxu1 %v3063_v62 }
  0x62   :  { %1987 = vmatmul.mubr.bf16.vlgmr.msra.gmra.mrb[8].mxu0 %v501_v60  ;;  %2807 = vmatprep.subr.bf16.mxu1 %v3066_v0  ;;  %v24_v60 = vld [vmem:[%s3924_s0 + $0x10] sm:$0xff] }
  0x63   :  { %2786 = vmatpush3.bf16.msra.mxu0 %v3065_v1  ;;  %2066 = vmatprep.mubr.bf16.mxu0 %v522_v63  ;;  %v534_v62 = vrot.slane %v24_v60, %v3337_v41  ;;  %v527_v63 = vcombine.high %v24_v60, %v24_v60  ;;  %v3123_v0 = vld [vmem:[%s3925_s1 + $0x4f0] sm:$0xff]  }
  0x64   :  { %2027 = vmatmul.mubr.bf16.vlgmr.msra.gmra.mrb[8].mxu1 %v523_v2  ;;  %2787 = vmatprep.subr.bf16.mxu0 %v3068_v3  ;;  %v3122_v1 = vld [vmem:[%s3925_s1 + $0x430] sm:$0xff]  }
  0x65   :  { %2808 = vmatpush3.bf16.msra.mxu1 %v3067_v4  ;;  %2106 = vmatprep.mubr.bf16.mxu1 %v526_v5  ;;  %v542_v2 = vcombine.high %v534_v62, %v534_v62  ;;  %v3732_v3 = vrot.slane %v527_v63, %v3337_v41  ;;  %v3125_v4 = vld [vmem:[%s3925_s1 + $0x478] sm:$0xff]   ;;  %v3124_v5 = vld [vmem:[%s3925_s1 + $0x4b0] sm:$0xff]  }
  0x66   :  { %2809 = vmatprep.subr.bf16.mxu1 %v3070_v6 }
  0x67   :  { %2788 = vmatpush3.bf16.msra.mxu0 %v3069_v7  ;;  %v564_v6 = vrot.slane %v542_v2, %v3337_v41  ;;  %v543_v7 = vcombine.high %v3732_v3, %v3732_v3 }
  0x68   :  { %2789 = vmatprep.subr.bf16.mxu0 %v3072_v8  ;;  %v3127_v8 = vld [vmem:[%s3925_s1 + $0x4f8] sm:$0xff]  }
  0x69   :  { %2810 = vmatpush3.bf16.msra.mxu1 %v3071_v9  ;;  %v3126_v9 = vld [vmem:[%s3925_s1 + $0x438] sm:$0xff]  }
  0x6a   :  { %2811 = vmatprep.subr.bf16.mxu1 %v3074_v10  ;;  %v574_v10 = vcombine.high %v564_v6, %v564_v6 }
  0x6b   :  { %2790 = vmatpush3.bf16.msra.mxu0 %v3073_v11  ;;  %v550_v11 = vrot.slane %v534_v62, %v3337_v41 }
  0x6c   :  { %2791 = vmatprep.subr.bf16.mxu0 %v3076_v12  ;;  %v3129_v12 = vld [vmem:[%s3925_s1 + $0x540] sm:$0xff]  }
  0x6d   :  { %2812 = vmatpush3.bf16.msra.mxu1 %v3075_v13  ;;  %v3128_v13 = vld [vmem:[%s3925_s1 + $0x4b8] sm:$0xff]  }
  0x6e   :  { %2813 = vmatprep.subr.bf16.mxu1 %v3078_v14  ;;  %v571_v14 = vrot.slane %v543_v7, %v3337_v41 }
  0x6f   :  { %2792 = vmatpush3.bf16.msra.mxu0 %v3077_v15  ;;  %v3131_v15 = vld [vmem:[%s3925_s1 + $0x5c0] sm:$0xff]  }
  0x70   :  { %2793 = vmatprep.subr.bf16.mxu0 %v3080_v16  ;;  %v3130_v16 = vld [vmem:[%s3925_s1 + $0x500] sm:$0xff]  }
  0x71   :  { %2814 = vmatpush3.bf16.msra.mxu1 %v3079_v17  ;;  %v572_v17 = vcombine.high %v550_v11, %v550_v11 }
  0x72   :  { %2815 = vmatprep.subr.bf16.mxu1 %v3082_v18  ;;  %v3133_v18 = vld [vmem:[%s3925_s1 + $0x548] sm:$0xff]  }
  0x73   :  { %2794 = vmatpush3.bf16.msra.mxu0 %v3081_v19  ;;  %v3132_v19 = vld [vmem:[%s3925_s1 + $0x580] sm:$0xff]  }
  0x74   :  { %2795 = vmatprep.subr.bf16.mxu0 %v3084_v20  ;;  %v575_v20 = vcombine.high %v571_v14, %v571_v14 }
  0x75   :  { %2816 = vmatpush3.bf16.msra.mxu1 %v3083_v21  ;;  %v3135_v21 = vld [vmem:[%s3925_s1 + $0x5c8] sm:$0xff]  }
  0x76   :  { %2817 = vmatprep.subr.bf16.mxu1 %v3086_v22  ;;  %v3134_v22 = vld [vmem:[%s3925_s1 + $0x508] sm:$0xff]  }
  0x77   :  { %2796 = vmatpush3.bf16.msra.mxu0 %v3085_v23  ;;  %v3137_v23 = vld [vmem:[%s3925_s1 + $0x550] sm:$0xff]  }
  0x78   :  { %2797 = vmatprep.subr.bf16.mxu0 %v3088_v24  ;;  %v3136_v24 = vld [vmem:[%s3925_s1 + $0x588] sm:$0xff]  }
  0x79   :  { %2818 = vmatpush3.bf16.msra.mxu1 %v3087_v25  ;;  %v3139_v25 = vld [vmem:[%s3925_s1 + $0x5d0] sm:$0xff]  }
  0x7a   :  { %2819 = vmatprep.subr.bf16.mxu1 %v3090_v26  ;;  %v3138_v26 = vld [vmem:[%s3925_s1 + $0x510] sm:$0xff]  }
  0x7b   :  { %2798 = vmatpush3.bf16.msra.mxu0 %v3089_v27  ;;  %v3141_v27 = vld [vmem:[%s3925_s1 + $0x558] sm:$0xff]  }
  0x7c   :  { %2799 = vmatprep.subr.bf16.mxu0 %v3092_v28  ;;  %v3140_v28 = vld [vmem:[%s3925_s1 + $0x590] sm:$0xff]  }
  0x7d   :  { %2820 = vmatpush3.bf16.msra.mxu1 %v3091_v29  ;;  %v3143_v29 = vld [vmem:[%s3925_s1 + $0x5d8] sm:$0xff]  }
  0x7e   :  { %2821 = vmatprep.subr.bf16.mxu1 %v3094_v30  ;;  %v3142_v30 = vld [vmem:[%s3925_s1 + $0x518] sm:$0xff]  }
  0x7f   :  { %2800 = vmatpush3.bf16.msra.mxu0 %v3093_v31  ;;  %v3145_v31 = vld [vmem:[%s3925_s1 + $0x560] sm:$0xff]  }
  0x80   :  { %2829 = vmatprep.subr.bf16.mxu0 %v3097_v33  ;;  %v3147_v33 = vld [vmem:[%s3925_s1 + $0x5e0] sm:$0xff]  }
  0x81   :  { %2822 = vmatpush3.bf16.msra.mxu1 %v3096_v34  ;;  %v3146_v34 = vld [vmem:[%s3925_s1 + $0x520] sm:$0xff]  }
  0x82   :  { %2067 = vmatmul.mubr.bf16.vlgmr.msra.gmra.mrb[12].mxu0 %v508_v32  ;;  %2851 = vmatprep.subr.bf16.mxu1 %v3099_v35  ;;  %v3144_v32 = vld [vmem:[%s3925_s1 + $0x598] sm:$0xff]   ;;  %v3149_v35 = vld [vmem:[%s3925_s1 + $0x568] sm:$0xff]  }
  0x83   :  { %2830 = vmatpush3.bf16.msra.mxu0 %v3098_v36  ;;  %2146 = vmatprep.mubr.bf16.mxu0 %v564_v6  ;;  %v3148_v36 = vld [vmem:[%s3925_s1 + $0x5a0] sm:$0xff]  }
  0x84   :  { %2107 = vmatmul.mubr.bf16.vlgmr.msra.gmra.mrb[12].mxu1 %v524_v37  ;;  %2831 = vmatprep.subr.bf16.mxu0 %v3101_v38  ;;  %v3151_v37 = vld [vmem:[%s3925_s1 + $0x5e8] sm:$0xff]  }
  0x85   :  { %2852 = vmatpush3.bf16.msra.mxu1 %v3100_v39  ;;  %2186 = vmatprep.mubr.bf16.mxu1 %v574_v10  ;;  %v3150_v38 = vld [vmem:[%s3925_s1 + $0x528] sm:$0xff]   ;;  %v3153_v39 = vld [vmem:[%s3925_s1 + $0x570] sm:$0xff]  }
  0x86   :  { %2853 = vmatprep.subr.bf16.mxu1 %v3103_v40  ;;  %v3152_v40 = vld [vmem:[%s3925_s1 + $0x5a8] sm:$0xff]  }
  0x87   :  { %2832 = vmatpush3.bf16.msra.mxu0 %v3102_v42  ;;  %v3155_v42 = vld [vmem:[%s3925_s1 + $0x5f0] sm:$0xff]  }
  0x88   :  { %2833 = vmatprep.subr.bf16.mxu0 %v3105_v43  ;;  %v3154_v43 = vld [vmem:[%s3925_s1 + $0x530] sm:$0xff]  }
  0x89   :  { %2854 = vmatpush3.bf16.msra.mxu1 %v3104_v44  ;;  %v3157_v44 = vld [vmem:[%s3925_s1 + $0x578] sm:$0xff]  }
  0x8a   :  { %2855 = vmatprep.subr.bf16.mxu1 %v3107_v45  ;;  %v3156_v45 = vld [vmem:[%s3925_s1 + $0x5b0] sm:$0xff]  }
  0x8b   :  { %2834 = vmatpush3.bf16.msra.mxu0 %v3106_v46  ;;  %v3158_v46 = vld [vmem:[%s3925_s1 + $0x538] sm:$0xff]  }
  0x8c   :  { %2835 = vmatprep.subr.bf16.mxu0 %v3109_v47  ;;  %v3159_v47 = vld [vmem:[%s3925_s1 + $0x5f8] sm:$0xff]  }
  0x8d   :  { %2856 = vmatpush3.bf16.msra.mxu1 %v3108_v48  ;;  %v3161_v48 = vld [vmem:[%s3925_s1 + $0x5b8] sm:$0xff]  }
  0x8e   :  { %2857 = vmatprep.subr.bf16.mxu1 %v3111_v49  ;;  %v557_v49 = vrot.slane %v3732_v3, %v3337_v41 }
  0x8f   :  { %2836 = vmatpush3.bf16.msra.mxu0 %v3110_v50  ;;  %v3162_v50 = vld [vmem:[%s3925_s1 + $0x600] sm:$0xff]  }
  0x90   :  { %2837 = vmatprep.subr.bf16.mxu0 %v3113_v51  ;;  %v3199_v51 = vmov 0.0  }
  0x91   :  { %2858 = vmatpush3.bf16.msra.mxu1 %v3112_v52  ;;  %v573_v52 = vcombine.high %v557_v49, %v557_v49 }
  0x92   :  { %2859 = vmatprep.subr.bf16.mxu1 %v3115_v53 }
  0x93   :  { %2838 = vmatpush3.bf16.msra.mxu0 %v3114_v54 }
  0x94   :  { %2839 = vmatprep.subr.bf16.mxu0 %v3117_v55 }
  0x95   :  { %2860 = vmatpush3.bf16.msra.mxu1 %v3116_v56 }
  0x96   :  { %2861 = vmatprep.subr.bf16.mxu1 %v3119_v57 }
  0x97   :  { %2840 = vmatpush3.bf16.msra.mxu0 %v3118_v58 }
  0x98   :  { %2841 = vmatprep.subr.bf16.mxu0 %v3121_v59 }
  0x99   :  { %2862 = vmatpush3.bf16.msra.mxu1 %v3120_v61 }
  0x9a   :  { %2863 = vmatprep.subr.bf16.mxu1 %v3123_v0 }
  0x9b   :  { %2842 = vmatpush3.bf16.msra.mxu0 %v3122_v1 }
  0x9c   :  { %2843 = vmatprep.subr.bf16.mxu0 %v3125_v4 }
  0x9d   :  { %2864 = vmatpush3.bf16.msra.mxu1 %v3124_v5 }
  0x9e   :  { %2865 = vmatprep.subr.bf16.mxu1 %v3127_v8 }
  0x9f   :  { %2844 = vmatpush3.bf16.msra.mxu0 %v3126_v9 }
  0xa0   :  { %2873 = vmatprep.subr.bf16.mxu0 %v3129_v12 }
  0xa1   :  { %2866 = vmatpush3.bf16.msra.mxu1 %v3128_v13 }
  0xa2   :  { %2147 = vmatmul.mubr.bf16.vlgmr.msra.gmra.mrb[16].mxu0 %v550_v11  ;;  %2895 = vmatprep.subr.bf16.mxu1 %v3131_v15 }
  0xa3   :  { %2874 = vmatpush3.bf16.msra.mxu0 %v3130_v16  ;;  %2226 = vmatprep.mubr.bf16.mxu0 %v571_v14 }
  0xa4   :  { %2187 = vmatmul.mubr.bf16.vlgmr.msra.gmra.mrb[16].mxu1 %v572_v17  ;;  %2875 = vmatprep.subr.bf16.mxu0 %v3133_v18 }
  0xa5   :  { %2896 = vmatpush3.bf16.msra.mxu1 %v3132_v19  ;;  %2266 = vmatprep.mubr.bf16.mxu1 %v575_v20 }
  0xa6   :  { %2897 = vmatprep.subr.bf16.mxu1 %v3135_v21 }
  0xa7   :  { %2876 = vmatpush3.bf16.msra.mxu0 %v3134_v22 }
  0xa8   :  { %2877 = vmatprep.subr.bf16.mxu0 %v3137_v23 }
  0xa9   :  { %2898 = vmatpush3.bf16.msra.mxu1 %v3136_v24 }
  0xaa   :  { %2899 = vmatprep.subr.bf16.mxu1 %v3139_v25 }
  0xab   :  { %2878 = vmatpush3.bf16.msra.mxu0 %v3138_v26 }
  0xac   :  { %2879 = vmatprep.subr.bf16.mxu0 %v3141_v27 }
  0xad   :  { %2900 = vmatpush3.bf16.msra.mxu1 %v3140_v28 }
  0xae   :  { %2901 = vmatprep.subr.bf16.mxu1 %v3143_v29 }
  0xaf   :  { %2880 = vmatpush3.bf16.msra.mxu0 %v3142_v30 }
  0xb0   :  { %2881 = vmatprep.subr.bf16.mxu0 %v3145_v31 }
  0xb1   :  { %2902 = vmatpush3.bf16.msra.mxu1 %v3144_v32 }
  0xb2   :  { %2903 = vmatprep.subr.bf16.mxu1 %v3147_v33 }
  0xb3   :  { %2882 = vmatpush3.bf16.msra.mxu0 %v3146_v34 }
  0xb4   :  { %2883 = vmatprep.subr.bf16.mxu0 %v3149_v35 }
  0xb5   :  { %2904 = vmatpush3.bf16.msra.mxu1 %v3148_v36 }
  0xb6   :  { %2905 = vmatprep.subr.bf16.mxu1 %v3151_v37 }
  0xb7   :  { %2884 = vmatpush3.bf16.msra.mxu0 %v3150_v38 }
  0xb8   :  { %2885 = vmatprep.subr.bf16.mxu0 %v3153_v39 }
  0xb9   :  { %2906 = vmatpush3.bf16.msra.mxu1 %v3152_v40 }
  0xba   :  { %2907 = vmatprep.subr.bf16.mxu1 %v3155_v42 }
  0xbb   :  { %2886 = vmatpush3.bf16.msra.mxu0 %v3154_v43 }
  0xbc   :  { %2887 = vmatprep.subr.bf16.mxu0 %v3157_v44 }
  0xbd   :  { %2908 = vmatpush3.bf16.msra.mxu1 %v3156_v45 }
  0xbe   :  { %2909 = vmatprep.subr.bf16.mxu1 %v3159_v47 }
  0xbf   :  { %2888 = vmatpush3.bf16.msra.mxu0 %v3158_v46 }
  0xc0   :  { %2931 = vmatprep.subr.bf16.mxu0 %v3199_v51 }
  0xc1   :  { %10 = vsyncpa [#allocation4], 0  ;;  %2910 = vmatpush3.bf16.msra.mxu1 %v3161_v48  ;;  %v3163_v53 = vld [vmem:[%s3925_s1 + $0x608] sm:$0xff]   ;;  %vm3200_vm0 = vmmov 0   ;;  %v3164_v54 = vld [vmem:[%s3925_s1 + $0x610] sm:$0xff]   ;;  %vm1790_vm1 = vcmask 523264  }
  0xc2   :  { %2227 = vmatmul.mubr.bf16.vlgmr.msra.gmra.mrb[20].mxu0 %v557_v49  ;;  %2943 = vmatprep.subr.bf16.mxu1 %v3199_v51  ;;  %v3165_v55 = vld [vmem:[%s3925_s1 + $0x618] sm:$0xff]   ;;  %v2445_v59 = vld [vmem:[%s3926_s2] ss:$0 sm:$0xff]  ;;  %v3167_v12 = vld [vmem:[%s3927_s3 + $0x8] sm:$0xff]   ;;  %s3201_s9 = smov [#allocation3]   ;;  %vm2429_vm2 = vcmask 500736  }
  0xc3   :  { %2932 = vmatpush3.bf16.msra.mxu0 %v3162_v50  ;;  %2939 = vmatprep.mubr.msk.bf16.mxu0 %vm3200_vm0, %v3199_v51  ;;  %v2446_v56 = vld.sshfl [vmem:[%s3924_s0 + $0x18] sm:$0x1 pattern:$0x75316420]  ;;  %v3168_v18 = vld [vmem:[%s3927_s3 + $0x10] sm:$0xff]   ;;  %v3170_v22 = vld [vmem:[%s3927_s3 + $0x20] sm:$0xff]  }
  0xc4   :  { %2267 = vmatmul.mubr.bf16.vlgmr.msra.gmra.mrb[20].mxu1 %v573_v52  ;;  %2933 = vmatprep.subr.bf16.mxu0 %v3199_v51  ;;  %v589_v57 = vrot.slane %v2446_v56, %v3337_v41  ;;  %v3166_v41 = vld [vmem:[%s3927_s3] sm:$0xff]   ;;  %v3169_v21 = vld [vmem:[%s3927_s3 + $0x18] sm:$0xff]   ;;  %v3171_v23 = vld [vmem:[%s3927_s3 + $0x28] sm:$0xff]   ;;  %s2437_s10 = sshll.u32 %s3201_s9, 4  ;;  %s2438_s10 = int_to_ptr.vmem [resolvable:$true] %s2437_s10 }
  0xc5   :  { %2959 = vmatprep.mubr.msk.bf16.mxu1 %vm3200_vm0, %v3199_v51  ;;  %2944 = vmatpush3.bf16.msra.mxu1 %v3166_v41  ;;  %v3172_v24 = vld [vmem:[%s3927_s3 + $0x30] sm:$0xff]   ;;  %v3173_v25 = vld [vmem:[%s3927_s3 + $0x38] sm:$0xff]   ;;  %s3174_s11 = scalar_lea.vmem %s2438_s10, 32  ;;  %p3179_p1 = scmp.lt.s32.totalorder %s2438_s10, %s2438_s10 }
  0xc6   :  { %2945 = vmatprep.subr.bf16.mxu1 %v3199_v51  ;;  %p3175_p0 = scmp.ne.s32.totalorder %s2438_s10, %s3174_s11  ;;  %p3180_p2 = scmp.lt.s32.totalorder %s3174_s11, %s3174_s11 }
  0xc7   :  { %2934 = vmatpush3.bf16.msra.mxu0 %v3163_v53 }
  0xc8   :  { %2935 = vmatprep.subr.bf16.mxu0 %v3199_v51  ;;  %p3181_p3 = por %p3180_p2, %p3179_p1 }
  0xc9   :  { %2946 = vmatpush3.bf16.msra.mxu1 %v3167_v12 }
  0xca   :  { %2947 = vmatprep.subr.bf16.mxu1 %v3199_v51  ;;  %p3182_p4 = pnand %p3181_p3, %p3175_p0 }
  0xcb   :  { %2936 = vmatpush3.bf16.msra.mxu0 %v3164_v54 }
  0xcc   :  { %2937 = vmatprep.subr.bf16.mxu0 %v3199_v51 }
  0xcd   :  { %2948 = vmatpush3.bf16.msra.mxu1 %v3168_v18  ;;  %v2644_v18 = vld [vmem:[%s3928_s4] ss:$0 sm:$0xff] }
  0xce   :  { %2949 = vmatprep.subr.bf16.mxu1 %v3199_v51 }
  0xcf   :  { %2938 = vmatpush3.bf16.msra.mxu0 %v3165_v55 }
  0xd1   :  { %2950 = vmatpush3.bf16.msra.mxu1 %v3169_v21 }
  0xd2   :  { %2940 = vmatmul.mubr.msk.bf16.vlgmr.msra.gmra.mrb[24].mxu0 %vm1790_vm1, %v589_v57  ;;  %2951 = vmatprep.subr.bf16.mxu1 %v3199_v51 }
  0xd5   :  { %2952 = vmatpush3.bf16.msra.mxu1 %v3170_v22 }
  0xd6   :  { %2953 = vmatprep.subr.bf16.mxu1 %v3199_v51 }
  0xd9   :  { %2954 = vmatpush3.bf16.msra.mxu1 %v3171_v23 }
  0xda   :  { %2955 = vmatprep.subr.bf16.mxu1 %v3199_v51 }
  0xdd   :  { %2956 = vmatpush3.bf16.msra.mxu1 %v3172_v24 }
  0xde   :  { %2957 = vmatprep.subr.bf16.mxu1 %v3199_v51 }
  0xe1   :  { %2958 = vmatpush3.bf16.msra.mxu1 %v3173_v25 }
  0xf5   :  { %v2669_v58 = vpop.f32.mrb[0].mxu0 }
  0xf6   :  { %v2670_v60 = vpop.f32.mrb[1].mxu0 }
  0xf7   :  { %v2671_v61 = vadd.f32 %v2670_v60, %v2669_v58  ;;  %v2672_v62 = vpop.f32.mrb[2].mxu0  ;;  %v2691_v63 = vpop.f32.mrb[0].mxu1 }
  0xf8   :  { %v2673_v0 = vpop.f32.mrb[3].mxu0  ;;  %v2692_v1 = vpop.f32.mrb[1].mxu1 }
  0xf9   :  { %v1829_v2 = vadd.f32 %v2671_v61, %v2445_v59  ;;  %v2693_v3 = vadd.f32 %v2692_v1, %v2691_v63  ;;  %v2694_v4 = vpop.f32.mrb[2].mxu1 }
  0xfa   :  { %v2695_v5 = vpop.f32.mrb[3].mxu1 }
  0xfb   :  { %v1869_v6 = vadd.f32 %v2693_v3, %v1829_v2 }
 0x115   :  { %v2713_v7 = vpop.f32.mrb[4].mxu0 }
 0x116   :  { %v2714_v8 = vpop.f32.mrb[5].mxu0 }
 0x117   :  { %v2715_v9 = vadd.f32 %v2714_v8, %v2713_v7  ;;  %v2716_v10 = vpop.f32.mrb[6].mxu0  ;;  %v2735_v11 = vpop.f32.mrb[4].mxu1 }
 0x118   :  { %v2717_v13 = vpop.f32.mrb[7].mxu0  ;;  %v2736_v14 = vpop.f32.mrb[5].mxu1 }
 0x119   :  { %v1909_v15 = vadd.f32 %v2715_v9, %v1869_v6  ;;  %v2737_v16 = vadd.f32 %v2736_v14, %v2735_v11  ;;  %v2738_v17 = vpop.f32.mrb[6].mxu1 }
 0x11a   :  { %v2739_v19 = vpop.f32.mrb[7].mxu1 }
 0x11b   :  { %v1949_v20 = vadd.f32 %v2737_v16, %v1909_v15 }
 0x135   :  { %v2757_v26 = vpop.f32.mrb[8].mxu0 }
 0x136   :  { %v2758_v27 = vpop.f32.mrb[9].mxu0 }
 0x137   :  { %v2759_v28 = vadd.f32 %v2758_v27, %v2757_v26  ;;  %v2760_v29 = vpop.f32.mrb[10].mxu0  ;;  %v2779_v30 = vpop.f32.mrb[8].mxu1 }
 0x138   :  { %v2761_v31 = vpop.f32.mrb[11].mxu0  ;;  %v2780_v32 = vpop.f32.mrb[9].mxu1 }
 0x139   :  { %v1989_v33 = vadd.f32 %v2759_v28, %v1949_v20  ;;  %v2781_v34 = vadd.f32 %v2780_v32, %v2779_v30  ;;  %v2782_v35 = vpop.f32.mrb[10].mxu1 }
 0x13a   :  { %v2783_v36 = vpop.f32.mrb[11].mxu1 }
 0x13b   :  { %v2029_v37 = vadd.f32 %v2781_v34, %v1989_v33 }
 0x155   :  { %v2801_v38 = vpop.f32.mrb[12].mxu0 }
 0x156   :  { %v2802_v39 = vpop.f32.mrb[13].mxu0 }
 0x157   :  { %v2803_v40 = vadd.f32 %v2802_v39, %v2801_v38  ;;  %v2804_v42 = vpop.f32.mrb[14].mxu0  ;;  %v2823_v43 = vpop.f32.mrb[12].mxu1 }
 0x158   :  { %v2805_v44 = vpop.f32.mrb[15].mxu0  ;;  %v2824_v45 = vpop.f32.mrb[13].mxu1 }
 0x159   :  { %v2069_v46 = vadd.f32 %v2803_v40, %v2029_v37  ;;  %v2825_v47 = vadd.f32 %v2824_v45, %v2823_v43  ;;  %v2826_v48 = vpop.f32.mrb[14].mxu1 }
 0x15a   :  { %v2827_v49 = vpop.f32.mrb[15].mxu1 }
 0x15b   :  { %v2109_v50 = vadd.f32 %v2825_v47, %v2069_v46 }
 0x175   :  { %v2845_v51 = vpop.f32.mrb[16].mxu0 }
 0x176   :  { %v2846_v52 = vpop.f32.mrb[17].mxu0 }
 0x177   :  { %v2847_v53 = vadd.f32 %v2846_v52, %v2845_v51  ;;  %v2848_v54 = vpop.f32.mrb[18].mxu0  ;;  %v2867_v55 = vpop.f32.mrb[16].mxu1 }
 0x178   :  { %v2849_v56 = vpop.f32.mrb[19].mxu0  ;;  %v2868_v57 = vpop.f32.mrb[17].mxu1 }
 0x179   :  { %v2149_v58 = vadd.f32 %v2847_v53, %v2109_v50  ;;  %v2869_v59 = vadd.f32 %v2868_v57, %v2867_v55  ;;  %v2870_v60 = vpop.f32.mrb[18].mxu1 }
 0x17a   :  { %v2871_v61 = vpop.f32.mrb[19].mxu1 }
 0x17b   :  { %v2189_v62 = vadd.f32 %v2869_v59, %v2149_v58 }
 0x195   :  { %v2889_v63 = vpop.f32.mrb[20].mxu0 }
 0x196   :  { %v2890_v0 = vpop.f32.mrb[21].mxu0 }
 0x197   :  { %v2891_v1 = vadd.f32 %v2890_v0, %v2889_v63  ;;  %v2892_v2 = vpop.f32.mrb[22].mxu0  ;;  %v2911_v3 = vpop.f32.mrb[20].mxu1 }
 0x198   :  { %v2893_v4 = vpop.f32.mrb[23].mxu0  ;;  %v2912_v5 = vpop.f32.mrb[21].mxu1 }
 0x199   :  { %v2229_v6 = vadd.f32 %v2891_v1, %v2189_v62  ;;  %v2913_v41 = vadd.f32 %v2912_v5, %v2911_v3  ;;  %v2914_v7 = vpop.f32.mrb[22].mxu1 }
 0x19a   :  { %v2915_v8 = vpop.f32.mrb[23].mxu1 }
 0x19b   :  { %v2269_v9 = vadd.f32 %v2913_v41, %v2229_v6 }
 0x1a5   :  { %v2308_v10 = vpop.f32.mrb[24].mxu0 }
 0x1a6   :  { %v2309_v11 = vadd.f32 %v2308_v10, %v2269_v9  ;;  %v2941_v12 = vpop.f32.mrb[25].mxu0 }
 0x1a7   :  { %v2311_v13 = vpop.f32.mrb[26].mxu0 }
 0x1a8   :  { %v2314_v14 = vmax.f32 %v2309_v11, 0.0  ;;  %v2942_v15 = vpop.f32.mrb[27].mxu0 }
 0x1aa   :  { %v2315_v16 = vpack.c.bf16 %v2314_v14, %v2314_v14 }
 0x1ac   :  { %2316 = vst [vmem:[#allocation2] sm:$0x1] %v2315_v16 }
 0x1b3   :  { %v2317_v17 = vld [vmem:[#allocation2] sm:$0x1] }
 0x1b4   :  { %2960 = vmatmul.mubr.bf16.vlgmr.msra.gmra.mrb[24].mxu1 %v2317_v17 }
 0x287   :  { %v2423_v19 = vpop.f32.mrb[24].mxu1 }
 0x288   :  { %v2424_v20 = vadd.f32 %v2644_v18, %v2423_v19  ;;  %v2961_v21 = vpop.f32.mrb[25].mxu1 }
 0x289   :  { %v2426_v22 = vpop.f32.mrb[26].mxu1 }
 0x28a   :  { %v2962_v23 = vpop.f32.mrb[27].mxu1  ;;  %2430 = vst.msk [vmem:[#allocation3] sm:$0x3] %vm2429_vm2, %v2424_v20 }
 0x28b   :  { %3185 = shalt.err (!%p3182_p4)
}
 0x28c   :  { %s3186_s4 = scalar_lea.hbm %s3929_s5, 32 }
 0x28d   :  { %p3187_p5 = scmp.ne.s32.totalorder %s3929_s5, %s3186_s4  ;;  %p3190_p6 = scmp.lt.u32.totalorder %s3186_s4, %s3929_s5 }
 0x28f   :  { %p3192_p7 = pnand %p3190_p6, %p3187_p5 }
 0x291   :  { %3195 = shalt.err (!%p3192_p7)
}
 0x292   :  { %2440 = dma.vmem_to_hbm [thread:$0]  %s2438_s10, 32, %s3929_s5, [#allocation4]  }
 0x293   :  { %3196 = dma.done.wait [#allocation4], 32  }
 0x294   :  { %3197 = vsyncadd [#allocation4], 4294967264 }
 0x295   :  { %2444 = vsyncpa [#allocation4], 1 }

// kernel: emnist_forward.2
= control target key start
LH: loop header
LB: loop body
LE: loop exit
PB: predicated region body
PF: predicated region fallthrough
CT: control target
= control target key end

     0   :  { %s8274_s18 = smov 0   ;;  %s9748_s0 = inlined_call_operand.vmem [shape: f32[2,784,16], index: 0, kind: input, shape index: {}]   ;;  %s9749_s1 = inlined_call_operand.vmem [shape: f32[16,32], index: 1, kind: input, shape index: {}]   ;;  %s9750_s2 = inlined_call_operand.vmem [shape: f32[1,32], index: 2, kind: input, shape index: {}]   ;;  %s9751_s3 = inlined_call_operand.vmem [shape: f32[288,64], index: 3, kind: input, shape index: {}]   ;;  %s9752_s4 = inlined_call_operand.vmem [shape: f32[1,64], index: 4, kind: input, shape index: {}]   ;;  %s9753_s5 = inlined_call_operand.vmem [shape: bf16[2,49,64], index: 5, kind: output, shape index: {}]  }
   0x1 LB: > { %s6283_s19 = sadd.s32 4294967295, %s8241_s18   ;;  %p6287_p0 = scmp.ge.s32.totalorder %s8241_s18, 1  ;;  %s8241_s18 = sphi %s8274_s18, %s15_s18  }
   0x2   : > { %p187_p1 = scmp.lt.s32.totalorder %s8241_s18, 3 }
   0x4   : > { %p188_p2 = pnand %p6287_p0, %p187_p1 }
   0x6   : > { %191 = sbr.rel (%p188_p2) target bundleno = 828 (0x33c), region = 40 }
   0xd   : > { %v274_v0 = vld [vmem:[%s9749_s1] sm:$0xff]  ;;  %v275_v1 = vld [vmem:[%s9749_s1 + $0x8] sm:$0xff]  ;;  %p215_p3 = scmp.lt.s32.totalorder %s6283_s19, 1  ;;  %vm283_vm0 = vcmask 130048   ;;  %vm225_vm1 = vcmask 261120   ;;  %vm1879_vm2 = vcmask 259072  }
   0xe   : > { %v8288_v2 = vpack.c.bf16 %v275_v1, %v274_v0  ;;  %vm4096_vm3 = vcmask 523264   ;;  %vm6039_vm4 = vcmask 519168   ;;  %vm6040_vm5 = vsmask.f32 3328 }
   0xf   : > { %s9785_s19 = smov (!%p215_p3, %s6283_s19), 1  ;;  %vm6041_vm6 = vmand %vm6039_vm4, %vm6040_vm5  ;;  %vm6071_vm7 = vcmask 519171   ;;  %vm6072_vm8 = vsmask.f32 7950  ;;  %vm6077_vm10 = vcmask 518144   ;;  %vm6132_vm13 = vcmask 519170  }
  0x10   : > { %7968 = vmatprep.subr.bf16.mxu1 %v8288_v2  ;;  %7797 = vmatprep.subr.bf16.mxu0 %v8288_v2  ;;  %s8222_s24 = smul.u32 784, %s9785_s19  ;;  %vm6073_vm9 = vmand %vm6071_vm7, %vm6072_vm8  ;;  %vm6101_vm11 = vsmask.f32 2304  ;;  %vm6133_vm14 = vsmask.f32 7946  ;;  %vm6193_vm4 = vcmask 519169  }
  0x11   : > { %7969 = vmatpush3.bf16.msra.mxu1 %v8288_v2  ;;  %7799 = vmatpush3.bf16.msra.mxu0 %v8288_v2  ;;  %s8223_s14 = smul.u32 28, %s9785_s19  ;;  %vm6102_vm12 = vmand %vm6077_vm10, %vm6101_vm11  ;;  %vm6194_vm5 = vsmask.f32 7942 }
  0x12   : > { %7801 = vmatprep.subr.bf16.mxu1 %v8288_v2  ;;  %7805 = vmatprep.subr.bf16.mxu0 %v8288_v2  ;;  %s8302_s27 = scalar_lea.vmem %s9748_s0, %s8222_s24  ;;  %vm9713_vm15 = vmand %vm6132_vm13, %vm6133_vm14 }
  0x13   : > { %v260_v3 = vld [vmem:[%s8302_s27] sm:$0xff]  ;;  %v261_v5 = vld [vmem:[%s8302_s27 + $0x8] sm:$0xff]  ;;  %v262_v7 = vld [vmem:[%s8302_s27 + $0x10] sm:$0xff]  ;;  %s9667_s19 = scalar_lea.vmem %s9753_s5, %s8223_s14 }
  0x14   : > { %v268_v4 = vld [vmem:[%s8302_s27 + $0x40] sm:$0xff]  ;;  %7103 = vmatprep.mubr.msk.f32.mxu0 %vm283_vm0, %v260_v3  ;;  %v269_v6 = vld [vmem:[%s8302_s27 + $0x48] sm:$0xff]  ;;  %v270_v8 = vld [vmem:[%s8302_s27 + $0x50] sm:$0xff] }
  0x15   : > { %7115 = vmatprep.mubr.msk.f32.mxu1 %vm283_vm0, %v268_v4  ;;  %7104 = vmatmul.mubr.msk.f32.vlgmr.msra.gmra.mrb[0].mxu0 %vm283_vm0, %v261_v5  ;;  %v263_v9 = vld [vmem:[%s8302_s27 + $0x18] sm:$0xff]  ;;  %v264_v11 = vld [vmem:[%s8302_s27 + $0x20] sm:$0xff]  ;;  %v265_v13 = vld [vmem:[%s8302_s27 + $0x28] sm:$0xff] }
  0x16   : > { %7116 = vmatmul.mubr.msk.f32.vlgmr.msra.gmra.mrb[0].mxu1 %vm283_vm0, %v269_v6  ;;  %7106 = vmatprep.mubr.msk.f32.mxu0 %vm283_vm0, %v262_v7  ;;  %v271_v10 = vld [vmem:[%s8302_s27 + $0x58] sm:$0xff]  ;;  %v272_v12 = vld [vmem:[%s8302_s27 + $0x60] sm:$0xff]  ;;  %v273_v14 = vld [vmem:[%s8302_s27 + $0x68] sm:$0xff] }
  0x17   : > { %7803 = vmatpush3.bf16.msra.mxu1 %v8288_v2  ;;  %7118 = vmatprep.mubr.msk.f32.mxu1 %vm283_vm0, %v270_v8  ;;  %v266_v15 = vld [vmem:[%s8302_s27 + $0x30] sm:$0xff]  ;;  %v267_v17 = vld [vmem:[%s8302_s27 + $0x38] sm:$0xff]  ;;  %v491_v19 = vld [vmem:[%s8302_s27 + $0x80] sm:$0xff] }
  0x18   : > { %7809 = vmatprep.subr.bf16.mxu1 %v8288_v2  ;;  %7807 = vmatpush3.bf16.msra.mxu0 %v8288_v2  ;;  %v489_v16 = vld [vmem:[%s8302_s27 + $0x70] sm:$0xff]  ;;  %v490_v18 = vld [vmem:[%s8302_s27 + $0x78] sm:$0xff]  ;;  %v717_v20 = vld [vmem:[%s8302_s27 + $0xe0] sm:$0xff] }
  0x19   : > { %7107 = vmatmul.mubr.msk.f32.gmra.mrb[2].mxu0 %vm283_vm0, %v263_v9  ;;  %7813 = vmatprep.subr.bf16.mxu0 %v8288_v2  ;;  %v492_v21 = vld [vmem:[%s8302_s27 + $0x88] sm:$0xff]  ;;  %v493_v23 = vld [vmem:[%s8302_s27 + $0x90] sm:$0xff]  ;;  %v494_v25 = vld [vmem:[%s8302_s27 + $0x98] sm:$0xff] }
  0x1a   : > { %7119 = vmatmul.mubr.msk.f32.gmra.mrb[2].mxu1 %vm283_vm0, %v271_v10  ;;  %7109 = vmatprep.mubr.msk.f32.mxu0 %vm283_vm0, %v264_v11  ;;  %v718_v22 = vld [vmem:[%s8302_s27 + $0xe8] sm:$0xff]  ;;  %v719_v24 = vld [vmem:[%s8302_s27 + $0xf0] sm:$0xff]  ;;  %v720_v26 = vld [vmem:[%s8302_s27 + $0xf8] sm:$0xff] }
  0x1b   : > { %7121 = vmatprep.mubr.msk.f32.mxu1 %vm283_vm0, %v272_v12  ;;  %v495_v27 = vld [vmem:[%s8302_s27 + $0xa0] sm:$0xff]  ;;  %v496_v29 = vld [vmem:[%s8302_s27 + $0xa8] sm:$0xff]  ;;  %v497_v31 = vld [vmem:[%s8302_s27 + $0xb0] sm:$0xff] }
  0x1c   : > { %v721_v28 = vld [vmem:[%s8302_s27 + $0x100] sm:$0xff]  ;;  %v722_v30 = vld [vmem:[%s8302_s27 + $0x108] sm:$0xff]  ;;  %v723_v32 = vld [vmem:[%s8302_s27 + $0x110] sm:$0xff] }
  0x1d   : > { %7110 = vmatmul.mubr.msk.f32.gmra.mrb[4].mxu0 %vm283_vm0, %v265_v13  ;;  %v498_v33 = vld [vmem:[%s8302_s27 + $0xb8] sm:$0xff]  ;;  %v499_v35 = vld [vmem:[%s8302_s27 + $0xc0] sm:$0xff]  ;;  %v500_v37 = vld [vmem:[%s8302_s27 + $0xc8] sm:$0xff] }
  0x1e   : > { %7122 = vmatmul.mubr.msk.f32.gmra.mrb[4].mxu1 %vm283_vm0, %v273_v14  ;;  %7112 = vmatprep.mubr.msk.f32.mxu0 %vm283_vm0, %v266_v15  ;;  %v724_v34 = vld [vmem:[%s8302_s27 + $0x118] sm:$0xff]  ;;  %v725_v36 = vld [vmem:[%s8302_s27 + $0x120] sm:$0xff]  ;;  %v726_v38 = vld [vmem:[%s8302_s27 + $0x128] sm:$0xff] }
  0x1f   : > { %7128 = vmatprep.mubr.msk.f32.mxu1 %vm283_vm0, %v489_v16  ;;  %v501_v39 = vld [vmem:[%s8302_s27 + $0xd0] sm:$0xff]  ;;  %v502_v41 = vld [vmem:[%s8302_s27 + $0xd8] sm:$0xff]  ;;  %v729_v43 = vld [vmem:[%s8302_s27 + $0x140] sm:$0xff] }
  0x20   : > { %v727_v40 = vld [vmem:[%s8302_s27 + $0x130] sm:$0xff]  ;;  %v728_v42 = vld [vmem:[%s8302_s27 + $0x138] sm:$0xff]  ;;  %v730_v45 = vld [vmem:[%s8302_s27 + $0x148] sm:$0xff] }
  0x21   : > { %7113 = vmatmul.mubr.msk.f32.gmra.mrb[6].mxu0 %vm283_vm0, %v267_v17  ;;  %v945_v44 = vld [vmem:[%s8302_s27 + $0x150] sm:$0xff]  ;;  %v946_v46 = vld [vmem:[%s8302_s27 + $0x158] sm:$0xff]  ;;  %v947_v47 = vld [vmem:[%s8302_s27 + $0x160] sm:$0xff] }
  0x22   : > { %7129 = vmatmul.mubr.msk.f32.vlgmr.msra.gmra.mrb[6].mxu1 %vm283_vm0, %v490_v18  ;;  %7153 = vmatprep.mubr.msk.f32.mxu0 %vm283_vm0, %v717_v20  ;;  %v1173_v48 = vld [vmem:[%s8302_s27 + $0x1c0] sm:$0xff]  ;;  %v948_v49 = vld [vmem:[%s8302_s27 + $0x168] sm:$0xff]  ;;  %v949_v51 = vld [vmem:[%s8302_s27 + $0x170] sm:$0xff] }
  0x23   : > { %7811 = vmatpush3.bf16.msra.mxu1 %v8288_v2  ;;  %7131 = vmatprep.mubr.msk.f32.mxu1 %vm283_vm0, %v491_v19  ;;  %v1174_v50 = vld [vmem:[%s8302_s27 + $0x1c8] sm:$0xff]  ;;  %v1175_v52 = vld [vmem:[%s8302_s27 + $0x1d0] sm:$0xff]  ;;  %v950_v53 = vld [vmem:[%s8302_s27 + $0x178] sm:$0xff] }
  0x24   : > { %7817 = vmatprep.subr.bf16.mxu1 %v8288_v2  ;;  %v1176_v54 = vld [vmem:[%s8302_s27 + $0x1d8] sm:$0xff]  ;;  %v951_v55 = vld [vmem:[%s8302_s27 + $0x180] sm:$0xff]  ;;  %v952_v57 = vld [vmem:[%s8302_s27 + $0x188] sm:$0xff] }
  0x25   : > { %7154 = vmatmul.mubr.msk.f32.vlgmr.msra.gmra.mrb[8].mxu0 %vm283_vm0, %v718_v22  ;;  %v1177_v56 = vld [vmem:[%s8302_s27 + $0x1e0] sm:$0xff]  ;;  %v1178_v58 = vld [vmem:[%s8302_s27 + $0x1e8] sm:$0xff]  ;;  %v953_v59 = vld [vmem:[%s8302_s27 + $0x190] sm:$0xff] }
  0x26   : > { %7132 = vmatmul.mubr.msk.f32.gmra.mrb[8].mxu1 %vm283_vm0, %v492_v21  ;;  %7156 = vmatprep.mubr.msk.f32.mxu0 %vm283_vm0, %v719_v24  ;;  %v1179_v60 = vld [vmem:[%s8302_s27 + $0x1f0] sm:$0xff]  ;;  %v954_v61 = vld [vmem:[%s8302_s27 + $0x198] sm:$0xff]  ;;  %v955_v63 = vld [vmem:[%s8302_s27 + $0x1a0] sm:$0xff] }
  0x27   : > { %7134 = vmatprep.mubr.msk.f32.mxu1 %vm283_vm0, %v493_v23  ;;  %7815 = vmatpush3.bf16.msra.mxu0 %v8288_v2  ;;  %v1180_v62 = vld [vmem:[%s8302_s27 + $0x1f8] sm:$0xff]  ;;  %v1181_v0 = vld [vmem:[%s8302_s27 + $0x200] sm:$0xff]  ;;  %v956_v1 = vld [vmem:[%s8302_s27 + $0x1a8] sm:$0xff] }
  0x28   : > { %7821 = vmatprep.subr.bf16.mxu0 %v8288_v2  ;;  %v957_v3 = vld [vmem:[%s8302_s27 + $0x1b0] sm:$0xff]  ;;  %v958_v5 = vld [vmem:[%s8302_s27 + $0x1b8] sm:$0xff]  ;;  %v1185_v7 = vld [vmem:[%s8302_s27 + $0x220] sm:$0xff] }
  0x29   : > { %7157 = vmatmul.mubr.msk.f32.gmra.mrb[10].mxu0 %vm283_vm0, %v720_v26  ;;  %v1183_v4 = vld [vmem:[%s8302_s27 + $0x210] sm:$0xff]  ;;  %v1184_v6 = vld [vmem:[%s8302_s27 + $0x218] sm:$0xff]  ;;  %v1186_v9 = vld [vmem:[%s8302_s27 + $0x228] sm:$0xff] }
  0x2a   : > { %7135 = vmatmul.mubr.msk.f32.gmra.mrb[10].mxu1 %vm283_vm0, %v494_v25  ;;  %7159 = vmatprep.mubr.msk.f32.mxu0 %vm283_vm0, %v721_v28  ;;  %v1401_v8 = vld [vmem:[%s8302_s27 + $0x230] sm:$0xff]  ;;  %v1402_v10 = vld [vmem:[%s8302_s27 + $0x238] sm:$0xff]  ;;  %v1403_v11 = vld [vmem:[%s8302_s27 + $0x240] sm:$0xff] }
  0x2b   : > { %7137 = vmatprep.mubr.msk.f32.mxu1 %vm283_vm0, %v495_v27  ;;  %v1629_v12 = vld [vmem:[%s8302_s27 + $0x2a0] sm:$0xff]  ;;  %v1404_v13 = vld [vmem:[%s8302_s27 + $0x248] sm:$0xff]  ;;  %v1405_v15 = vld [vmem:[%s8302_s27 + $0x250] sm:$0xff] }
  0x2c   : > { %v1630_v14 = vld [vmem:[%s8302_s27 + $0x2a8] sm:$0xff]  ;;  %v1631_v16 = vld [vmem:[%s8302_s27 + $0x2b0] sm:$0xff]  ;;  %v1406_v17 = vld [vmem:[%s8302_s27 + $0x258] sm:$0xff] }
  0x2d   : > { %7160 = vmatmul.mubr.msk.f32.gmra.mrb[12].mxu0 %vm283_vm0, %v722_v30  ;;  %v1632_v18 = vld [vmem:[%s8302_s27 + $0x2b8] sm:$0xff]  ;;  %v1407_v19 = vld [vmem:[%s8302_s27 + $0x260] sm:$0xff]  ;;  %v1408_v21 = vld [vmem:[%s8302_s27 + $0x268] sm:$0xff] }
  0x2e   : > { %7138 = vmatmul.mubr.msk.f32.gmra.mrb[12].mxu1 %vm283_vm0, %v496_v29  ;;  %7162 = vmatprep.mubr.msk.f32.mxu0 %vm283_vm0, %v723_v32  ;;  %v1633_v20 = vld [vmem:[%s8302_s27 + $0x2c0] sm:$0xff]  ;;  %v1634_v22 = vld [vmem:[%s8302_s27 + $0x2c8] sm:$0xff]  ;;  %v1409_v23 = vld [vmem:[%s8302_s27 + $0x270] sm:$0xff] }
  0x2f   : > { %7140 = vmatprep.mubr.msk.f32.mxu1 %vm283_vm0, %v497_v31  ;;  %v1635_v24 = vld [vmem:[%s8302_s27 + $0x2d0] sm:$0xff]  ;;  %v1410_v25 = vld [vmem:[%s8302_s27 + $0x278] sm:$0xff]  ;;  %v1411_v27 = vld [vmem:[%s8302_s27 + $0x280] sm:$0xff] }
  0x30   : > { %v1636_v26 = vld [vmem:[%s8302_s27 + $0x2d8] sm:$0xff]  ;;  %v1637_v28 = vld [vmem:[%s8302_s27 + $0x2e0] sm:$0xff]  ;;  %v1412_v29 = vld [vmem:[%s8302_s27 + $0x288] sm:$0xff] }
  0x31   : > { %7163 = vmatmul.mubr.msk.f32.gmra.mrb[14].mxu0 %vm283_vm0, %v724_v34  ;;  %v1638_v30 = vld [vmem:[%s8302_s27 + $0x2e8] sm:$0xff]  ;;  %v1413_v31 = vld [vmem:[%s8302_s27 + $0x290] sm:$0xff]  ;;  %v1640_v34 = vld [vmem:[%s8302_s27 + $0x2f8] sm:$0xff] }
  0x32   : > { %7141 = vmatmul.mubr.msk.f32.gmra.mrb[14].mxu1 %vm283_vm0, %v498_v33  ;;  %7165 = vmatprep.mubr.msk.f32.mxu0 %vm283_vm0, %v725_v36  ;;  %v1639_v32 = vld [vmem:[%s8302_s27 + $0x2f0] sm:$0xff]  ;;  %v1414_v33 = vld [vmem:[%s8302_s27 + $0x298] sm:$0xff]  ;;  %v1642_v36 = vld [vmem:[%s8302_s27 + $0x308] sm:$0xff] }
  0x33   : > { %7143 = vmatprep.mubr.msk.f32.mxu1 %vm283_vm0, %v499_v35  ;;  %v1641_v35 = vld [vmem:[%s8302_s27 + $0x300] sm:$0xff] }
  0x35   : > { %7166 = vmatmul.mubr.msk.f32.gmra.mrb[16].mxu0 %vm283_vm0, %v726_v38  ;;  %v2216_v38 = vld [vmem:[%s9751_s3 + $0x8] sm:$0xff] }
  0x36   : > { %7144 = vmatmul.mubr.msk.f32.gmra.mrb[16].mxu1 %vm283_vm0, %v500_v37  ;;  %7168 = vmatprep.mubr.msk.f32.mxu0 %vm283_vm0, %v727_v40  ;;  %v2215_v37 = vld [vmem:[%s9751_s3] sm:$0xff]  ;;  %v8243_v40 = vmov 0.0  }
  0x37   : > { %7146 = vmatprep.mubr.msk.f32.mxu1 %vm283_vm0, %v501_v39  ;;  %v7824_v39 = vpack.c.bf16 %v2216_v38, %v2215_v37  ;;  %226 = vst.msk [vmem:[#allocation3] sm:$0xff] %vm225_vm1, %v8243_v40  ;;  %227 = vst.msk [vmem:[#allocation3 + $0x8] sm:$0xff] %vm225_vm1, %v8243_v40 }
  0x38   : > { %228 = vst.msk [vmem:[#allocation3 + $0x10] sm:$0xff] %vm225_vm1, %v8243_v40  ;;  %229 = vst.msk [vmem:[#allocation3 + $0x18] sm:$0xff] %vm225_vm1, %v8243_v40 }
  0x39   : > { %7169 = vmatmul.mubr.msk.f32.gmra.mrb[18].mxu0 %vm283_vm0, %v728_v42  ;;  %230 = vst.msk [vmem:[#allocation3 + $0x20] sm:$0xff] %vm225_vm1, %v8243_v40  ;;  %231 = vst.msk [vmem:[#allocation3 + $0x28] sm:$0xff] %vm225_vm1, %v8243_v40  ;;  %v2218_v42 = vld [vmem:[%s9751_s3 + $0x18] sm:$0xff] }
  0x3a   : > { %7147 = vmatmul.mubr.msk.f32.gmra.mrb[18].mxu1 %vm283_vm0, %v502_v41  ;;  %7171 = vmatprep.mubr.msk.f32.mxu0 %vm283_vm0, %v729_v43  ;;  %232 = vst.msk [vmem:[#allocation3 + $0x30] sm:$0xff] %vm225_vm1, %v8243_v40  ;;  %233 = vst.msk [vmem:[#allocation3 + $0x38] sm:$0xff] %vm225_vm1, %v8243_v40  ;;  %v2217_v41 = vld [vmem:[%s9751_s3 + $0x10] sm:$0xff] }
  0x3b   : > { %7178 = vmatprep.mubr.msk.f32.mxu1 %vm283_vm0, %v945_v44  ;;  %234 = vst.msk [vmem:[#allocation3 + $0x40] sm:$0xff] %vm225_vm1, %v8243_v40  ;;  %235 = vst.msk [vmem:[#allocation3 + $0x48] sm:$0xff] %vm225_vm1, %v8243_v40  ;;  %v7828_v43 = vpack.c.bf16 %v2218_v42, %v2217_v41 }
  0x3c   : > { %236 = vst.msk [vmem:[#allocation3 + $0x50] sm:$0xff] %vm225_vm1, %v8243_v40  ;;  %237 = vst.msk [vmem:[#allocation3 + $0x58] sm:$0xff] %vm225_vm1, %v8243_v40 }
  0x3d   : > { %7172 = vmatmul.mubr.msk.f32.gmra.mrb[20].mxu0 %vm283_vm0, %v730_v45  ;;  %238 = vst.msk [vmem:[#allocation3 + $0x60] sm:$0xff] %vm225_vm1, %v8243_v40  ;;  %239 = vst.msk [vmem:[#allocation3 + $0x68] sm:$0xff] %vm225_vm1, %v8243_v40 }
  0x3e   : > { %7179 = vmatmul.mubr.msk.f32.vlgmr.msra.gmra.mrb[20].mxu1 %vm283_vm0, %v946_v46  ;;  %7203 = vmatprep.mubr.msk.f32.mxu0 %vm283_vm0, %v1173_v48  ;;  %240 = vst.msk [vmem:[#allocation3 + $0x70] sm:$0xff] %vm225_vm1, %v8243_v40  ;;  %241 = vst.msk [vmem:[#allocation3 + $0x78] sm:$0xff] %vm225_vm1, %v8243_v40  ;;  %v2201_v44 = vld [vmem:[#allocation3] sm:$0xff]  ;;  %v2202_v45 = vld [vmem:[#allocation3 + $0x8] sm:$0xff] }
  0x3f   : > { %7819 = vmatpush3.bf16.msra.mxu1 %v8288_v2  ;;  %7181 = vmatprep.mubr.msk.f32.mxu1 %vm283_vm0, %v947_v47  ;;  %242 = vst.msk [vmem:[#allocation3 + $0x80] sm:$0xff] %vm225_vm1, %v8243_v40  ;;  %243 = vst.msk [vmem:[#allocation3 + $0x88] sm:$0xff] %vm225_vm1, %v8243_v40  ;;  %v2424_v46 = vld [vmem:[%s9751_s3 + $0x20] sm:$0xff]  ;;  %v2425_v47 = vld [vmem:[%s9751_s3 + $0x28] sm:$0xff] }
  0x40   : > { %7825 = vmatprep.subr.bf16.mxu1 %v7824_v39  ;;  %244 = vst.msk [vmem:[#allocation3 + $0x90] sm:$0xff] %vm225_vm1, %v8243_v40  ;;  %245 = vst.msk [vmem:[#allocation3 + $0x98] sm:$0xff] %vm225_vm1, %v8243_v40  ;;  %v8563_v48 = vpack.c.bf16 %v2425_v47, %v2424_v46 }
  0x41   : > { %7204 = vmatmul.mubr.msk.f32.vlgmr.msra.gmra.mrb[22].mxu0 %vm283_vm0, %v1174_v50  ;;  %246 = vst.msk [vmem:[#allocation3 + $0xa0] sm:$0xff] %vm225_vm1, %v8243_v40  ;;  %247 = vst.msk [vmem:[#allocation3 + $0xa8] sm:$0xff] %vm225_vm1, %v8243_v40  ;;  %v2427_v50 = vld [vmem:[%s9751_s3 + $0x38] sm:$0xff] }
  0x42   : > { %7182 = vmatmul.mubr.msk.f32.gmra.mrb[22].mxu1 %vm283_vm0, %v948_v49  ;;  %7206 = vmatprep.mubr.msk.f32.mxu0 %vm283_vm0, %v1175_v52  ;;  %248 = vst.msk [vmem:[#allocation3 + $0xb0] sm:$0xff] %vm225_vm1, %v8243_v40  ;;  %249 = vst.msk [vmem:[#allocation3 + $0xb8] sm:$0xff] %vm225_vm1, %v8243_v40  ;;  %v2426_v49 = vld [vmem:[%s9751_s3 + $0x30] sm:$0xff]  ;;  %v2633_v52 = vld [vmem:[%s9751_s3 + $0x40] sm:$0xff] }
  0x43   : > { %7184 = vmatprep.mubr.msk.f32.mxu1 %vm283_vm0, %v949_v51  ;;  %7823 = vmatpush3.bf16.msra.mxu0 %v8288_v2  ;;  %v1182_v2 = vld [vmem:[%s8302_s27 + $0x208] sm:$0xff]  ;;  %250 = vst.msk [vmem:[#allocation3 + $0xc0] sm:$0xff] %vm225_vm1, %v8243_v40  ;;  %251 = vst.msk [vmem:[#allocation3 + $0xc8] sm:$0xff] %vm225_vm1, %v8243_v40  ;;  %v8574_v51 = vpack.c.bf16 %v2427_v50, %v2426_v49 }
  0x44   : > { %7897 = vmatprep.subr.bf16.mxu0 %v7824_v39  ;;  %252 = vst.msk [vmem:[#allocation3 + $0xd0] sm:$0xff] %vm225_vm1, %v8243_v40  ;;  %253 = vst.msk [vmem:[#allocation3 + $0xd8] sm:$0xff] %vm225_vm1, %v8243_v40 }
  0x45   : > { %7207 = vmatmul.mubr.msk.f32.gmra.mrb[24].mxu0 %vm283_vm0, %v1176_v54  ;;  %254 = vst.msk [vmem:[#allocation3 + $0xe0] sm:$0xff] %vm225_vm1, %v8243_v40  ;;  %255 = vst.msk [vmem:[#allocation3 + $0xe8] sm:$0xff] %vm225_vm1, %v8243_v40 }
  0x46   : > { %7185 = vmatmul.mubr.msk.f32.gmra.mrb[24].mxu1 %vm283_vm0, %v950_v53  ;;  %7209 = vmatprep.mubr.msk.f32.mxu0 %vm283_vm0, %v1177_v56  ;;  %256 = vst.msk [vmem:[#allocation3 + $0xf0] sm:$0xff] %vm225_vm1, %v8243_v40  ;;  %257 = vst.msk [vmem:[#allocation3 + $0xf8] sm:$0xff] %vm225_vm1, %v8243_v40  ;;  %v2634_v53 = vld [vmem:[%s9751_s3 + $0x48] sm:$0xff] }
  0x47   : > { %7187 = vmatprep.mubr.msk.f32.mxu1 %vm283_vm0, %v951_v55  ;;  %258 = vst.msk [vmem:[#allocation3 + $0x100] sm:$0xff] %vm225_vm1, %v8243_v40  ;;  %v8584_v54 = vpack.c.bf16 %v2634_v53, %v2633_v52  ;;  %v8590_v55 = vld [vmem:[%s9750_s2] ss:$0 sm:$0xff] }
  0x49   : > { %7210 = vmatmul.mubr.msk.f32.gmra.mrb[26].mxu0 %vm283_vm0, %v1178_v58 }
  0x4a   : > { %7188 = vmatmul.mubr.msk.f32.gmra.mrb[26].mxu1 %vm283_vm0, %v952_v57  ;;  %7212 = vmatprep.mubr.msk.f32.mxu0 %vm283_vm0, %v1179_v60 }
  0x4b   : > { %7190 = vmatprep.mubr.msk.f32.mxu1 %vm283_vm0, %v953_v59 }
  0x4d   : > { %7213 = vmatmul.mubr.msk.f32.gmra.mrb[28].mxu0 %vm283_vm0, %v1180_v62 }
  0x4e   : > { %7191 = vmatmul.mubr.msk.f32.gmra.mrb[28].mxu1 %vm283_vm0, %v954_v61  ;;  %7215 = vmatprep.mubr.msk.f32.mxu0 %vm283_vm0, %v1181_v0 }
  0x4f   : > { %7193 = vmatprep.mubr.msk.f32.mxu1 %vm283_vm0, %v955_v63 }
  0x51   : > { %7216 = vmatmul.mubr.msk.f32.gmra.mrb[30].mxu0 %vm283_vm0, %v1182_v2 }
  0x52   : > { %7194 = vmatmul.mubr.msk.f32.gmra.mrb[30].mxu1 %vm283_vm0, %v956_v1  ;;  %7218 = vmatprep.mubr.msk.f32.mxu0 %vm283_vm0, %v1183_v4 }
  0x53   : > { %7196 = vmatprep.mubr.msk.f32.mxu1 %vm283_vm0, %v957_v3 }
  0x55   : > { %7219 = vmatmul.mubr.msk.f32.gmra.mrb[32].mxu0 %vm283_vm0, %v1184_v6 }
  0x56   : > { %7197 = vmatmul.mubr.msk.f32.gmra.mrb[32].mxu1 %vm283_vm0, %v958_v5  ;;  %7221 = vmatprep.mubr.msk.f32.mxu0 %vm283_vm0, %v1185_v7 }
  0x57   : > { %7228 = vmatprep.mubr.msk.f32.mxu1 %vm283_vm0, %v1401_v8 }
  0x59   : > { %7222 = vmatmul.mubr.msk.f32.gmra.mrb[34].mxu0 %vm283_vm0, %v1186_v9 }
  0x5a   : > { %7229 = vmatmul.mubr.msk.f32.vlgmr.msra.gmra.mrb[34].mxu1 %vm283_vm0, %v1402_v10  ;;  %7253 = vmatprep.mubr.msk.f32.mxu0 %vm283_vm0, %v1629_v12 }
  0x5b   : > { %7231 = vmatprep.mubr.msk.f32.mxu1 %vm283_vm0, %v1403_v11  ;;  %7827 = vmatpush3.bf16.msra.mxu1 %v7824_v39 }
  0x5c   : > { %7829 = vmatprep.subr.bf16.mxu1 %v7828_v43 }
  0x5d   : > { %7254 = vmatmul.mubr.msk.f32.vlgmr.msra.gmra.mrb[36].mxu0 %vm283_vm0, %v1630_v14 }
  0x5e   : > { %7232 = vmatmul.mubr.msk.f32.gmra.mrb[36].mxu1 %vm283_vm0, %v1404_v13  ;;  %7256 = vmatprep.mubr.msk.f32.mxu0 %vm283_vm0, %v1631_v16 }
  0x5f   : > { %7234 = vmatprep.mubr.msk.f32.mxu1 %vm283_vm0, %v1405_v15  ;;  %7899 = vmatpush3.bf16.msra.mxu0 %v7824_v39 }
  0x60   : > { %7901 = vmatprep.subr.bf16.mxu0 %v7828_v43  ;;  %7831 = vmatpush3.bf16.msra.mxu1 %v7828_v43 }
  0x61   : > { %7257 = vmatmul.mubr.msk.f32.gmra.mrb[38].mxu0 %vm283_vm0, %v1632_v18  ;;  %7833 = vmatprep.subr.bf16.mxu1 %v8563_v48 }
  0x62   : > { %7235 = vmatmul.mubr.msk.f32.gmra.mrb[38].mxu1 %vm283_vm0, %v1406_v17  ;;  %7259 = vmatprep.mubr.msk.f32.mxu0 %vm283_vm0, %v1633_v20 }
  0x63   : > { %7237 = vmatprep.mubr.msk.f32.mxu1 %vm283_vm0, %v1407_v19  ;;  %7903 = vmatpush3.bf16.msra.mxu0 %v7828_v43 }
  0x64   : > { %7905 = vmatprep.subr.bf16.mxu0 %v8563_v48 }
  0x65   : > { %7260 = vmatmul.mubr.msk.f32.gmra.mrb[40].mxu0 %vm283_vm0, %v1634_v22 }
  0x66   : > { %7238 = vmatmul.mubr.msk.f32.gmra.mrb[40].mxu1 %vm283_vm0, %v1408_v21  ;;  %7262 = vmatprep.mubr.msk.f32.mxu0 %vm283_vm0, %v1635_v24 }
  0x67   : > { %7240 = vmatprep.mubr.msk.f32.mxu1 %vm283_vm0, %v1409_v23 }
  0x69   : > { %7263 = vmatmul.mubr.msk.f32.gmra.mrb[42].mxu0 %vm283_vm0, %v1636_v26 }
  0x6a   : > { %7241 = vmatmul.mubr.msk.f32.gmra.mrb[42].mxu1 %vm283_vm0, %v1410_v25  ;;  %7265 = vmatprep.mubr.msk.f32.mxu0 %vm283_vm0, %v1637_v28 }
  0x6b   : > { %7243 = vmatprep.mubr.msk.f32.mxu1 %vm283_vm0, %v1411_v27 }
  0x6d   : > { %7266 = vmatmul.mubr.msk.f32.gmra.mrb[44].mxu0 %vm283_vm0, %v1638_v30 }
  0x6e   : > { %7244 = vmatmul.mubr.msk.f32.gmra.mrb[44].mxu1 %vm283_vm0, %v1412_v29  ;;  %7268 = vmatprep.mubr.msk.f32.mxu0 %vm283_vm0, %v1639_v32 }
  0x6f   : > { %7246 = vmatprep.mubr.msk.f32.mxu1 %vm283_vm0, %v1413_v31 }
  0x71   : > { %7269 = vmatmul.mubr.msk.f32.gmra.mrb[46].mxu0 %vm283_vm0, %v1640_v34 }
  0x72   : > { %7247 = vmatmul.mubr.msk.f32.gmra.mrb[46].mxu1 %vm283_vm0, %v1414_v33  ;;  %7271 = vmatprep.mubr.msk.f32.mxu0 %vm283_vm0, %v1641_v35 }
  0x73   : > { %7282 = vmatprep.mubr.msk.f32.mxu1 %vm225_vm1, %v2201_v44 }
  0x75   : > { %7272 = vmatmul.mubr.msk.f32.gmra.mrb[48].mxu0 %vm283_vm0, %v1642_v36  ;;  %vm6138_vm0 = vcmask 517120  }
  0x76   : > { %7283 = vmatmul.mubr.msk.f32.vlgmr.msra.gmra.mrb[48].mxu1 %vm225_vm1, %v2202_v45 }
  0x77   : > { %7835 = vmatpush3.bf16.msra.mxu1 %v8563_v48 }
  0x78   : > { %7837 = vmatprep.subr.bf16.mxu1 %v8574_v51 }
  0x7b   : > { %7839 = vmatpush3.bf16.msra.mxu1 %v8574_v51 }
  0x7c   : > { %7841 = vmatprep.subr.bf16.mxu1 %v8584_v54 }
  0xe8   : > { %v7105_v57 = vpop.f32.mrb[0].mxu0 }
  0xe9   : > { %v7117_v56 = vpop.f32.mrb[0].mxu1  ;;  %v398_v60 = vadd.f32 %v7105_v57, %v8590_v55  ;;  %v392_v61 = vpop.f32.mrb[1].mxu0 }
  0xea   : > { %v438_v58 = vadd.f32 %v7117_v56, %v8590_v55  ;;  %v432_v59 = vpop.f32.mrb[1].mxu1  ;;  %v393_v63 = vadd.f32 %v8590_v55, %v392_v61 }
  0xeb   : > { %v433_v62 = vadd.f32 %v8590_v55, %v432_v59  ;;  %v462_v1 = vmax.f32 %v398_v60, 0.0 }
  0xec   : > { %v470_v0 = vmax.f32 %v438_v58, 0.0  ;;  %v461_v4 = vmax.f32 %v393_v63, 0.0  ;;  %v7108_v5 = vpop.f32.mrb[2].mxu0 }
  0xed   : > { %v469_v2 = vmax.f32 %v433_v62, 0.0  ;;  %v7120_v3 = vpop.f32.mrb[2].mxu1  ;;  %476 = vst.msk [vmem:[#allocation2 + $0x8] sm:$0xff] %vm225_vm1, %v462_v1  ;;  %v408_v8 = vadd.f32 %v7108_v5, %v8590_v55  ;;  %v402_v9 = vpop.f32.mrb[3].mxu0 }
  0xee   : > { %484 = vst.msk [vmem:[#allocation2 + $0x48] sm:$0xff] %vm225_vm1, %v470_v0  ;;  %v448_v6 = vadd.f32 %v7120_v3, %v8590_v55  ;;  %v442_v7 = vpop.f32.mrb[3].mxu1  ;;  %475 = vst.msk [vmem:[#allocation2] sm:$0xff] %vm225_vm1, %v461_v4  ;;  %v403_v11 = vadd.f32 %v8590_v55, %v402_v9 }
  0xef   : > { %483 = vst.msk [vmem:[#allocation2 + $0x40] sm:$0xff] %vm225_vm1, %v469_v2  ;;  %v443_v10 = vadd.f32 %v8590_v55, %v442_v7  ;;  %v464_v13 = vmax.f32 %v408_v8, 0.0 }
  0xf0   : > { %v472_v12 = vmax.f32 %v448_v6, 0.0  ;;  %v463_v16 = vmax.f32 %v403_v11, 0.0  ;;  %v7111_v17 = vpop.f32.mrb[4].mxu0 }
  0xf1   : > { %v471_v14 = vmax.f32 %v443_v10, 0.0  ;;  %v7123_v15 = vpop.f32.mrb[4].mxu1  ;;  %478 = vst.msk [vmem:[#allocation2 + $0x18] sm:$0xff] %vm225_vm1, %v464_v13  ;;  %v418_v20 = vadd.f32 %v7111_v17, %v8590_v55  ;;  %v412_v21 = vpop.f32.mrb[5].mxu0 }
  0xf2   : > { %486 = vst.msk [vmem:[#allocation2 + $0x58] sm:$0xff] %vm225_vm1, %v472_v12  ;;  %v458_v18 = vadd.f32 %v7123_v15, %v8590_v55  ;;  %v452_v19 = vpop.f32.mrb[5].mxu1  ;;  %477 = vst.msk [vmem:[#allocation2 + $0x10] sm:$0xff] %vm225_vm1, %v463_v16  ;;  %v413_v23 = vadd.f32 %v8590_v55, %v412_v21 }
  0xf3   : > { %485 = vst.msk [vmem:[#allocation2 + $0x50] sm:$0xff] %vm225_vm1, %v471_v14  ;;  %v453_v22 = vadd.f32 %v8590_v55, %v452_v19  ;;  %v466_v25 = vmax.f32 %v418_v20, 0.0 }
  0xf4   : > { %v474_v24 = vmax.f32 %v458_v18, 0.0  ;;  %v465_v27 = vmax.f32 %v413_v23, 0.0  ;;  %v7114_v28 = vpop.f32.mrb[6].mxu0 }
  0xf5   : > { %v473_v26 = vmax.f32 %v453_v22, 0.0  ;;  %v7130_v29 = vpop.f32.mrb[6].mxu1  ;;  %480 = vst.msk [vmem:[#allocation2 + $0x28] sm:$0xff] %vm225_vm1, %v466_v25  ;;  %v428_v30 = vadd.f32 %v7114_v28, %v8590_v55  ;;  %v422_v32 = vpop.f32.mrb[7].mxu0  ;;  %v1857_v42 = vld [vmem:[#allocation2] ss:$2 sm:$0xff] }
  0xf6   : > { %488 = vst.msk [vmem:[#allocation2 + $0x68] sm:$0xff] %vm225_vm1, %v474_v24  ;;  %v626_v31 = vadd.f32 %v7130_v29, %v8590_v55  ;;  %v620_v33 = vpop.f32.mrb[7].mxu1  ;;  %479 = vst.msk [vmem:[#allocation2 + $0x20] sm:$0xff] %vm225_vm1, %v465_v27  ;;  %v423_v34 = vadd.f32 %v8590_v55, %v422_v32  ;;  %v1861_v47 = vld [vmem:[#allocation2 + $0x1] ss:$2 sm:$0xff] }
  0xf7   : > { %487 = vst.msk [vmem:[#allocation2 + $0x60] sm:$0xff] %vm225_vm1, %v473_v26  ;;  %v621_v35 = vadd.f32 %v8590_v55, %v620_v33  ;;  %v468_v36 = vmax.f32 %v428_v30, 0.0  ;;  %v1864_v2 = vmax.f32 %v1857_v42, %v1861_v47 }
  0xf8   : > { %v690_v37 = vmax.f32 %v626_v31, 0.0  ;;  %v467_v38 = vmax.f32 %v423_v34, 0.0  ;;  %v7155_v41 = vpop.f32.mrb[8].mxu0 }
  0xf9   : > { %v689_v39 = vmax.f32 %v621_v35, 0.0  ;;  %v7133_v40 = vpop.f32.mrb[8].mxu1  ;;  %482 = vst.msk [vmem:[#allocation2 + $0x38] sm:$0xff] %vm225_vm1, %v468_v36  ;;  %v854_v44 = vadd.f32 %v7155_v41, %v8590_v55  ;;  %v1859_v49 = vld [vmem:[#allocation2 + $0x10] ss:$2 sm:$0x3f] }
  0xfa   : > { %704 = vst.msk [vmem:[#allocation2 + $0x78] sm:$0xff] %vm225_vm1, %v690_v37  ;;  %v636_v43 = vadd.f32 %v7133_v40, %v8590_v55  ;;  %v1884_v45 = vld [vmem:[#allocation2 + $0x48] ss:$2 sm:$0x3f]  ;;  %481 = vst.msk [vmem:[#allocation2 + $0x30] sm:$0xff] %vm225_vm1, %v467_v38  ;;  %v630_v52 = vpop.f32.mrb[9].mxu1 }
  0xfb   : > { %v1888_v46 = vld [vmem:[#allocation2 + $0x49] ss:$2 sm:$0x3f]  ;;  %703 = vst.msk [vmem:[#allocation2 + $0x70] sm:$0xff] %vm225_vm1, %v689_v39  ;;  %v918_v53 = vmax.f32 %v854_v44, 0.0  ;;  %v848_v56 = vpop.f32.mrb[9].mxu0  ;;  %v631_v58 = vadd.f32 %v8590_v55, %v630_v52 }
  0xfc   : > { %v692_v50 = vmax.f32 %v636_v43, 0.0  ;;  %v1863_v57 = vld [vmem:[#allocation2 + $0x11] ss:$2 sm:$0x3f]  ;;  %v849_v60 = vadd.f32 %v8590_v55, %v848_v56  ;;  %v7158_v61 = vpop.f32.mrb[10].mxu0  ;;  %v1890_v8 = vmax.f32 %v1884_v45, %v1888_v46 }
  0xfd   : > { %v7136_v59 = vpop.f32.mrb[10].mxu1  ;;  %932 = vst.msk [vmem:[#allocation2 + $0xe8] sm:$0xff] %vm225_vm1, %v918_v53  ;;  %v691_v5 = vmax.f32 %v631_v58, 0.0  ;;  %v864_v7 = vadd.f32 %v7158_v61, %v8590_v55  ;;  %v1867_v10 = vld [vmem:[#allocation2 + $0x1c] ss:$2 sm:$0xff]  ;;  %v1865_v14 = vmax.f32 %v1859_v49, %v1863_v57  ;;  %v858_v33 = vpop.f32.mrb[11].mxu0 }
  0xfe   : > { %v1892_v62 = vld [vmem:[#allocation2 + $0x54] ss:$2 sm:$0xff]  ;;  %v1894_v63 = vld [vmem:[#allocation2 + $0x64] ss:$2 sm:$0x3f]  ;;  %706 = vst.msk [vmem:[#allocation2 + $0x88] sm:$0xff] %vm225_vm1, %v692_v50  ;;  %v646_v0 = vadd.f32 %v7136_v59, %v8590_v55  ;;  %v859_v35 = vadd.f32 %v8590_v55, %v858_v33 }
  0xff   : > { %v640_v1 = vpop.f32.mrb[11].mxu1  ;;  %v1896_v3 = vld [vmem:[#allocation2 + $0x55] ss:$2 sm:$0xff]  ;;  %v1898_v4 = vld [vmem:[#allocation2 + $0x65] ss:$2 sm:$0x3f] }
 0x100   : > { %v641_v6 = vadd.f32 %v8590_v55, %v640_v1  ;;  %v1900_v9 = vmax.f32 %v1894_v63, %v1898_v4  ;;  %v1871_v11 = vld [vmem:[#allocation2 + $0x1d] ss:$2 sm:$0xff]  ;;  %v694_v12 = vmax.f32 %v646_v0, 0.0  ;;  %v917_v13 = vmax.f32 %v849_v60, 0.0  ;;  %v1882_v16 = vld [vmem:[#allocation2 + $0x38] ss:$2 sm:$0xff] }
 0x101   : > { %v1874_v15 = vmax.f32 %v1867_v10, %v1871_v11  ;;  %v1886_v17 = vld [vmem:[#allocation2 + $0x39] ss:$2 sm:$0xff]  ;;  %705 = vst.msk [vmem:[#allocation2 + $0x80] sm:$0xff] %vm225_vm1, %v691_v5  ;;  %v7139_v19 = vpop.f32.mrb[12].mxu1  ;;  %v1899_v20 = vmax.f32 %v1892_v62, %v1896_v3  ;;  %v920_v28 = vmax.f32 %v864_v7, 0.0  ;;  %v7161_v36 = vpop.f32.mrb[12].mxu0 }
 0x102   : > { %v693_v18 = vmax.f32 %v641_v6, 0.0  ;;  %v1902_v21 = vmax.f32 %v1890_v8, %v1900_v9  ;;  %v1889_v22 = vmax.f32 %v1882_v16, %v1886_v17  ;;  %v1869_v23 = vld [vmem:[#allocation2 + $0x2c] ss:$2 sm:$0x3f]  ;;  %708 = vst.msk [vmem:[#allocation2 + $0x98] sm:$0xff] %vm225_vm1, %v694_v12  ;;  %931 = vst.msk [vmem:[#allocation2 + $0xe0] sm:$0xff] %vm225_vm1, %v917_v13  ;;  %v656_v25 = vadd.f32 %v7139_v19, %v8590_v55 }
 0x103   : > { %v1873_v24 = vld [vmem:[#allocation2 + $0x2d] ss:$2 sm:$0x3f]  ;;  %v1876_v26 = vmax.f32 %v1864_v2, %v1874_v15  ;;  %v650_v29 = vpop.f32.mrb[13].mxu1  ;;  %934 = vst.msk [vmem:[#allocation2 + $0xf8] sm:$0xff] %vm225_vm1, %v920_v28  ;;  %v874_v39 = vadd.f32 %v7161_v36, %v8590_v55  ;;  %v868_v40 = vpop.f32.mrb[13].mxu0 }
 0x104   : > { %v1875_v27 = vmax.f32 %v1869_v23, %v1873_v24  ;;  %707 = vst.msk [vmem:[#allocation2 + $0x90] sm:$0xff] %vm225_vm1, %v693_v18  ;;  %v1901_v30 = vmax.f32 %v1889_v22, %v1899_v20  ;;  %v696_v31 = vmax.f32 %v656_v25, 0.0  ;;  %v651_v32 = vadd.f32 %v8590_v55, %v650_v29  ;;  %v7164_v45 = vpop.f32.mrb[14].mxu0  ;;  %v1906_v47 = vld [vmem:[#allocation2 + $0x70] ss:$2 sm:$0xff] }
 0x105   : > { %1904 = vst.msk [vmem:[#allocation3 + $0x29] sm:$0x3f] %vm1879_vm2, %v1902_v21  ;;  %v7142_v37 = vpop.f32.mrb[14].mxu1  ;;  %v919_v43 = vmax.f32 %v859_v35, 0.0  ;;  %v869_v44 = vadd.f32 %v8590_v55, %v868_v40  ;;  %v1910_v49 = vld [vmem:[#allocation2 + $0x71] ss:$2 sm:$0xff]  ;;  %v884_v50 = vadd.f32 %v7164_v45, %v8590_v55 }
 0x106   : > { %v1877_v34 = vmax.f32 %v1865_v14, %v1875_v27  ;;  %1878 = vst.msk [vmem:[#allocation3 + $0x11] sm:$0xff] %vm225_vm1, %v1876_v26  ;;  %710 = vst.msk [vmem:[#allocation2 + $0xa8] sm:$0xff] %vm225_vm1, %v696_v31  ;;  %v695_v38 = vmax.f32 %v651_v32, 0.0  ;;  %v666_v41 = vadd.f32 %v7142_v37, %v8590_v55  ;;  %v660_v42 = vpop.f32.mrb[15].mxu1  ;;  %v922_v52 = vmax.f32 %v874_v39, 0.0  ;;  %v878_v0 = vpop.f32.mrb[15].mxu0 }
 0x107   : > { %1903 = vst.msk [vmem:[#allocation3 + $0x21] sm:$0xff] %vm225_vm1, %v1901_v30  ;;  %v661_v46 = vadd.f32 %v8590_v55, %v660_v42  ;;  %933 = vst.msk [vmem:[#allocation2 + $0xf0] sm:$0xff] %vm225_vm1, %v919_v43  ;;  %v921_v53 = vmax.f32 %v869_v44, 0.0  ;;  %v924_v59 = vmax.f32 %v884_v50, 0.0  ;;  %v1913_v60 = vmax.f32 %v1906_v47, %v1910_v49 }
 0x108   : > { %1880 = vst.msk [vmem:[#allocation3 + $0x19] sm:$0x3f] %vm1879_vm2, %v1877_v34  ;;  %v698_v58 = vmax.f32 %v666_v41, 0.0  ;;  %v1908_v61 = vld [vmem:[#allocation2 + $0x80] ss:$2 sm:$0x3f]  ;;  %v879_v3 = vadd.f32 %v8590_v55, %v878_v0 }
 0x109   : > { %709 = vst.msk [vmem:[#allocation2 + $0xa0] sm:$0xff] %vm225_vm1, %v695_v38  ;;  %936 = vst.msk [vmem:[#allocation2 + $0x108] sm:$0xff] %vm225_vm1, %v922_v52  ;;  %v697_v63 = vmax.f32 %v661_v46, 0.0  ;;  %v7145_v1 = vpop.f32.mrb[16].mxu1  ;;  %v7167_v6 = vpop.f32.mrb[16].mxu0 }
 0x10a   : > { %935 = vst.msk [vmem:[#allocation2 + $0x100] sm:$0xff] %vm225_vm1, %v921_v53  ;;  %v1912_v2 = vld [vmem:[#allocation2 + $0x81] ss:$2 sm:$0x3f]  ;;  %712 = vst.msk [vmem:[#allocation2 + $0xb8] sm:$0xff] %vm225_vm1, %v698_v58  ;;  %v676_v4 = vadd.f32 %v7145_v1, %v8590_v55  ;;  %v670_v5 = vpop.f32.mrb[17].mxu1  ;;  %v894_v13 = vadd.f32 %v7167_v6, %v8590_v55 }
 0x10b   : > { %v1916_v56 = vld [vmem:[#allocation2 + $0x8c] ss:$2 sm:$0xff]  ;;  %v1920_v57 = vld [vmem:[#allocation2 + $0x8d] ss:$2 sm:$0xff]  ;;  %938 = vst.msk [vmem:[#allocation2 + $0x118] sm:$0xff] %vm225_vm1, %v924_v59  ;;  %711 = vst.msk [vmem:[#allocation2 + $0xb0] sm:$0xff] %vm225_vm1, %v697_v63  ;;  %v671_v11 = vadd.f32 %v8590_v55, %v670_v5  ;;  %v1914_v27 = vmax.f32 %v1908_v61, %v1912_v2 }
 0x10c   : > { %v1923_v62 = vmax.f32 %v1916_v56, %v1920_v57  ;;  %v1954_v9 = vld [vmem:[#allocation2 + $0xe0] ss:$2 sm:$0xff]  ;;  %v1958_v10 = vld [vmem:[#allocation2 + $0xe1] ss:$2 sm:$0xff]  ;;  %v888_v14 = vpop.f32.mrb[17].mxu0  ;;  %v923_v15 = vmax.f32 %v879_v3, 0.0 }
 0x10d   : > { %v2203_v7 = vld [vmem:[#allocation3 + $0x10] sm:$0xff]  ;;  %v7148_v12 = vpop.f32.mrb[18].mxu1  ;;  %v700_v16 = vmax.f32 %v676_v4, 0.0  ;;  %v889_v19 = vadd.f32 %v8590_v55, %v888_v14  ;;  %v7170_v20 = vpop.f32.mrb[18].mxu0  ;;  %v1961_v31 = vmax.f32 %v1954_v9, %v1958_v10  ;;  %v699_v32 = vmax.f32 %v671_v11, 0.0 }
 0x10e   : > { %v1925_v8 = vmax.f32 %v1913_v60, %v1923_v62  ;;  %7285 = vmatprep.mubr.msk.f32.mxu1 %vm225_vm1, %v2203_v7  ;;  %v686_v17 = vadd.f32 %v7148_v12, %v8590_v55  ;;  %v680_v18 = vpop.f32.mrb[19].mxu1  ;;  %v2205_v22 = vld [vmem:[#allocation3 + $0x20] sm:$0xff]  ;;  %v904_v26 = vadd.f32 %v7170_v20, %v8590_v55  ;;  %937 = vst.msk [vmem:[#allocation2 + $0x110] sm:$0xff] %vm225_vm1, %v923_v15  ;;  %v926_v34 = vmax.f32 %v894_v13, 0.0  ;;  %v898_v35 = vpop.f32.mrb[19].mxu0  ;;  %v2206_v37 = vld [vmem:[#allocation3 + $0x28] sm:$0xff] }
 0x10f   : > { %v2204_v21 = vld [vmem:[#allocation3 + $0x18] sm:$0xff]  ;;  %v681_v25 = vadd.f32 %v8590_v55, %v680_v18  ;;  %v8669_v29 = vld [vmem:[#allocation2 + $0xf0] ss:$2 sm:$0x3f]  ;;  %714 = vst.msk [vmem:[#allocation2 + $0xc8] sm:$0xff] %vm225_vm1, %v700_v16  ;;  %v925_v42 = vmax.f32 %v889_v19, 0.0  ;;  %v899_v43 = vadd.f32 %v8590_v55, %v898_v35 }
 0x110   : > { %v1918_v23 = vld [vmem:[#allocation2 + $0x9c] ss:$2 sm:$0x3f]  ;;  %v1922_v24 = vld [vmem:[#allocation2 + $0x9d] ss:$2 sm:$0x3f]  ;;  %7286 = vmatmul.mubr.msk.f32.gmra.mrb[50].mxu1 %vm225_vm1, %v2204_v21 }
 0x111   : > { %1927 = vst.msk [vmem:[#allocation3 + $0x31] sm:$0xff] %vm225_vm1, %v1925_v8  ;;  %v1924_v28 = vmax.f32 %v1918_v23, %v1922_v24  ;;  %v8671_v30 = vld [vmem:[#allocation2 + $0xf1] ss:$2 sm:$0x3f]  ;;  %7288 = vmatprep.mubr.msk.f32.mxu1 %vm225_vm1, %v2205_v22  ;;  %v702_v33 = vmax.f32 %v686_v17, 0.0  ;;  %v7180_v36 = vpop.f32.mrb[20].mxu1 }
 0x112   : > { %v1964_v39 = vld [vmem:[#allocation2 + $0xfc] ss:$2 sm:$0xff]  ;;  %v1968_v40 = vld [vmem:[#allocation2 + $0xfd] ss:$2 sm:$0xff]  ;;  %v701_v41 = vmax.f32 %v681_v25, 0.0  ;;  %713 = vst.msk [vmem:[#allocation2 + $0xc0] sm:$0xff] %vm225_vm1, %v699_v32  ;;  %v1082_v47 = vadd.f32 %v7180_v36, %v8590_v55  ;;  %v1962_v57 = vmax.f32 %v8669_v29, %v8671_v30 }
 0x113   : > { %v1926_v38 = vmax.f32 %v1914_v27, %v1924_v28  ;;  %v1971_v44 = vmax.f32 %v1964_v39, %v1968_v40  ;;  %716 = vst.msk [vmem:[#allocation2 + $0xd8] sm:$0xff] %vm225_vm1, %v702_v33  ;;  %940 = vst.msk [vmem:[#allocation2 + $0x128] sm:$0xff] %vm225_vm1, %v926_v34  ;;  %v928_v45 = vmax.f32 %v904_v26, 0.0  ;;  %v7173_v46 = vpop.f32.mrb[20].mxu0  ;;  %v1076_v49 = vpop.f32.mrb[21].mxu1  ;;  %v927_v50 = vmax.f32 %v899_v43, 0.0 }
 0x114   : > { %7289 = vmatmul.mubr.msk.f32.gmra.mrb[52].mxu1 %vm225_vm1, %v2206_v37  ;;  %715 = vst.msk [vmem:[#allocation2 + $0xd0] sm:$0xff] %vm225_vm1, %v701_v41  ;;  %939 = vst.msk [vmem:[#allocation2 + $0x120] sm:$0xff] %vm225_vm1, %v925_v42  ;;  %v914_v52 = vadd.f32 %v7173_v46, %v8590_v55  ;;  %v908_v53 = vpop.f32.mrb[21].mxu0  ;;  %v1077_v56 = vadd.f32 %v8590_v55, %v1076_v49  ;;  %v1146_v59 = vmax.f32 %v1082_v47, 0.0  ;;  %v1930_v10 = vld [vmem:[#allocation2 + $0xa8] ss:$2 sm:$0xff] }
 0x115   : > { %1928 = vst.msk [vmem:[#allocation3 + $0x39] sm:$0x3f] %vm1879_vm2, %v1926_v38  ;;  %v1973_v58 = vmax.f32 %v1961_v31, %v1971_v44  ;;  %v909_v60 = vadd.f32 %v8590_v55, %v908_v53  ;;  %v7183_v61 = vpop.f32.mrb[22].mxu1  ;;  %v7205_v62 = vpop.f32.mrb[22].mxu0  ;;  %v1934_v15 = vld [vmem:[#allocation2 + $0xa9] ss:$2 sm:$0xff] }
 0x116   : > { %942 = vst.msk [vmem:[#allocation2 + $0x138] sm:$0xff] %vm225_vm1, %v928_v45  ;;  %941 = vst.msk [vmem:[#allocation2 + $0x130] sm:$0xff] %vm225_vm1, %v927_v50  ;;  %v930_v63 = vmax.f32 %v914_v52, 0.0  ;;  %v1145_v0 = vmax.f32 %v1077_v56, 0.0  ;;  %v1092_v1 = vadd.f32 %v7183_v61, %v8590_v55  ;;  %v1086_v2 = vpop.f32.mrb[23].mxu1  ;;  %v1310_v4 = vadd.f32 %v7205_v62, %v8590_v55  ;;  %v1304_v5 = vpop.f32.mrb[23].mxu0 }
 0x117   : > { %v1966_v6 = vld [vmem:[#allocation2 + $0x10c] ss:$2 sm:$0x3f]  ;;  %v1970_v7 = vld [vmem:[#allocation2 + $0x10d] ss:$2 sm:$0x3f]  ;;  %v1087_v8 = vadd.f32 %v8590_v55, %v1086_v2  ;;  %v1305_v9 = vadd.f32 %v8590_v55, %v1304_v5  ;;  %v1937_v32 = vmax.f32 %v1930_v10, %v1934_v15 }
 0x118   : > { %v2207_v3 = vld [vmem:[#allocation3 + $0x30] sm:$0xff]  ;;  %1975 = vst.msk [vmem:[#allocation3 + $0x51] sm:$0xff] %vm225_vm1, %v1973_v58  ;;  %1160 = vst.msk [vmem:[#allocation2 + $0x158] sm:$0xff] %vm225_vm1, %v1146_v59  ;;  %v1972_v11 = vmax.f32 %v1966_v6, %v1970_v7  ;;  %v929_v12 = vmax.f32 %v909_v60, 0.0  ;;  %v1148_v13 = vmax.f32 %v1092_v1, 0.0  ;;  %v1374_v14 = vmax.f32 %v1310_v4, 0.0 }
 0x119   : > { %7291 = vmatprep.mubr.msk.f32.mxu1 %vm225_vm1, %v2207_v3  ;;  %944 = vst.msk [vmem:[#allocation2 + $0x148] sm:$0xff] %vm225_vm1, %v930_v63  ;;  %1159 = vst.msk [vmem:[#allocation2 + $0x150] sm:$0xff] %vm225_vm1, %v1145_v0  ;;  %v1147_v16 = vmax.f32 %v1087_v8, 0.0  ;;  %v7186_v17 = vpop.f32.mrb[24].mxu1  ;;  %v1373_v18 = vmax.f32 %v1305_v9, 0.0  ;;  %v7208_v19 = vpop.f32.mrb[24].mxu0 }
 0x11a   : > { %v1974_v20 = vmax.f32 %v1962_v57, %v1972_v11  ;;  %v1932_v21 = vld [vmem:[#allocation2 + $0xb8] ss:$2 sm:$0x3f]  ;;  %v1936_v22 = vld [vmem:[#allocation2 + $0xb9] ss:$2 sm:$0x3f]  ;;  %v1102_v23 = vadd.f32 %v7186_v17, %v8590_v55  ;;  %v1320_v31 = vadd.f32 %v7208_v19, %v8590_v55 }
 0x11b   : > { %943 = vst.msk [vmem:[#allocation2 + $0x140] sm:$0xff] %vm225_vm1, %v929_v12  ;;  %1162 = vst.msk [vmem:[#allocation2 + $0x168] sm:$0xff] %vm225_vm1, %v1148_v13  ;;  %v1940_v24 = vld [vmem:[#allocation2 + $0xc4] ss:$2 sm:$0xff]  ;;  %v1096_v26 = vpop.f32.mrb[25].mxu1  ;;  %v1938_v33 = vmax.f32 %v1932_v21, %v1936_v22  ;;  %v1314_v52 = vpop.f32.mrb[25].mxu0 }
 0x11c   : > { %1388 = vst.msk [vmem:[#allocation2 + $0x1c8] sm:$0xff] %vm225_vm1, %v1374_v14  ;;  %v1942_v25 = vld [vmem:[#allocation2 + $0xd4] ss:$2 sm:$0x3f]  ;;  %1161 = vst.msk [vmem:[#allocation2 + $0x160] sm:$0xff] %vm225_vm1, %v1147_v16  ;;  %v1150_v29 = vmax.f32 %v1102_v23, 0.0  ;;  %v1097_v30 = vadd.f32 %v8590_v55, %v1096_v26  ;;  %v1315_v59 = vadd.f32 %v8590_v55, %v1314_v52 }
 0x11d   : > { %1387 = vst.msk [vmem:[#allocation2 + $0x1c0] sm:$0xff] %vm225_vm1, %v1373_v18  ;;  %v1944_v27 = vld [vmem:[#allocation2 + $0xc5] ss:$2 sm:$0xff]  ;;  %v1946_v28 = vld [vmem:[#allocation2 + $0xd5] ss:$2 sm:$0x3f] }
 0x11e   : > { %1976 = vst.msk [vmem:[#allocation3 + $0x59] sm:$0x3f] %vm1879_vm2, %v1974_v20  ;;  %v1947_v34 = vmax.f32 %v1940_v24, %v1944_v27  ;;  %v1948_v35 = vmax.f32 %v1942_v25, %v1946_v28  ;;  %v1978_v36 = vld [vmem:[#allocation2 + $0x118] ss:$2 sm:$0xff]  ;;  %v1982_v37 = vld [vmem:[#allocation2 + $0x119] ss:$2 sm:$0xff] }
 0x11f   : > { %v8710_v38 = vld [vmem:[#allocation3 + $0x38] sm:$0xff]  ;;  %v7189_v39 = vpop.f32.mrb[26].mxu1  ;;  %1164 = vst.msk [vmem:[#allocation2 + $0x178] sm:$0xff] %vm225_vm1, %v1150_v29  ;;  %v1149_v45 = vmax.f32 %v1097_v30, 0.0  ;;  %v1376_v49 = vmax.f32 %v1320_v31, 0.0  ;;  %v1985_v53 = vmax.f32 %v1978_v36, %v1982_v37  ;;  %v7211_v60 = vpop.f32.mrb[26].mxu0 }
 0x120   : > { %v1980_v40 = vld [vmem:[#allocation2 + $0x128] ss:$2 sm:$0x3f]  ;;  %v1984_v41 = vld [vmem:[#allocation2 + $0x129] ss:$2 sm:$0x3f]  ;;  %7292 = vmatmul.mubr.msk.f32.gmra.mrb[54].mxu1 %vm225_vm1, %v8710_v38  ;;  %v1112_v42 = vadd.f32 %v7189_v39, %v8590_v55  ;;  %v1949_v43 = vmax.f32 %v1937_v32, %v1947_v34  ;;  %v1950_v44 = vmax.f32 %v1938_v33, %v1948_v35  ;;  %v1330_v0 = vadd.f32 %v7211_v60, %v8590_v55 }
 0x121   : > { %v1106_v46 = vpop.f32.mrb[27].mxu1  ;;  %v1986_v56 = vmax.f32 %v1980_v40, %v1984_v41  ;;  %1163 = vst.msk [vmem:[#allocation2 + $0x170] sm:$0xff] %vm225_vm1, %v1149_v45  ;;  %1390 = vst.msk [vmem:[#allocation2 + $0x1d8] sm:$0xff] %vm225_vm1, %v1376_v49  ;;  %v1375_v3 = vmax.f32 %v1315_v59, 0.0  ;;  %v1324_v7 = vpop.f32.mrb[27].mxu0  ;;  %v8745_v41 = vld [vmem:[#allocation3 + $0x50] sm:$0xff] }
 0x122   : > { %v1152_v47 = vmax.f32 %v1112_v42, 0.0  ;;  %v1107_v50 = vadd.f32 %v8590_v55, %v1106_v46  ;;  %1951 = vst.msk [vmem:[#allocation3 + $0x41] sm:$0xff] %vm225_vm1, %v1949_v43  ;;  %v1988_v57 = vld [vmem:[#allocation2 + $0x134] ss:$2 sm:$0xff]  ;;  %v1992_v61 = vld [vmem:[#allocation2 + $0x135] ss:$2 sm:$0xff]  ;;  %v1325_v11 = vadd.f32 %v8590_v55, %v1324_v7 }
 0x123   : > { %1952 = vst.msk [vmem:[#allocation3 + $0x49] sm:$0x3f] %vm1879_vm2, %v1950_v44  ;;  %v1990_v58 = vld [vmem:[#allocation2 + $0x144] ss:$2 sm:$0x3f]  ;;  %v1995_v1 = vmax.f32 %v1988_v57, %v1992_v61  ;;  %v1378_v4 = vmax.f32 %v1330_v0, 0.0 }
 0x124   : > { %v1994_v62 = vld [vmem:[#allocation2 + $0x145] ss:$2 sm:$0x3f]  ;;  %1166 = vst.msk [vmem:[#allocation2 + $0x188] sm:$0xff] %vm225_vm1, %v1152_v47  ;;  %v1151_v63 = vmax.f32 %v1107_v50, 0.0  ;;  %v7192_v8 = vpop.f32.mrb[28].mxu1 }
 0x125   : > { %v1996_v2 = vmax.f32 %v1990_v58, %v1994_v62  ;;  %v1997_v5 = vmax.f32 %v1985_v53, %v1995_v1  ;;  %v2002_v9 = vld [vmem:[#allocation2 + $0x150] ss:$2 sm:$0xff]  ;;  %v2006_v10 = vld [vmem:[#allocation2 + $0x151] ss:$2 sm:$0xff]  ;;  %1389 = vst.msk [vmem:[#allocation2 + $0x1d0] sm:$0xff] %vm225_vm1, %v1375_v3  ;;  %1392 = vst.msk [vmem:[#allocation2 + $0x1e8] sm:$0xff] %vm225_vm1, %v1378_v4  ;;  %v1122_v12 = vadd.f32 %v7192_v8, %v8590_v55 }
 0x126   : > { %1165 = vst.msk [vmem:[#allocation2 + $0x180] sm:$0xff] %vm225_vm1, %v1151_v63  ;;  %v7214_v13 = vpop.f32.mrb[28].mxu0  ;;  %v1116_v14 = vpop.f32.mrb[29].mxu1  ;;  %v2004_v15 = vld [vmem:[#allocation2 + $0x160] ss:$2 sm:$0x3f]  ;;  %v2009_v27 = vmax.f32 %v2002_v9, %v2006_v10 }
 0x127   : > { %v1998_v6 = vmax.f32 %v1986_v56, %v1996_v2  ;;  %1999 = vst.msk [vmem:[#allocation3 + $0x61] sm:$0xff] %vm225_vm1, %v1997_v5  ;;  %v2008_v16 = vld [vmem:[#allocation2 + $0x161] ss:$2 sm:$0x3f]  ;;  %v1340_v17 = vadd.f32 %v7214_v13, %v8590_v55  ;;  %v1117_v18 = vadd.f32 %v8590_v55, %v1116_v14  ;;  %v1334_v19 = vpop.f32.mrb[29].mxu0  ;;  %v7195_v20 = vpop.f32.mrb[30].mxu1 }
 0x128   : > { %v2012_v21 = vld [vmem:[#allocation2 + $0x16c] ss:$2 sm:$0xff]  ;;  %v2016_v22 = vld [vmem:[#allocation2 + $0x16d] ss:$2 sm:$0xff]  ;;  %v1377_v23 = vmax.f32 %v1325_v11, 0.0  ;;  %v1154_v24 = vmax.f32 %v1122_v12, 0.0  ;;  %v1335_v25 = vadd.f32 %v8590_v55, %v1334_v19  ;;  %v1132_v26 = vadd.f32 %v7195_v20, %v8590_v55 }
 0x129   : > { %2000 = vst.msk [vmem:[#allocation3 + $0x69] sm:$0x3f] %vm1879_vm2, %v1998_v6  ;;  %v2019_v28 = vmax.f32 %v2012_v21, %v2016_v22  ;;  %v1380_v29 = vmax.f32 %v1340_v17, 0.0  ;;  %v1153_v30 = vmax.f32 %v1117_v18, 0.0  ;;  %v1126_v31 = vpop.f32.mrb[31].mxu1  ;;  %v8735_v32 = vld [vmem:[#allocation3 + $0x40] sm:$0xff]  ;;  %v2010_v50 = vmax.f32 %v2004_v15, %v2008_v16 }
 0x12a   : > { %v8737_v33 = vld [vmem:[#allocation3 + $0x48] sm:$0xff]  ;;  %v7217_v34 = vpop.f32.mrb[30].mxu0  ;;  %1391 = vst.msk [vmem:[#allocation2 + $0x1e0] sm:$0xff] %vm225_vm1, %v1377_v23  ;;  %1168 = vst.msk [vmem:[#allocation2 + $0x198] sm:$0xff] %vm225_vm1, %v1154_v24  ;;  %v1379_v35 = vmax.f32 %v1335_v25, 0.0  ;;  %v1156_v36 = vmax.f32 %v1132_v26, 0.0  ;;  %v1127_v37 = vadd.f32 %v8590_v55, %v1126_v31  ;;  %7294 = vmatprep.mubr.msk.f32.mxu1 %vm225_vm1, %v8735_v32 }
 0x12b   : > { %v7198_v39 = vpop.f32.mrb[32].mxu1  ;;  %v1350_v40 = vadd.f32 %v7217_v34, %v8590_v55  ;;  %v1344_v42 = vpop.f32.mrb[31].mxu0  ;;  %v2021_v43 = vmax.f32 %v2009_v27, %v2019_v28  ;;  %v8747_v44 = vld [vmem:[#allocation2 + $0x1c0] ss:$2 sm:$0xff]  ;;  %1394 = vst.msk [vmem:[#allocation2 + $0x1f8] sm:$0xff] %vm225_vm1, %v1380_v29  ;;  %1167 = vst.msk [vmem:[#allocation2 + $0x190] sm:$0xff] %vm225_vm1, %v1153_v30  ;;  %7295 = vmatmul.mubr.msk.f32.gmra.mrb[56].mxu1 %vm225_vm1, %v8737_v33 }
 0x12c   : > { %v1142_v47 = vadd.f32 %v7198_v39, %v8590_v55  ;;  %v1345_v49 = vadd.f32 %v8590_v55, %v1344_v42  ;;  %v2054_v52 = vld [vmem:[#allocation2 + $0x1c1] ss:$2 sm:$0xff]  ;;  %1393 = vst.msk [vmem:[#allocation2 + $0x1f0] sm:$0xff] %vm225_vm1, %v1379_v35  ;;  %1170 = vst.msk [vmem:[#allocation2 + $0x1a8] sm:$0xff] %vm225_vm1, %v1156_v36  ;;  %v1155_v56 = vmax.f32 %v1127_v37, 0.0  ;;  %7297 = vmatprep.mubr.msk.f32.mxu1 %vm225_vm1, %v8745_v41  ;;  %v1136_v58 = vpop.f32.mrb[33].mxu1 }
 0x12d   : > { %v2014_v45 = vld [vmem:[#allocation2 + $0x17c] ss:$2 sm:$0x3f]  ;;  %v2018_v46 = vld [vmem:[#allocation2 + $0x17d] ss:$2 sm:$0x3f]  ;;  %v1137_v62 = vadd.f32 %v8590_v55, %v1136_v58  ;;  %v2057_v13 = vmax.f32 %v8747_v44, %v2054_v52 }
 0x12e   : > { %v2020_v53 = vmax.f32 %v2014_v45, %v2018_v46  ;;  %v1382_v57 = vmax.f32 %v1350_v40, 0.0  ;;  %v7220_v59 = vpop.f32.mrb[32].mxu0  ;;  %2023 = vst.msk [vmem:[#allocation3 + $0x71] sm:$0xff] %vm225_vm1, %v2021_v43  ;;  %v8760_v60 = vld [vmem:[#allocation2 + $0x1d0] ss:$2 sm:$0x3f] }
 0x12f   : > { %v8762_v61 = vld [vmem:[#allocation2 + $0x1d1] ss:$2 sm:$0x3f]  ;;  %v1360_v63 = vadd.f32 %v7220_v59, %v8590_v55  ;;  %1169 = vst.msk [vmem:[#allocation2 + $0x1a0] sm:$0xff] %vm225_vm1, %v1155_v56  ;;  %v1158_v1 = vmax.f32 %v1142_v47, 0.0  ;;  %v1381_v2 = vmax.f32 %v1345_v49, 0.0 }
 0x130   : > { %v2022_v0 = vmax.f32 %v2010_v50, %v2020_v53  ;;  %1396 = vst.msk [vmem:[#allocation2 + $0x208] sm:$0xff] %vm225_vm1, %v1382_v57  ;;  %v1354_v3 = vpop.f32.mrb[33].mxu0  ;;  %v8768_v4 = vld [vmem:[#allocation3 + $0x58] sm:$0xff]  ;;  %v7230_v5 = vpop.f32.mrb[34].mxu1  ;;  %v1157_v6 = vmax.f32 %v1137_v62, 0.0  ;;  %v8774_v11 = vld [vmem:[#allocation3 + $0x60] sm:$0xff]  ;;  %v2058_v23 = vmax.f32 %v8760_v60, %v8762_v61 }
 0x131   : > { %v1384_v7 = vmax.f32 %v1360_v63, 0.0  ;;  %v1355_v8 = vadd.f32 %v8590_v55, %v1354_v3  ;;  %7298 = vmatmul.mubr.msk.f32.gmra.mrb[58].mxu1 %vm225_vm1, %v8768_v4  ;;  %v7223_v9 = vpop.f32.mrb[34].mxu0  ;;  %v1538_v10 = vadd.f32 %v7230_v5, %v8590_v55  ;;  %v1532_v12 = vpop.f32.mrb[35].mxu1  ;;  %1172 = vst.msk [vmem:[#allocation2 + $0x1b8] sm:$0xff] %vm225_vm1, %v1158_v1  ;;  %1395 = vst.msk [vmem:[#allocation2 + $0x200] sm:$0xff] %vm225_vm1, %v1381_v2  ;;  %v2410_v17 = vld [vmem:[#allocation3 + $0x1] sm:$0xff] }
 0x132   : > { %2024 = vst.msk [vmem:[#allocation3 + $0x79] sm:$0x3f] %vm1879_vm2, %v2022_v0  ;;  %v1370_v14 = vadd.f32 %v7223_v9, %v8590_v55  ;;  %7300 = vmatprep.mubr.msk.f32.mxu1 %vm225_vm1, %v8774_v11  ;;  %v1364_v15 = vpop.f32.mrb[35].mxu0  ;;  %v1533_v16 = vadd.f32 %v8590_v55, %v1532_v12  ;;  %v2060_v18 = vld [vmem:[#allocation2 + $0x1dc] ss:$2 sm:$0xff]  ;;  %v2635_v28 = vld [vmem:[%s9751_s3 + $0x50] sm:$0xff] }
 0x133   : > { %v2064_v19 = vld [vmem:[#allocation2 + $0x1dd] ss:$2 sm:$0xff]  ;;  %1171 = vst.msk [vmem:[#allocation2 + $0x1b0] sm:$0xff] %vm225_vm1, %v1157_v6  ;;  %1398 = vst.msk [vmem:[#allocation2 + $0x218] sm:$0xff] %vm225_vm1, %v1384_v7  ;;  %v1383_v20 = vmax.f32 %v1355_v8, 0.0  ;;  %v1602_v21 = vmax.f32 %v1538_v10, 0.0  ;;  %v1365_v22 = vadd.f32 %v8590_v55, %v1364_v15 }
 0x134   : > { %v2067_v24 = vmax.f32 %v2060_v18, %v2064_v19  ;;  %v1386_v25 = vmax.f32 %v1370_v14, 0.0  ;;  %v1601_v26 = vmax.f32 %v1533_v16, 0.0  ;;  %v8789_v27 = vld [vmem:[#allocation3 + $0x68] sm:$0xff]  ;;  %v2062_v30 = vld [vmem:[#allocation2 + $0x1ec] ss:$2 sm:$0x3f] }
 0x135   : > { %v2636_v29 = vld [vmem:[%s9751_s3 + $0x58] sm:$0xff]  ;;  %v2066_v31 = vld [vmem:[#allocation2 + $0x1ed] ss:$2 sm:$0x3f]  ;;  %1397 = vst.msk [vmem:[#allocation2 + $0x210] sm:$0xff] %vm225_vm1, %v1383_v20  ;;  %1616 = vst.msk [vmem:[#allocation2 + $0x238] sm:$0xff] %vm225_vm1, %v1602_v21  ;;  %7301 = vmatmul.mubr.msk.f32.gmra.mrb[60].mxu1 %vm225_vm1, %v8789_v27 }
 0x136   : > { %v8804_v34 = vld [vmem:[%s9750_s2] ss:$0 sm:$0xff]  ;;  %v2069_v35 = vmax.f32 %v2057_v13, %v2067_v24  ;;  %v2068_v36 = vmax.f32 %v2062_v30, %v2066_v31  ;;  %1400 = vst.msk [vmem:[#allocation2 + $0x228] sm:$0xff] %vm225_vm1, %v1386_v25  ;;  %v1385_v37 = vmax.f32 %v1365_v22, 0.0  ;;  %1615 = vst.msk [vmem:[#allocation2 + $0x230] sm:$0xff] %vm225_vm1, %v1601_v26  ;;  %v7233_v39 = vpop.f32.mrb[36].mxu1  ;;  %7311 = vmatprep.mubr.msk.f32.mxu1 %vm225_vm1, %v2410_v17 }
 0x137   : > { %v8809_v40 = vld [vmem:[#allocation3 + $0x70] sm:$0xff]  ;;  %v7255_v43 = vpop.f32.mrb[36].mxu0  ;;  %v2026_v45 = vld [vmem:[#allocation2 + $0x188] ss:$2 sm:$0xff]  ;;  %v2030_v46 = vld [vmem:[#allocation2 + $0x189] ss:$2 sm:$0xff]  ;;  %v1548_v49 = vadd.f32 %v7233_v39, %v8590_v55  ;;  %v8817_v50 = vpack.c.bf16 %v2636_v29, %v2635_v28 }
 0x138   : > { %v2411_v42 = vld [vmem:[#allocation3 + $0x9] sm:$0xff]  ;;  %7543 = vmatprep.mubr.msk.f32.mxu0 %vm225_vm1, %v8809_v40  ;;  %v2843_v52 = vld [vmem:[%s9751_s3 + $0x68] sm:$0xff]  ;;  %2071 = vst.msk [vmem:[#allocation3 + $0x91] sm:$0xff] %vm225_vm1, %v2069_v35  ;;  %v2070_v53 = vmax.f32 %v2058_v23, %v2068_v36  ;;  %1399 = vst.msk [vmem:[#allocation2 + $0x220] sm:$0xff] %vm225_vm1, %v1385_v37  ;;  %v1542_v57 = vpop.f32.mrb[37].mxu1  ;;  %v1760_v59 = vpop.f32.mrb[37].mxu0  ;;  %v1766_v6 = vadd.f32 %v7255_v43, %v8804_v34  ;;  %v2033_v15 = vmax.f32 %v2026_v45, %v2030_v46 }
 0x139   : > { %v2842_v44 = vld [vmem:[%s9751_s3 + $0x60] sm:$0xff]  ;;  %v1604_v62 = vmax.f32 %v1548_v49, 0.0  ;;  %v1543_v63 = vadd.f32 %v8590_v55, %v1542_v57  ;;  %7312 = vmatmul.mubr.msk.f32.vlgmr.msra.gmra.mrb[48].mxu1 %vm225_vm1, %v2411_v42  ;;  %v7236_v0 = vpop.f32.mrb[38].mxu1  ;;  %v8837_v7 = vld [vmem:[#allocation3 + $0x19] sm:$0xff]  ;;  %v1761_v13 = vadd.f32 %v8804_v34, %v1760_v59  ;;  %v7258_v30 = vpop.f32.mrb[38].mxu0 }
 0x13a   : > { %v2028_v47 = vld [vmem:[#allocation2 + $0x198] ss:$2 sm:$0x3f]  ;;  %v2032_v56 = vld [vmem:[#allocation2 + $0x199] ss:$2 sm:$0x3f]  ;;  %v1558_v3 = vadd.f32 %v7236_v0, %v8590_v55  ;;  %7843 = vmatpush3.bf16.msra.mxu1 %v8584_v54  ;;  %v8844_v14 = vpack.c.bf16 %v2843_v52, %v2842_v44  ;;  %v1776_v44 = vadd.f32 %v7258_v30, %v8804_v34 }
 0x13b   : > { %v8824_v58 = vld [vmem:[#allocation3 + $0x11] sm:$0xff]  ;;  %2072 = vst.msk [vmem:[#allocation3 + $0x99] sm:$0x3f] %vm1879_vm2, %v2070_v53  ;;  %v2038_v2 = vld [vmem:[#allocation2 + $0x1b4] ss:$2 sm:$0x3f]  ;;  %7845 = vmatprep.subr.bf16.mxu1 %v8817_v50  ;;  %v2034_v16 = vmax.f32 %v2028_v47, %v2032_v56 }
 0x13c   : > { %v8826_v60 = vld [vmem:[#allocation2 + $0x1f8] ss:$2 sm:$0xff]  ;;  %v8828_v61 = vld [vmem:[#allocation2 + $0x1f9] ss:$2 sm:$0xff]  ;;  %7314 = vmatprep.mubr.msk.f32.mxu1 %vm225_vm1, %v8824_v58  ;;  %v1552_v5 = vpop.f32.mrb[39].mxu1  ;;  %1618 = vst.msk [vmem:[#allocation2 + $0x248] sm:$0xff] %vm225_vm1, %v1604_v62 }
 0x13d   : > { %v2036_v1 = vld [vmem:[#allocation2 + $0x1a4] ss:$2 sm:$0xff]  ;;  %v2040_v8 = vld [vmem:[#allocation2 + $0x1a5] ss:$2 sm:$0xff]  ;;  %v1603_v10 = vmax.f32 %v1543_v63, 0.0  ;;  %v1553_v12 = vadd.f32 %v8590_v55, %v1552_v5  ;;  %v1606_v21 = vmax.f32 %v1558_v3, 0.0  ;;  %7315 = vmatmul.mubr.msk.f32.gmra.mrb[50].mxu1 %vm225_vm1, %v8837_v7  ;;  %v2081_v25 = vmax.f32 %v8826_v60, %v8828_v61 }
 0x13e   : > { %v2042_v9 = vld [vmem:[#allocation2 + $0x1b5] ss:$2 sm:$0x3f]  ;;  %v2043_v17 = vmax.f32 %v2036_v1, %v2040_v8  ;;  %v2076_v19 = vld [vmem:[#allocation2 + $0x208] ss:$2 sm:$0x3f]  ;;  %7847 = vmatpush3.bf16.msra.mxu1 %v8817_v50 }
 0x13f   : > { %v2044_v18 = vmax.f32 %v2038_v2, %v2042_v9  ;;  %v2080_v20 = vld [vmem:[#allocation2 + $0x209] ss:$2 sm:$0x3f]  ;;  %1617 = vst.msk [vmem:[#allocation2 + $0x240] sm:$0xff] %vm225_vm1, %v1603_v10  ;;  %v1605_v22 = vmax.f32 %v1553_v12, 0.0  ;;  %v1830_v26 = vmax.f32 %v1766_v6, 0.0  ;;  %7849 = vmatprep.subr.bf16.mxu1 %v8844_v14 }
 0x140   : > { %v8849_v55 = vld [vmem:[#allocation3 + $0x21] sm:$0xff]  ;;  %v2045_v23 = vmax.f32 %v2033_v15, %v2043_v17  ;;  %v8853_v28 = vld [vmem:[#allocation3 + $0x78] sm:$0xff]  ;;  %v7239_v29 = vpop.f32.mrb[40].mxu1  ;;  %v8857_v31 = vld [vmem:[#allocation3 + $0x29] sm:$0xff]  ;;  %v2082_v35 = vmax.f32 %v2076_v19, %v2080_v20  ;;  %1620 = vst.msk [vmem:[#allocation2 + $0x258] sm:$0xff] %vm225_vm1, %v1606_v21  ;;  %v1829_v39 = vmax.f32 %v1761_v13, 0.0 }
 0x141   : > { %v2046_v24 = vmax.f32 %v2034_v16, %v2044_v18  ;;  %7317 = vmatprep.mubr.msk.f32.mxu1 %vm225_vm1, %v8849_v55  ;;  %v2084_v36 = vld [vmem:[#allocation2 + $0x214] ss:$2 sm:$0xff]  ;;  %v2086_v37 = vld [vmem:[#allocation2 + $0x224] ss:$2 sm:$0x3f]  ;;  %1619 = vst.msk [vmem:[#allocation2 + $0x250] sm:$0xff] %vm225_vm1, %v1605_v22  ;;  %7544 = vmatmul.mubr.msk.f32.vlgmr.msra.gmra.mrb[50].mxu0 %vm225_vm1, %v8853_v28 }
 0x142   : > { %v8867_v42 = vld [vmem:[%s9750_s2] ss:$0 sm:$0xff]  ;;  %2047 = vst.msk [vmem:[#allocation3 + $0x81] sm:$0xff] %vm225_vm1, %v2045_v23  ;;  %v2088_v45 = vld [vmem:[#allocation2 + $0x215] ss:$2 sm:$0xff]  ;;  %1844 = vst.msk [vmem:[#allocation2 + $0x2a8] sm:$0xff] %vm225_vm1, %v1830_v26  ;;  %7907 = vmatpush3.bf16.msra.mxu0 %v8563_v48  ;;  %7318 = vmatmul.mubr.msk.f32.gmra.mrb[52].mxu1 %vm225_vm1, %v8857_v31 }
 0x143   : > { %v1568_v43 = vadd.f32 %v8867_v42, %v7239_v29  ;;  %2048 = vst.msk [vmem:[#allocation3 + $0x89] sm:$0x3f] %vm1879_vm2, %v2046_v24  ;;  %v2090_v46 = vld [vmem:[#allocation2 + $0x225] ss:$2 sm:$0x3f]  ;;  %v1562_v47 = vpop.f32.mrb[41].mxu1  ;;  %v2091_v49 = vmax.f32 %v2084_v36, %v2088_v45  ;;  %7909 = vmatprep.subr.bf16.mxu0 %v8574_v51 }
 0x144   : > { %v2092_v52 = vmax.f32 %v2086_v37, %v2090_v46  ;;  %1843 = vst.msk [vmem:[#allocation2 + $0x2a0] sm:$0xff] %vm225_vm1, %v1829_v39  ;;  %v1832_v56 = vmax.f32 %v1776_v44, 0.0  ;;  %v1770_v57 = vpop.f32.mrb[39].mxu0  ;;  %v7242_v59 = vpop.f32.mrb[42].mxu1  ;;  %v8879_v60 = vld [vmem:[#allocation3 + $0x31] sm:$0xff]  ;;  %v1563_v61 = vadd.f32 %v8867_v42, %v1562_v47  ;;  %v8892_v13 = vld [vmem:[#allocation3 + $0x39] sm:$0xff] }
 0x145   : > { %v1608_v53 = vmax.f32 %v1568_v43, 0.0  ;;  %v1771_v62 = vadd.f32 %v8804_v34, %v1770_v57  ;;  %v7261_v48 = vpop.f32.mrb[40].mxu0  ;;  %v1578_v63 = vadd.f32 %v8867_v42, %v7242_v59  ;;  %7320 = vmatprep.mubr.msk.f32.mxu1 %vm225_vm1, %v8879_v60  ;;  %v1572_v0 = vpop.f32.mrb[43].mxu1  ;;  %v2093_v1 = vmax.f32 %v2081_v25, %v2091_v49  ;;  %v2098_v9 = vld [vmem:[#allocation2 + $0x230] ss:$2 sm:$0xff]  ;;  %v8928_v57 = vld [vmem:[#allocation3 + $0x51] sm:$0xff] }
 0x146   : > { %v2094_v2 = vmax.f32 %v2082_v35, %v2092_v52  ;;  %1846 = vst.msk [vmem:[#allocation2 + $0x2b8] sm:$0xff] %vm225_vm1, %v1832_v56  ;;  %v1786_v3 = vadd.f32 %v7261_v48, %v8804_v34  ;;  %v1780_v5 = vpop.f32.mrb[41].mxu0  ;;  %v1573_v6 = vadd.f32 %v8867_v42, %v1572_v0  ;;  %v7245_v8 = vpop.f32.mrb[44].mxu1  ;;  %v2102_v10 = vld [vmem:[#allocation2 + $0x231] ss:$2 sm:$0xff]  ;;  %7911 = vmatpush3.bf16.msra.mxu0 %v8574_v51  ;;  %v1607_v16 = vmax.f32 %v1563_v61, 0.0 }
 0x147   : > { %1622 = vst.msk [vmem:[#allocation2 + $0x268] sm:$0xff] %vm225_vm1, %v1608_v53  ;;  %v1781_v12 = vadd.f32 %v8804_v34, %v1780_v5  ;;  %v1588_v15 = vadd.f32 %v8867_v42, %v7245_v8  ;;  %2095 = vst.msk [vmem:[#allocation3 + $0xa1] sm:$0xff] %vm225_vm1, %v2093_v1  ;;  %v1831_v17 = vmax.f32 %v1771_v62, 0.0  ;;  %v7264_v19 = vpop.f32.mrb[42].mxu0  ;;  %7321 = vmatmul.mubr.msk.f32.gmra.mrb[54].mxu1 %vm225_vm1, %v8892_v13  ;;  %v8900_v20 = vld [vmem:[#allocation3 + $0x41] sm:$0xff]  ;;  %v1582_v21 = vpop.f32.mrb[45].mxu1  ;;  %7913 = vmatprep.subr.bf16.mxu0 %v8584_v54 }
 0x148   : > { %2096 = vst.msk [vmem:[#allocation3 + $0xa9] sm:$0x3f] %vm1879_vm2, %v2094_v2  ;;  %v1834_v18 = vmax.f32 %v1786_v3, 0.0  ;;  %9766 = vst [vmem:[#allocation5_spill] sm:$0xff] %v8900_v20  ;;  %v2108_v22 = vld [vmem:[#allocation2 + $0x24c] ss:$2 sm:$0xff]  ;;  %v1796_v25 = vadd.f32 %v7264_v19, %v8804_v34  ;;  %7323 = vmatprep.mubr.msk.f32.mxu1 %vm225_vm1, %v8900_v20  ;;  %v1583_v26 = vadd.f32 %v8867_v42, %v1582_v21 }
 0x149   : > { %v2112_v23 = vld [vmem:[#allocation2 + $0x24d] ss:$2 sm:$0xff]  ;;  %v1833_v24 = vmax.f32 %v1781_v12, 0.0  ;;  %v1610_v51 = vmax.f32 %v1578_v63, 0.0  ;;  %v2105_v29 = vmax.f32 %v2098_v9, %v2102_v10  ;;  %1621 = vst.msk [vmem:[#allocation2 + $0x260] sm:$0xff] %vm225_vm1, %v1607_v16  ;;  %1845 = vst.msk [vmem:[#allocation2 + $0x2b0] sm:$0xff] %vm225_vm1, %v1831_v17 }
 0x14a   : > { %v2115_v30 = vmax.f32 %v2108_v22, %v2112_v23  ;;  %1848 = vst.msk [vmem:[#allocation2 + $0x2c8] sm:$0xff] %vm225_vm1, %v1834_v18  ;;  %v1609_v35 = vmax.f32 %v1573_v6, 0.0  ;;  %v1790_v36 = vpop.f32.mrb[43].mxu0  ;;  %v1612_v37 = vmax.f32 %v1588_v15, 0.0  ;;  %v8910_v39 = vld [vmem:[#allocation3 + $0x80] sm:$0xff]  ;;  %v8912_v43 = vld [vmem:[#allocation3 + $0x88] sm:$0xff] }
 0x14b   : > { %v7248_v44 = vpop.f32.mrb[46].mxu1  ;;  %1847 = vst.msk [vmem:[#allocation2 + $0x2c0] sm:$0xff] %vm225_vm1, %v1833_v24  ;;  %1624 = vst.msk [vmem:[#allocation2 + $0x278] sm:$0xff] %vm225_vm1, %v1610_v51  ;;  %v1836_v45 = vmax.f32 %v1796_v25, 0.0  ;;  %v1791_v46 = vadd.f32 %v8804_v34, %v1790_v36  ;;  %v1611_v47 = vmax.f32 %v1583_v26, 0.0  ;;  %7546 = vmatprep.mubr.msk.f32.mxu0 %vm225_vm1, %v8910_v39  ;;  %v8919_v49 = vld [vmem:[#allocation3 + $0x49] sm:$0xff] }
 0x14c   : > { %v1598_v52 = vadd.f32 %v8867_v42, %v7248_v44  ;;  %v2117_v53 = vmax.f32 %v2105_v29, %v2115_v30  ;;  %1623 = vst.msk [vmem:[#allocation2 + $0x270] sm:$0xff] %vm225_vm1, %v1609_v35  ;;  %1626 = vst.msk [vmem:[#allocation2 + $0x288] sm:$0xff] %vm225_vm1, %v1612_v37  ;;  %7324 = vmatmul.mubr.msk.f32.gmra.mrb[56].mxu1 %vm225_vm1, %v8919_v49  ;;  %7547 = vmatmul.mubr.msk.f32.gmra.mrb[52].mxu0 %vm225_vm1, %v8912_v43  ;;  %v7267_v56 = vpop.f32.mrb[44].mxu0  ;;  %v8930_v59 = vld [vmem:[#allocation3 + $0x90] sm:$0xff]  ;;  %v1592_v61 = vpop.f32.mrb[47].mxu1  ;;  %v8940_v3 = vld [vmem:[#allocation3 + $0x59] sm:$0xff] }
 0x14d   : > { %9767 = vst [vmem:[#allocation6_spill] sm:$0xff] %v8930_v59  ;;  %v2100_v62 = vld [vmem:[#allocation2 + $0x240] ss:$2 sm:$0x3f]  ;;  %1850 = vst.msk [vmem:[#allocation2 + $0x2d8] sm:$0xff] %vm225_vm1, %v1836_v45  ;;  %v1835_v48 = vmax.f32 %v1791_v46, 0.0  ;;  %v1806_v0 = vadd.f32 %v7267_v56, %v8804_v34  ;;  %7326 = vmatprep.mubr.msk.f32.mxu1 %vm225_vm1, %v8928_v57  ;;  %7549 = vmatprep.mubr.msk.f32.mxu0 %vm225_vm1, %v8930_v59  ;;  %v1593_v1 = vadd.f32 %v8867_v42, %v1592_v61 }
 0x14e   : > { %1625 = vst.msk [vmem:[#allocation2 + $0x280] sm:$0xff] %vm225_vm1, %v1611_v47  ;;  %v1614_v63 = vmax.f32 %v1598_v52, 0.0  ;;  %v1800_v2 = vpop.f32.mrb[45].mxu0  ;;  %v2104_v5 = vld [vmem:[#allocation2 + $0x241] ss:$2 sm:$0x3f] }
 0x14f   : > { %2119 = vst.msk [vmem:[#allocation3 + $0xb1] sm:$0xff] %vm225_vm1, %v2117_v53  ;;  %v2146_v6 = vld [vmem:[#allocation2 + $0x2a0] ss:$2 sm:$0xff]  ;;  %v1801_v8 = vadd.f32 %v8804_v34, %v1800_v2  ;;  %v7270_v9 = vpop.f32.mrb[46].mxu0  ;;  %v2150_v10 = vld [vmem:[#allocation2 + $0x2a1] ss:$2 sm:$0xff]  ;;  %v2106_v36 = vmax.f32 %v2100_v62, %v2104_v5 }
 0x150   : > { %1849 = vst.msk [vmem:[#allocation2 + $0x2d0] sm:$0xff] %vm225_vm1, %v1835_v48  ;;  %1628 = vst.msk [vmem:[#allocation2 + $0x298] sm:$0xff] %vm225_vm1, %v1614_v63  ;;  %v1838_v12 = vmax.f32 %v1806_v0, 0.0  ;;  %v1613_v15 = vmax.f32 %v1593_v1, 0.0  ;;  %v1810_v16 = vpop.f32.mrb[47].mxu0  ;;  %v8946_v17 = vld [vmem:[#allocation3 + $0x98] sm:$0xff]  ;;  %v1816_v18 = vadd.f32 %v7270_v9, %v8804_v34  ;;  %7327 = vmatmul.mubr.msk.f32.gmra.mrb[58].mxu1 %vm225_vm1, %v8940_v3  ;;  %v2153_v37 = vmax.f32 %v2146_v6, %v2150_v10 }
 0x151   : > { %v1837_v42 = vmax.f32 %v1801_v8, 0.0  ;;  %7550 = vmatmul.mubr.msk.f32.gmra.mrb[54].mxu0 %vm225_vm1, %v8946_v17  ;;  %v7273_v19 = vpop.f32.mrb[48].mxu0  ;;  %v8953_v21 = vld [vmem:[#allocation3 + $0x61] sm:$0xff]  ;;  %v2110_v24 = vld [vmem:[#allocation2 + $0x25c] ss:$2 sm:$0x3f]  ;;  %v1811_v25 = vadd.f32 %v8804_v34, %v1810_v16 }
 0x152   : > { %v8955_v22 = vld [vmem:[#allocation3 + $0xa0] sm:$0xff]  ;;  %v2114_v51 = vld [vmem:[#allocation2 + $0x25d] ss:$2 sm:$0x3f]  ;;  %1852 = vst.msk [vmem:[#allocation2 + $0x2e8] sm:$0xff] %vm225_vm1, %v1838_v12  ;;  %1627 = vst.msk [vmem:[#allocation2 + $0x290] sm:$0xff] %vm225_vm1, %v1613_v15  ;;  %v1826_v26 = vadd.f32 %v7273_v19, %v8804_v34  ;;  %7329 = vmatprep.mubr.msk.f32.mxu1 %vm225_vm1, %v8953_v21 }
 0x153   : > { %v2619_v23 = vld [vmem:[#allocation3 + $0x2] sm:$0xff]  ;;  %7552 = vmatprep.mubr.msk.f32.mxu0 %vm225_vm1, %v8955_v22  ;;  %v2116_v44 = vmax.f32 %v2110_v24, %v2114_v51  ;;  %1851 = vst.msk [vmem:[#allocation2 + $0x2e0] sm:$0xff] %vm225_vm1, %v1837_v42  ;;  %v2156_v47 = vld [vmem:[#allocation2 + $0x2bc] ss:$2 sm:$0xff]  ;;  %v2160_v52 = vld [vmem:[#allocation2 + $0x2bd] ss:$2 sm:$0xff] }
 0x154   : > { %v8965_v29 = vld [vmem:[#allocation3 + $0x69] sm:$0xff]  ;;  %v2844_v30 = vld [vmem:[%s9751_s3 + $0x70] sm:$0xff]  ;;  %v2163_v61 = vmax.f32 %v2156_v47, %v2160_v52  ;;  %v1840_v48 = vmax.f32 %v1816_v18, 0.0  ;;  %v3052_v63 = vld [vmem:[%s9751_s3 + $0x88] sm:$0xff]  ;;  %v1839_v5 = vmax.f32 %v1811_v25, 0.0  ;;  %v1842_v6 = vmax.f32 %v1826_v26, 0.0 }
 0x155   : > { %9768 = vst [vmem:[#allocation7_spill] sm:$0xff] %v8965_v29  ;;  %v2845_v35 = vld [vmem:[%s9751_s3 + $0x78] sm:$0xff]  ;;  %v2118_v56 = vmax.f32 %v2106_v36, %v2116_v44  ;;  %7330 = vmatmul.mubr.msk.f32.gmra.mrb[60].mxu1 %vm225_vm1, %v8965_v29  ;;  %v3051_v62 = vld [vmem:[%s9751_s3 + $0x80] sm:$0xff]  ;;  %v2122_v1 = vld [vmem:[#allocation2 + $0x268] ss:$2 sm:$0xff]  ;;  %v1820_v8 = vpop.f32.mrb[49].mxu0 }
 0x156   : > { %v2148_v45 = vld [vmem:[#allocation2 + $0x2b0] ss:$2 sm:$0x3f]  ;;  %v2152_v46 = vld [vmem:[#allocation2 + $0x2b1] ss:$2 sm:$0x3f]  ;;  %7340 = vmatprep.mubr.msk.f32.mxu1 %vm225_vm1, %v2619_v23  ;;  %v2165_v10 = vmax.f32 %v2153_v37, %v2163_v61  ;;  %v1821_v16 = vadd.f32 %v8804_v34, %v1820_v8  ;;  %v8992_v18 = vpack.c.bf16 %v2845_v35, %v2844_v30  ;;  %v9005_v37 = vpack.c.bf16 %v3052_v63, %v3051_v62 }
 0x157   : > { %v8974_v53 = vld [vmem:[#allocation3 + $0xa8] sm:$0xff]  ;;  %v2154_v0 = vmax.f32 %v2148_v45, %v2152_v46  ;;  %2120 = vst.msk [vmem:[#allocation3 + $0xb9] sm:$0x3f] %vm1879_vm2, %v2118_v56  ;;  %v2158_v12 = vld [vmem:[#allocation2 + $0x2cc] ss:$2 sm:$0x3f] }
 0x158   : > { %7553 = vmatmul.mubr.msk.f32.gmra.mrb[56].mxu0 %vm225_vm1, %v8974_v53  ;;  %v2124_v2 = vld [vmem:[#allocation2 + $0x278] ss:$2 sm:$0x3f]  ;;  %v2162_v15 = vld [vmem:[#allocation2 + $0x2cd] ss:$2 sm:$0x3f] }
 0x159   : > { %v2620_v9 = vld [vmem:[#allocation3 + $0xa] sm:$0xff]  ;;  %1854 = vst.msk [vmem:[#allocation2 + $0x2f8] sm:$0xff] %vm225_vm1, %v1840_v48  ;;  %v8990_v42 = vld [vmem:[#allocation3 + $0x12] sm:$0xff]  ;;  %v2164_v24 = vmax.f32 %v2158_v12, %v2162_v15  ;;  %1853 = vst.msk [vmem:[#allocation2 + $0x2f0] sm:$0xff] %vm225_vm1, %v1839_v5  ;;  %v1841_v36 = vmax.f32 %v1821_v16, 0.0 }
 0x15a   : > { %v2126_v19 = vld [vmem:[#allocation2 + $0x269] ss:$2 sm:$0xff]  ;;  %v2128_v51 = vld [vmem:[#allocation2 + $0x279] ss:$2 sm:$0x3f]  ;;  %1856 = vst.msk [vmem:[#allocation2 + $0x308] sm:$0xff] %vm225_vm1, %v1842_v6  ;;  %7341 = vmatmul.mubr.msk.f32.vlgmr.msra.gmra.mrb[48].mxu1 %vm225_vm1, %v2620_v9 }
 0x15b   : > { %v8996_v23 = vld [vmem:[#allocation3 + $0xb0] sm:$0xff]  ;;  %2167 = vst.msk [vmem:[#allocation3 + $0xd1] sm:$0xff] %vm225_vm1, %v2165_v10  ;;  %v2134_v26 = vld [vmem:[#allocation2 + $0x294] ss:$2 sm:$0x3f]  ;;  %v2166_v34 = vmax.f32 %v2154_v0, %v2164_v24  ;;  %7343 = vmatprep.mubr.msk.f32.mxu1 %vm225_vm1, %v8990_v42  ;;  %7851 = vmatpush3.bf16.msra.mxu1 %v8844_v14  ;;  %v2129_v44 = vmax.f32 %v2122_v1, %v2126_v19  ;;  %1855 = vst.msk [vmem:[#allocation2 + $0x300] sm:$0xff] %vm225_vm1, %v1841_v36 }
 0x15c   : > { %v2132_v25 = vld [vmem:[#allocation2 + $0x284] ss:$2 sm:$0xff]  ;;  %7555 = vmatprep.mubr.msk.f32.mxu0 %vm225_vm1, %v8996_v23  ;;  %v2136_v30 = vld [vmem:[#allocation2 + $0x285] ss:$2 sm:$0xff]  ;;  %v2130_v45 = vmax.f32 %v2124_v2, %v2128_v51  ;;  %7853 = vmatprep.subr.bf16.mxu1 %v8992_v18  ;;  %v9026_v5 = vld [vmem:[#allocation3 + $0x2a] sm:$0xff] }
 0x15d   : > { %v2138_v35 = vld [vmem:[#allocation2 + $0x295] ss:$2 sm:$0x3f]  ;;  %v2139_v46 = vmax.f32 %v2132_v25, %v2136_v30  ;;  %2168 = vst.msk [vmem:[#allocation3 + $0xd9] sm:$0x3f] %vm1879_vm2, %v2166_v34  ;;  %v9010_v52 = vld [vmem:[#allocation3 + $0x1a] sm:$0xff] }
 0x15e   : > { %v2140_v47 = vmax.f32 %v2134_v26, %v2138_v35  ;;  %7344 = vmatmul.mubr.msk.f32.gmra.mrb[50].mxu1 %vm225_vm1, %v9010_v52  ;;  %v9014_v48 = vld [vmem:[#allocation3 + $0x22] sm:$0xff]  ;;  %v9016_v0 = vld [vmem:[#allocation3 + $0xb8] sm:$0xff]  ;;  %v9050_v35 = vld [vmem:[#allocation3 + $0x4a] sm:$0xff] }
 0x15f   : > { %v2141_v56 = vmax.f32 %v2129_v44, %v2139_v46  ;;  %v2170_v62 = vld [vmem:[#allocation2 + $0x2d8] ss:$2 sm:$0xff]  ;;  %v2174_v63 = vld [vmem:[#allocation2 + $0x2d9] ss:$2 sm:$0xff]  ;;  %7346 = vmatprep.mubr.msk.f32.mxu1 %vm225_vm1, %v9014_v48  ;;  %7855 = vmatpush3.bf16.msra.mxu1 %v8992_v18  ;;  %v9034_v51 = vld [vmem:[#allocation3 + $0x3a] sm:$0xff] }
 0x160   : > { %v2142_v61 = vmax.f32 %v2130_v45, %v2140_v47  ;;  %v2172_v1 = vld [vmem:[#allocation2 + $0x2e8] ss:$2 sm:$0x3f]  ;;  %v2176_v2 = vld [vmem:[#allocation2 + $0x2e9] ss:$2 sm:$0x3f]  ;;  %7556 = vmatmul.mubr.msk.f32.gmra.mrb[58].mxu0 %vm225_vm1, %v9016_v0  ;;  %7857 = vmatprep.subr.bf16.mxu1 %v9005_v37  ;;  %v2177_v8 = vmax.f32 %v2170_v62, %v2174_v63 }
 0x161   : > { %2143 = vst.msk [vmem:[#allocation3 + $0xc1] sm:$0xff] %vm225_vm1, %v2141_v56  ;;  %v9030_v6 = vld [vmem:[#allocation3 + $0x32] sm:$0xff]  ;;  %v2178_v9 = vmax.f32 %v2172_v1, %v2176_v2  ;;  %v9038_v25 = vld [vmem:[#allocation3 + $0x42] sm:$0xff]  ;;  %v9066_v47 = vld [vmem:[#allocation3 + $0x5a] sm:$0xff] }
 0x162   : > { %2144 = vst.msk [vmem:[#allocation3 + $0xc9] sm:$0x3f] %vm1879_vm2, %v2142_v61  ;;  %7347 = vmatmul.mubr.msk.f32.gmra.mrb[52].mxu1 %vm225_vm1, %v9026_v5  ;;  %v2180_v10 = vld [vmem:[#allocation2 + $0x2f4] ss:$2 sm:$0xff]  ;;  %v2184_v15 = vld [vmem:[#allocation2 + $0x2f5] ss:$2 sm:$0xff] }
 0x163   : > { %v2182_v12 = vld [vmem:[#allocation2 + $0x304] ss:$2 sm:$0x3f]  ;;  %7349 = vmatprep.mubr.msk.f32.mxu1 %vm225_vm1, %v9030_v6  ;;  %v2186_v16 = vld [vmem:[#allocation2 + $0x305] ss:$2 sm:$0x3f]  ;;  %v2187_v19 = vmax.f32 %v2180_v10, %v2184_v15 }
 0x164   : > { %v2188_v24 = vmax.f32 %v2182_v12, %v2186_v16  ;;  %v9054_v44 = vld [vmem:[#allocation3 + $0xd0] sm:$0xff]  ;;  %v9064_v46 = vld [vmem:[#allocation3 + $0xd8] sm:$0xff]  ;;  %v9074_v61 = vld [vmem:[#allocation3 + $0x62] sm:$0xff] }
 0x165   : > { %v2189_v26 = vmax.f32 %v2177_v8, %v2187_v19  ;;  %v9058_v45 = vld [vmem:[#allocation3 + $0x52] sm:$0xff]  ;;  %v9082_v63 = vld [vmem:[#allocation3 + $0x6a] sm:$0xff]  ;;  %v3053_v1 = vld [vmem:[%s9751_s3 + $0x90] sm:$0xff] }
 0x166   : > { %7350 = vmatmul.mubr.msk.f32.gmra.mrb[54].mxu1 %vm225_vm1, %v9034_v51  ;;  %v2190_v36 = vmax.f32 %v2178_v9, %v2188_v24  ;;  %v9070_v56 = vld [vmem:[#allocation3 + $0x71] sm:$0xff]  ;;  %v9080_v62 = vld [vmem:[#allocation3 + $0x79] sm:$0xff]  ;;  %v9092_v8 = vld [vmem:[#allocation3 + $0x81] sm:$0xff] }
 0x167   : > { %7352 = vmatprep.mubr.msk.f32.mxu1 %vm225_vm1, %v9038_v25  ;;  %2191 = vst.msk [vmem:[#allocation3 + $0xe1] sm:$0xff] %vm225_vm1, %v2189_v26  ;;  %v2828_v2 = vld [vmem:[#allocation3 + $0x10] sm:$0xff]  ;;  %v3054_v9 = vld [vmem:[%s9751_s3 + $0x98] sm:$0xff]  ;;  %v2829_v12 = vld [vmem:[#allocation3 + $0x18] sm:$0xff] }
 0x168   : > { %v9042_v34 = vld [vmem:[#allocation3 + $0xc0] sm:$0xff]  ;;  %2192 = vst.msk [vmem:[#allocation3 + $0xe9] sm:$0x3f] %vm1879_vm2, %v2190_v36  ;;  %v9100_v10 = vld [vmem:[#allocation3 + $0x89] sm:$0xff]  ;;  %v9107_v15 = vpack.c.bf16 %v3054_v9, %v3053_v1  ;;  %v3261_v24 = vld [vmem:[%s9751_s3 + $0xa8] sm:$0xff] }
 0x169   : > { %v9044_v30 = vld [vmem:[#allocation3 + $0xc8] sm:$0xff]  ;;  %7558 = vmatprep.mubr.msk.f32.mxu0 %vm225_vm1, %v9042_v34  ;;  %v9110_v16 = vld [vmem:[#allocation3 + $0x20] sm:$0xff]  ;;  %v3260_v19 = vld [vmem:[%s9751_s3 + $0xa0] sm:$0xff] }
 0x16a   : > { %7559 = vmatmul.mubr.msk.f32.gmra.mrb[60].mxu0 %vm225_vm1, %v9044_v30  ;;  %7353 = vmatmul.mubr.msk.f32.gmra.mrb[56].mxu1 %vm225_vm1, %v9050_v35  ;;  %v9123_v26 = vld [vmem:[#allocation3 + $0x99] sm:$0xff]  ;;  %v9127_v36 = vld [vmem:[#allocation3 + $0x28] sm:$0xff] }
 0x16b   : > { %7561 = vmatprep.mubr.msk.f32.mxu0 %vm225_vm1, %v9054_v44  ;;  %7355 = vmatprep.mubr.msk.f32.mxu1 %vm225_vm1, %v9058_v45  ;;  %v9131_v1 = vld [vmem:[#allocation3 + $0xa1] sm:$0xff]  ;;  %v9141_v9 = vld [vmem:[#allocation3 + $0xa9] sm:$0xff] }
 0x16e   : > { %7562 = vmatmul.mubr.msk.f32.gmra.mrb[62].mxu0 %vm225_vm1, %v9064_v46  ;;  %7356 = vmatmul.mubr.msk.f32.gmra.mrb[58].mxu1 %vm225_vm1, %v9066_v47 }
 0x16f   : > { %7572 = vmatprep.mubr.msk.f32.mxu0 %vm225_vm1, %v9070_v56  ;;  %7358 = vmatprep.mubr.msk.f32.mxu1 %vm225_vm1, %v9074_v61 }
 0x172   : > { %7573 = vmatmul.mubr.msk.f32.vlgmr.msra.gmra.mrb[50].mxu0 %vm225_vm1, %v9080_v62  ;;  %7359 = vmatmul.mubr.msk.f32.gmra.mrb[60].mxu1 %vm225_vm1, %v9082_v63 }
 0x173   : > { %7915 = vmatpush3.bf16.msra.mxu0 %v8584_v54  ;;  %7369 = vmatprep.mubr.msk.f32.mxu1 %vm225_vm1, %v2828_v2  ;;  %v9105_v54 = vld [vmem:[#allocation3 + $0x91] sm:$0xff]  ;;  %v9134_v2 = vpack.c.bf16 %v3261_v24, %v3260_v19  ;;  %v9155_v19 = vld [vmem:[#allocation3 + $0xb9] sm:$0xff]  ;;  %v9159_v24 = vld [vmem:[#allocation3 + $0xc1] sm:$0xff] }
 0x174   : > { %7575 = vmatprep.mubr.msk.f32.mxu0 %vm225_vm1, %v9092_v8  ;;  %7917 = vmatprep.subr.bf16.mxu0 %v8817_v50  ;;  %9769 = vst [vmem:[#allocation8_spill] sm:$0xff] %v9105_v54 }
 0x176   : > { %7576 = vmatmul.mubr.msk.f32.gmra.mrb[52].mxu0 %vm225_vm1, %v9100_v10  ;;  %7370 = vmatmul.mubr.msk.f32.vlgmr.msra.gmra.mrb[48].mxu1 %vm225_vm1, %v2829_v12  ;;  %v9146_v12 = vld [vmem:[#allocation3 + $0xb1] sm:$0xff] }
 0x177   : > { %7578 = vmatprep.mubr.msk.f32.mxu0 %vm225_vm1, %v9105_v54  ;;  %7372 = vmatprep.mubr.msk.f32.mxu1 %vm225_vm1, %v9110_v16 }
 0x178   : > { %7919 = vmatpush3.bf16.msra.mxu0 %v8817_v50  ;;  %7859 = vmatpush3.bf16.msra.mxu1 %v9005_v37  ;;  %v8234_v50 = vld [vmem:[#allocation3 + $0x30] sm:$0xff] }
 0x179   : > { %7921 = vmatprep.subr.bf16.mxu0 %v8844_v14  ;;  %7861 = vmatprep.subr.bf16.mxu1 %v9107_v15 }
 0x17a   : > { %7579 = vmatmul.mubr.msk.f32.gmra.mrb[54].mxu0 %vm225_vm1, %v9123_v26  ;;  %7373 = vmatmul.mubr.msk.f32.gmra.mrb[50].mxu1 %vm225_vm1, %v9127_v36 }
 0x17b   : > { %7581 = vmatprep.mubr.msk.f32.mxu0 %vm225_vm1, %v9131_v1  ;;  %7375 = vmatprep.mubr.msk.f32.mxu1 %vm225_vm1, %v8234_v50  ;;  %v9210_v50 = vld [vmem:[#allocation3 + $0x8a] sm:$0xff] }
 0x17c   : > { %7863 = vmatpush3.bf16.msra.mxu1 %v9107_v15 }
 0x17d   : > { %7865 = vmatprep.subr.bf16.mxu1 %v9134_v2 }
 0x17e   : > { %7582 = vmatmul.mubr.msk.f32.gmra.mrb[56].mxu0 %vm225_vm1, %v9141_v9  ;;  %7376 = vmatmul.mubr.msk.f32.gmra.mrb[52].mxu1 %vm225_vm1, %v8710_v38  ;;  %v9167_v38 = vld [vmem:[#allocation3 + $0xc9] sm:$0xff] }
 0x17f   : > { %7584 = vmatprep.mubr.msk.f32.mxu0 %vm225_vm1, %v9146_v12  ;;  %7378 = vmatprep.mubr.msk.f32.mxu1 %vm225_vm1, %v8735_v32  ;;  %v9171_v32 = vld [vmem:[#allocation3 + $0xd1] sm:$0xff] }
 0x182   : > { %7585 = vmatmul.mubr.msk.f32.gmra.mrb[58].mxu0 %vm225_vm1, %v9155_v19  ;;  %7379 = vmatmul.mubr.msk.f32.gmra.mrb[54].mxu1 %vm225_vm1, %v8737_v33  ;;  %v9179_v33 = vld [vmem:[#allocation3 + $0xd9] sm:$0xff] }
 0x183   : > { %7587 = vmatprep.mubr.msk.f32.mxu0 %vm225_vm1, %v9159_v24  ;;  %7381 = vmatprep.mubr.msk.f32.mxu1 %vm225_vm1, %v8745_v41  ;;  %v9183_v41 = vld [vmem:[#allocation3 + $0x72] sm:$0xff] }
 0x186   : > { %7588 = vmatmul.mubr.msk.f32.gmra.mrb[60].mxu0 %vm225_vm1, %v9167_v38  ;;  %7382 = vmatmul.mubr.msk.f32.gmra.mrb[56].mxu1 %vm225_vm1, %v8768_v4  ;;  %v9191_v4 = vld [vmem:[#allocation3 + $0x7a] sm:$0xff] }
 0x187   : > { %7590 = vmatprep.mubr.msk.f32.mxu0 %vm225_vm1, %v9171_v32  ;;  %7384 = vmatprep.mubr.msk.f32.mxu1 %vm225_vm1, %v8774_v11  ;;  %v9198_v11 = vld [vmem:[#allocation3 + $0x82] sm:$0xff] }
 0x188   : > { %9770 = vst [vmem:[#allocation9_spill] sm:$0xff] %v9198_v11 }
 0x18a   : > { %7591 = vmatmul.mubr.msk.f32.gmra.mrb[62].mxu0 %vm225_vm1, %v9179_v33  ;;  %7385 = vmatmul.mubr.msk.f32.gmra.mrb[58].mxu1 %vm225_vm1, %v8789_v27  ;;  %v3262_v27 = vld [vmem:[%s9751_s3 + $0xb0] sm:$0xff] }
 0x18b   : > { %7601 = vmatprep.mubr.msk.f32.mxu0 %vm225_vm1, %v9183_v41  ;;  %7387 = vmatprep.mubr.msk.f32.mxu1 %vm225_vm1, %v8809_v40  ;;  %v3263_v40 = vld [vmem:[%s9751_s3 + $0xb8] sm:$0xff] }
 0x18e   : > { %7602 = vmatmul.mubr.msk.f32.vlgmr.msra.gmra.mrb[50].mxu0 %vm225_vm1, %v9191_v4  ;;  %7388 = vmatmul.mubr.msk.f32.gmra.mrb[60].mxu1 %vm225_vm1, %v8853_v28  ;;  %v9217_v28 = vpack.c.bf16 %v3263_v40, %v3262_v27  ;;  %v9232_v27 = vld [vmem:[#allocation3 + $0x9a] sm:$0xff] }
 0x18f   : > { %7923 = vmatpush3.bf16.msra.mxu0 %v8844_v14  ;;  %7398 = vmatprep.mubr.msk.f32.mxu1 %vm225_vm1, %v8824_v58  ;;  %v9215_v14 = vld [vmem:[#allocation3 + $0x92] sm:$0xff] }
 0x190   : > { %7604 = vmatprep.mubr.msk.f32.mxu0 %vm225_vm1, %v9198_v11  ;;  %7925 = vmatprep.subr.bf16.mxu0 %v8992_v18  ;;  %v3469_v58 = vld [vmem:[%s9751_s3 + $0xc0] sm:$0xff]  ;;  %v3470_v11 = vld [vmem:[%s9751_s3 + $0xc8] sm:$0xff] }
 0x191   : > { %v9241_v40 = vpack.c.bf16 %v3470_v11, %v3469_v58  ;;  %v9263_v11 = vld [vmem:[#allocation3 + $0xba] sm:$0xff]  ;;  %v9267_v58 = vld [vmem:[#allocation3 + $0xc2] sm:$0xff] }
 0x192   : > { %7605 = vmatmul.mubr.msk.f32.gmra.mrb[52].mxu0 %vm225_vm1, %v9210_v50  ;;  %7399 = vmatmul.mubr.msk.f32.vlgmr.msra.gmra.mrb[48].mxu1 %vm225_vm1, %v8837_v7  ;;  %v9238_v7 = vld [vmem:[#allocation3 + $0xa2] sm:$0xff]  ;;  %9772 = vst [vmem:[#allocation11_spill] sm:$0xff] %v9267_v58 }
 0x193   : > { %7607 = vmatprep.mubr.msk.f32.mxu0 %vm225_vm1, %v9215_v14  ;;  %7401 = vmatprep.mubr.msk.f32.mxu1 %vm225_vm1, %v8849_v55  ;;  %v9249_v55 = vld [vmem:[#allocation3 + $0xaa] sm:$0xff] }
 0x194   : > { %7927 = vmatpush3.bf16.msra.mxu0 %v8992_v18  ;;  %7867 = vmatpush3.bf16.msra.mxu1 %v9134_v2  ;;  %v9254_v18 = vld [vmem:[#allocation3 + $0xb2] sm:$0xff] }
 0x195   : > { %7929 = vmatprep.subr.bf16.mxu0 %v9005_v37  ;;  %7869 = vmatprep.subr.bf16.mxu1 %v9217_v28  ;;  %9771 = vst [vmem:[#allocation10_spill] sm:$0xff] %v9254_v18 }
 0x196   : > { %7608 = vmatmul.mubr.msk.f32.gmra.mrb[54].mxu0 %vm225_vm1, %v9232_v27  ;;  %7402 = vmatmul.mubr.msk.f32.gmra.mrb[50].mxu1 %vm225_vm1, %v8857_v31 }
 0x197   : > { %7610 = vmatprep.mubr.msk.f32.mxu0 %vm225_vm1, %v9238_v7  ;;  %7404 = vmatprep.mubr.msk.f32.mxu1 %vm225_vm1, %v8879_v60 }
 0x198   : > { %7871 = vmatpush3.bf16.msra.mxu1 %v9217_v28 }
 0x199   : > { %7873 = vmatprep.subr.bf16.mxu1 %v9241_v40 }
 0x19a   : > { %7611 = vmatmul.mubr.msk.f32.gmra.mrb[56].mxu0 %vm225_vm1, %v9249_v55  ;;  %7405 = vmatmul.mubr.msk.f32.gmra.mrb[52].mxu1 %vm225_vm1, %v8892_v13 }
 0x19b   : > { %7613 = vmatprep.mubr.msk.f32.mxu0 %vm225_vm1, %v9254_v18  ;;  %7407 = vmatprep.mubr.msk.f32.mxu1 %vm225_vm1, %v8900_v20  ;;  %v9275_v18 = vld [vmem:[#allocation3 + $0xca] sm:$0xff]  ;;  %v9279_v20 = vld [vmem:[#allocation3 + $0xd2] sm:$0xff] }
 0x19e   : > { %7614 = vmatmul.mubr.msk.f32.gmra.mrb[58].mxu0 %vm225_vm1, %v9263_v11  ;;  %7408 = vmatmul.mubr.msk.f32.gmra.mrb[54].mxu1 %vm225_vm1, %v8919_v49 }
 0x19f   : > { %7616 = vmatprep.mubr.msk.f32.mxu0 %vm225_vm1, %v9267_v58  ;;  %7410 = vmatprep.mubr.msk.f32.mxu1 %vm225_vm1, %v8928_v57  ;;  %v9287_v58 = vld [vmem:[#allocation3 + $0xda] sm:$0xff] }
 0x1a0   : > { %9773 = vst [vmem:[#allocation12_spill] sm:$0xff] %v9287_v58 }
 0x1a2   : > { %7617 = vmatmul.mubr.msk.f32.gmra.mrb[60].mxu0 %vm225_vm1, %v9275_v18  ;;  %7411 = vmatmul.mubr.msk.f32.gmra.mrb[56].mxu1 %vm225_vm1, %v8940_v3 }
 0x1a3   : > { %7619 = vmatprep.mubr.msk.f32.mxu0 %vm225_vm1, %v9279_v20  ;;  %7413 = vmatprep.mubr.msk.f32.mxu1 %vm225_vm1, %v8953_v21 }
 0x1a6   : > { %7620 = vmatmul.mubr.msk.f32.gmra.mrb[62].mxu0 %vm225_vm1, %v9287_v58  ;;  %7414 = vmatmul.mubr.msk.f32.gmra.mrb[58].mxu1 %vm225_vm1, %v8965_v29  ;;  %v3471_v58 = vld [vmem:[%s9751_s3 + $0xd0] sm:$0xff]  ;;  %v3472_v29 = vld [vmem:[%s9751_s3 + $0xd8] sm:$0xff] }
 0x1a7   : > { %7630 = vmatprep.mubr.msk.f32.mxu0 %vm225_vm1, %v8910_v39  ;;  %7416 = vmatprep.mubr.msk.f32.mxu1 %vm225_vm1, %v9070_v56 }
 0x1aa   : > { %7631 = vmatmul.mubr.msk.f32.vlgmr.msra.gmra.mrb[50].mxu0 %vm225_vm1, %v8912_v43  ;;  %7417 = vmatmul.mubr.msk.f32.gmra.mrb[60].mxu1 %vm225_vm1, %v9080_v62 }
 0x1ab   : > { %7931 = vmatpush3.bf16.msra.mxu0 %v9005_v37  ;;  %7427 = vmatprep.mubr.msk.f32.mxu1 %vm225_vm1, %v8990_v42  ;;  %v9315_v37 = vpack.c.bf16 %v3472_v29, %v3471_v58  ;;  %v3678_v42 = vld [vmem:[%s9751_s3 + $0xe0] sm:$0xff]  ;;  %v3681_v58 = vld [vmem:[%s9751_s3 + $0xf8] sm:$0xff] }
 0x1ac   : > { %7633 = vmatprep.mubr.msk.f32.mxu0 %vm225_vm1, %v8930_v59  ;;  %7933 = vmatprep.subr.bf16.mxu0 %v9107_v15  ;;  %v3679_v59 = vld [vmem:[%s9751_s3 + $0xe8] sm:$0xff] }
 0x1ad   : > { %v9335_v29 = vpack.c.bf16 %v3679_v59, %v3678_v42  ;;  %v9363_v59 = vld [vmem:[#allocation3 + $0xe0] sm:$0xff]  ;;  %v3457_v42 = vld [vmem:[#allocation3 + $0x30] sm:$0xff] }
 0x1ae   : > { %7634 = vmatmul.mubr.msk.f32.gmra.mrb[52].mxu0 %vm225_vm1, %v8946_v17  ;;  %7428 = vmatmul.mubr.msk.f32.vlgmr.msra.gmra.mrb[48].mxu1 %vm225_vm1, %v9010_v52  ;;  %v9371_v52 = vld [vmem:[#allocation3 + $0xe8] sm:$0xff] }
 0x1af   : > { %7636 = vmatprep.mubr.msk.f32.mxu0 %vm225_vm1, %v8955_v22  ;;  %7430 = vmatprep.mubr.msk.f32.mxu1 %vm225_vm1, %v9014_v48 }
 0x1b0   : > { %7935 = vmatpush3.bf16.msra.mxu0 %v9107_v15  ;;  %7875 = vmatpush3.bf16.msra.mxu1 %v9241_v40  ;;  %v3680_v15 = vld [vmem:[%s9751_s3 + $0xf0] sm:$0xff] }
 0x1b1   : > { %7937 = vmatprep.subr.bf16.mxu0 %v9134_v2  ;;  %7877 = vmatprep.subr.bf16.mxu1 %v9315_v37 }
 0x1b2   : > { %7637 = vmatmul.mubr.msk.f32.gmra.mrb[54].mxu0 %vm225_vm1, %v8974_v53  ;;  %7431 = vmatmul.mubr.msk.f32.gmra.mrb[50].mxu1 %vm225_vm1, %v9026_v5 }
 0x1b3   : > { %7639 = vmatprep.mubr.msk.f32.mxu0 %vm225_vm1, %v8996_v23  ;;  %7433 = vmatprep.mubr.msk.f32.mxu1 %vm225_vm1, %v9030_v6 }
 0x1b4   : > { %7879 = vmatpush3.bf16.msra.mxu1 %v9315_v37 }
 0x1b5   : > { %7881 = vmatprep.subr.bf16.mxu1 %v9335_v29 }
 0x1b6   : > { %7640 = vmatmul.mubr.msk.f32.gmra.mrb[56].mxu0 %vm225_vm1, %v9016_v0  ;;  %7434 = vmatmul.mubr.msk.f32.gmra.mrb[52].mxu1 %vm225_vm1, %v9034_v51 }
 0x1b7   : > { %7642 = vmatprep.mubr.msk.f32.mxu0 %vm225_vm1, %v9042_v34  ;;  %7436 = vmatprep.mubr.msk.f32.mxu1 %vm225_vm1, %v9038_v25 }
 0x1ba   : > { %7643 = vmatmul.mubr.msk.f32.gmra.mrb[58].mxu0 %vm225_vm1, %v9044_v30  ;;  %7437 = vmatmul.mubr.msk.f32.gmra.mrb[54].mxu1 %vm225_vm1, %v9050_v35 }
 0x1bb   : > { %7645 = vmatprep.mubr.msk.f32.mxu0 %vm225_vm1, %v9054_v44  ;;  %7439 = vmatprep.mubr.msk.f32.mxu1 %vm225_vm1, %v9058_v45 }
 0x1be   : > { %7646 = vmatmul.mubr.msk.f32.gmra.mrb[60].mxu0 %vm225_vm1, %v9064_v46  ;;  %7440 = vmatmul.mubr.msk.f32.gmra.mrb[56].mxu1 %vm225_vm1, %v9066_v47 }
 0x1bf   : > { %7648 = vmatprep.mubr.msk.f32.mxu0 %vm225_vm1, %v9363_v59  ;;  %7442 = vmatprep.mubr.msk.f32.mxu1 %vm225_vm1, %v9074_v61 }
 0x1c2   : > { %7649 = vmatmul.mubr.msk.f32.gmra.mrb[62].mxu0 %vm225_vm1, %v9371_v52  ;;  %7443 = vmatmul.mubr.msk.f32.gmra.mrb[58].mxu1 %vm225_vm1, %v9082_v63 }
 0x1c3   : > { %7659 = vmatprep.mubr.msk.f32.mxu0 %vm225_vm1, %v9092_v8  ;;  %7445 = vmatprep.mubr.msk.f32.mxu1 %vm225_vm1, %v9183_v41 }
 0x1c6   : > { %7660 = vmatmul.mubr.msk.f32.vlgmr.msra.gmra.mrb[50].mxu0 %vm225_vm1, %v9100_v10  ;;  %7446 = vmatmul.mubr.msk.f32.gmra.mrb[60].mxu1 %vm225_vm1, %v9191_v4 }
 0x1c7   : > { %7939 = vmatpush3.bf16.msra.mxu0 %v9134_v2  ;;  %7456 = vmatprep.mubr.msk.f32.mxu1 %vm225_vm1, %v9110_v16  ;;  %v9399_v2 = vpack.c.bf16 %v3681_v58, %v3680_v15  ;;  %v3887_v16 = vld [vmem:[%s9751_s3 + $0x100] sm:$0xff]  ;;  %v3459_v58 = vld [vmem:[#allocation3 + $0x40] sm:$0xff] }
 0x1c8   : > { %7662 = vmatprep.mubr.msk.f32.mxu0 %vm225_vm1, %v9105_v54  ;;  %7941 = vmatprep.subr.bf16.mxu0 %v9217_v28  ;;  %v3888_v54 = vld [vmem:[%s9751_s3 + $0x108] sm:$0xff] }
 0x1c9   : > { %v9418_v15 = vpack.c.bf16 %v3888_v54, %v3887_v16  ;;  %v3461_v54 = vld [vmem:[#allocation3 + $0x50] sm:$0xff]  ;;  %v3463_v16 = vld [vmem:[#allocation3 + $0x60] sm:$0xff] }
 0x1ca   : > { %7663 = vmatmul.mubr.msk.f32.gmra.mrb[52].mxu0 %vm225_vm1, %v9123_v26  ;;  %7457 = vmatmul.mubr.msk.f32.vlgmr.msra.gmra.mrb[48].mxu1 %vm225_vm1, %v9127_v36  ;;  %v3458_v36 = vld [vmem:[#allocation3 + $0x38] sm:$0xff] }
 0x1cb   : > { %7665 = vmatprep.mubr.msk.f32.mxu0 %vm225_vm1, %v9131_v1  ;;  %7459 = vmatprep.mubr.msk.f32.mxu1 %vm225_vm1, %v3457_v42  ;;  %v3462_v42 = vld [vmem:[#allocation3 + $0x58] sm:$0xff] }
 0x1cc   : > { %7943 = vmatpush3.bf16.msra.mxu0 %v9217_v28  ;;  %7883 = vmatpush3.bf16.msra.mxu1 %v9335_v29  ;;  %v3460_v28 = vld [vmem:[#allocation3 + $0x48] sm:$0xff] }
 0x1cd   : > { %7945 = vmatprep.subr.bf16.mxu0 %v9241_v40  ;;  %7885 = vmatprep.subr.bf16.mxu1 %v9399_v2 }
 0x1ce   : > { %7666 = vmatmul.mubr.msk.f32.gmra.mrb[54].mxu0 %vm225_vm1, %v9141_v9  ;;  %7460 = vmatmul.mubr.msk.f32.gmra.mrb[50].mxu1 %vm225_vm1, %v3458_v36  ;;  %v3464_v36 = vld [vmem:[#allocation3 + $0x68] sm:$0xff] }
 0x1cf   : > { %7668 = vmatprep.mubr.msk.f32.mxu0 %vm225_vm1, %v9146_v12  ;;  %7462 = vmatprep.mubr.msk.f32.mxu1 %vm225_vm1, %v3459_v58  ;;  %v9440_v58 = vld [vmem:[#allocation3 + $0xe1] sm:$0xff] }
 0x1d0   : > { %7887 = vmatpush3.bf16.msra.mxu1 %v9399_v2 }
 0x1d1   : > { %7889 = vmatprep.subr.bf16.mxu1 %v9418_v15 }
 0x1d2   : > { %7669 = vmatmul.mubr.msk.f32.gmra.mrb[56].mxu0 %vm225_vm1, %v9155_v19  ;;  %7463 = vmatmul.mubr.msk.f32.gmra.mrb[52].mxu1 %vm225_vm1, %v3460_v28  ;;  %v3465_v28 = vld [vmem:[#allocation3 + $0x70] sm:$0xff] }
 0x1d3   : > { %7671 = vmatprep.mubr.msk.f32.mxu0 %vm225_vm1, %v9159_v24  ;;  %7465 = vmatprep.mubr.msk.f32.mxu1 %vm225_vm1, %v3461_v54  ;;  %v9446_v54 = vld [vmem:[#allocation3 + $0xe9] sm:$0xff] }
 0x1d6   : > { %7672 = vmatmul.mubr.msk.f32.gmra.mrb[58].mxu0 %vm225_vm1, %v9167_v38  ;;  %7466 = vmatmul.mubr.msk.f32.gmra.mrb[54].mxu1 %vm225_vm1, %v3462_v42  ;;  %v3466_v42 = vld [vmem:[#allocation3 + $0x78] sm:$0xff] }
 0x1d7   : > { %7674 = vmatprep.mubr.msk.f32.mxu0 %vm225_vm1, %v9171_v32  ;;  %7468 = vmatprep.mubr.msk.f32.mxu1 %vm225_vm1, %v3463_v16  ;;  %v9774_v16 = vld [vmem:[#allocation9_spill] sm:$0xff] }
 0x1da   : > { %7675 = vmatmul.mubr.msk.f32.gmra.mrb[60].mxu0 %vm225_vm1, %v9179_v33  ;;  %7469 = vmatmul.mubr.msk.f32.gmra.mrb[56].mxu1 %vm225_vm1, %v3464_v36  ;;  %v3664_v36 = vld [vmem:[#allocation3 + $0x21] sm:$0xff] }
 0x1db   : > { %7677 = vmatprep.mubr.msk.f32.mxu0 %vm225_vm1, %v9440_v58  ;;  %7471 = vmatprep.mubr.msk.f32.mxu1 %vm225_vm1, %v3465_v28  ;;  %v3889_v28 = vld [vmem:[%s9751_s3 + $0x110] sm:$0xff] }
 0x1de   : > { %7678 = vmatmul.mubr.msk.f32.gmra.mrb[62].mxu0 %vm225_vm1, %v9446_v54  ;;  %7472 = vmatmul.mubr.msk.f32.gmra.mrb[58].mxu1 %vm225_vm1, %v3466_v42  ;;  %v3890_v42 = vld [vmem:[%s9751_s3 + $0x118] sm:$0xff] }
 0x1df   : > { %7688 = vmatprep.mubr.msk.f32.mxu0 %vm225_vm1, %v9774_v16  ;;  %7474 = vmatprep.mubr.msk.f32.mxu1 %vm225_vm1, %v8910_v39  ;;  %v9472_v39 = vpack.c.bf16 %v3890_v42, %v3889_v28 }
 0x1e2   : > { %7689 = vmatmul.mubr.msk.f32.vlgmr.msra.gmra.mrb[50].mxu0 %vm225_vm1, %v9210_v50  ;;  %7475 = vmatmul.mubr.msk.f32.gmra.mrb[60].mxu1 %vm225_vm1, %v8912_v43  ;;  %v9776_v43 = vld [vmem:[#allocation5_spill] sm:$0xff] }
 0x1e3   : > { %7947 = vmatpush3.bf16.msra.mxu0 %v9241_v40  ;;  %7485 = vmatprep.mubr.msk.f32.mxu1 %vm225_vm1, %v3664_v36  ;;  %v9779_v40 = vld [vmem:[#allocation7_spill] sm:$0xff] }
 0x1e4   : > { %7691 = vmatprep.mubr.msk.f32.mxu0 %vm225_vm1, %v9215_v14  ;;  %7949 = vmatprep.subr.bf16.mxu0 %v9315_v37 }
 0x1e6   : > { %7692 = vmatmul.mubr.msk.f32.gmra.mrb[52].mxu0 %vm225_vm1, %v9232_v27  ;;  %7486 = vmatmul.mubr.msk.f32.vlgmr.msra.gmra.mrb[48].mxu1 %vm225_vm1, %v8857_v31  ;;  %v9775_v31 = vld [vmem:[#allocation10_spill] sm:$0xff] }
 0x1e7   : > { %7694 = vmatprep.mubr.msk.f32.mxu0 %vm225_vm1, %v9238_v7  ;;  %7488 = vmatprep.mubr.msk.f32.mxu1 %vm225_vm1, %v8879_v60  ;;  %v9777_v60 = vld [vmem:[#allocation11_spill] sm:$0xff] }
 0x1e8   : > { %7951 = vmatpush3.bf16.msra.mxu0 %v9315_v37  ;;  %7891 = vmatpush3.bf16.msra.mxu1 %v9418_v15 }
 0x1e9   : > { %7953 = vmatprep.subr.bf16.mxu0 %v9335_v29  ;;  %7893 = vmatprep.subr.bf16.mxu1 %v9472_v39 }
 0x1ea   : > { %7695 = vmatmul.mubr.msk.f32.gmra.mrb[54].mxu0 %vm225_vm1, %v9249_v55  ;;  %7489 = vmatmul.mubr.msk.f32.gmra.mrb[50].mxu1 %vm225_vm1, %v8892_v13  ;;  %v9778_v13 = vld [vmem:[#allocation12_spill] sm:$0xff] }
 0x1eb   : > { %7697 = vmatprep.mubr.msk.f32.mxu0 %vm225_vm1, %v9775_v31  ;;  %7491 = vmatprep.mubr.msk.f32.mxu1 %vm225_vm1, %v9776_v43 }
 0x1ec   : > { %7895 = vmatpush3.bf16.msra.mxu1 %v9472_v39 }
 0x1ee   : > { %7698 = vmatmul.mubr.msk.f32.gmra.mrb[56].mxu0 %vm225_vm1, %v9263_v11  ;;  %7492 = vmatmul.mubr.msk.f32.gmra.mrb[52].mxu1 %vm225_vm1, %v8919_v49  ;;  %v9511_v49 = vld [vmem:[#allocation3 + $0xe2] sm:$0xff] }
 0x1ef   : > { %7700 = vmatprep.mubr.msk.f32.mxu0 %vm225_vm1, %v9777_v60  ;;  %7494 = vmatprep.mubr.msk.f32.mxu1 %vm225_vm1, %v8928_v57  ;;  %v9519_v57 = vld [vmem:[#allocation3 + $0xea] sm:$0xff] }
 0x1f2   : > { %7701 = vmatmul.mubr.msk.f32.gmra.mrb[58].mxu0 %vm225_vm1, %v9275_v18  ;;  %7495 = vmatmul.mubr.msk.f32.gmra.mrb[54].mxu1 %vm225_vm1, %v8940_v3  ;;  %v9780_v3 = vld [vmem:[#allocation6_spill] sm:$0xff] }
 0x1f3   : > { %7703 = vmatprep.mubr.msk.f32.mxu0 %vm225_vm1, %v9279_v20  ;;  %7497 = vmatprep.mubr.msk.f32.mxu1 %vm225_vm1, %v8953_v21  ;;  %v5386_v21 = vld [vmem:[#allocation3 + $0xf8] sm:$0xff] }
 0x1f6   : > { %7704 = vmatmul.mubr.msk.f32.gmra.mrb[60].mxu0 %vm225_vm1, %v9778_v13  ;;  %7498 = vmatmul.mubr.msk.f32.gmra.mrb[56].mxu1 %vm225_vm1, %v9779_v40 }
 0x1f7   : > { %7706 = vmatprep.mubr.msk.f32.mxu0 %vm225_vm1, %v9511_v49  ;;  %7500 = vmatprep.mubr.msk.f32.mxu1 %vm225_vm1, %v9070_v56 }
 0x1fa   : > { %7707 = vmatmul.mubr.msk.f32.gmra.mrb[62].mxu0 %vm225_vm1, %v9519_v57  ;;  %7501 = vmatmul.mubr.msk.f32.gmra.mrb[58].mxu1 %vm225_vm1, %v9080_v62 }
 0x1fb   : > { %7717 = vmatprep.mubr.msk.f32.mxu0 %vm225_vm1, %v9780_v3  ;;  %7503 = vmatprep.mubr.msk.f32.mxu1 %vm225_vm1, %v9092_v8 }
 0x1fe   : > { %7718 = vmatmul.mubr.msk.f32.vlgmr.msra.gmra.mrb[50].mxu0 %vm225_vm1, %v8946_v17  ;;  %7504 = vmatmul.mubr.msk.f32.gmra.mrb[60].mxu1 %vm225_vm1, %v9100_v10  ;;  %v5385_v17 = vld [vmem:[#allocation3 + $0xf0] sm:$0xff] }
 0x1ff   : > { %7955 = vmatpush3.bf16.msra.mxu0 %v9335_v29  ;;  %7514 = vmatprep.mubr.msk.f32.mxu1 %vm225_vm1, %v9014_v48  ;;  %v5803_v48 = vld [vmem:[#allocation3 + $0xf2] sm:$0xff] }
 0x200   : > { %7720 = vmatprep.mubr.msk.f32.mxu0 %vm225_vm1, %v8955_v22  ;;  %7957 = vmatprep.subr.bf16.mxu0 %v9399_v2  ;;  %v9781_v22 = vld [vmem:[#allocation8_spill] sm:$0xff] }
 0x202   : > { %7721 = vmatmul.mubr.msk.f32.gmra.mrb[52].mxu0 %vm225_vm1, %v8974_v53  ;;  %7515 = vmatmul.mubr.msk.f32.vlgmr.msra.gmra.mrb[48].mxu1 %vm225_vm1, %v9026_v5  ;;  %v5594_v53 = vld [vmem:[#allocation3 + $0xf1] sm:$0xff]  ;;  %v9645_v5 = vld [vmem:[%s9752_s4] ss:$0 sm:$0xff] }
 0x203   : > { %7723 = vmatprep.mubr.msk.f32.mxu0 %vm225_vm1, %v8996_v23  ;;  %7517 = vmatprep.mubr.msk.f32.mxu1 %vm225_vm1, %v9030_v6  ;;  %v5595_v23 = vld [vmem:[#allocation3 + $0xf9] sm:$0xff] }
 0x204   : > { %7959 = vmatpush3.bf16.msra.mxu0 %v9399_v2 }
 0x205   : > { %7961 = vmatprep.subr.bf16.mxu0 %v9418_v15 }
 0x206   : > { %7724 = vmatmul.mubr.msk.f32.gmra.mrb[54].mxu0 %vm225_vm1, %v9016_v0  ;;  %7518 = vmatmul.mubr.msk.f32.gmra.mrb[50].mxu1 %vm225_vm1, %v9034_v51  ;;  %v5804_v0 = vld [vmem:[#allocation3 + $0xfa] sm:$0xff] }
 0x207   : > { %7726 = vmatprep.mubr.msk.f32.mxu0 %vm225_vm1, %v9042_v34  ;;  %7520 = vmatprep.mubr.msk.f32.mxu1 %vm225_vm1, %v9038_v25 }
 0x20a   : > { %7727 = vmatmul.mubr.msk.f32.gmra.mrb[56].mxu0 %vm225_vm1, %v9044_v30  ;;  %7521 = vmatmul.mubr.msk.f32.gmra.mrb[52].mxu1 %vm225_vm1, %v9050_v35 }
 0x20b   : > { %7729 = vmatprep.mubr.msk.f32.mxu0 %vm225_vm1, %v9054_v44  ;;  %7523 = vmatprep.mubr.msk.f32.mxu1 %vm225_vm1, %v9058_v45 }
 0x20e   : > { %7730 = vmatmul.mubr.msk.f32.gmra.mrb[58].mxu0 %vm225_vm1, %v9064_v46  ;;  %7524 = vmatmul.mubr.msk.f32.gmra.mrb[54].mxu1 %vm225_vm1, %v9066_v47 }
 0x20f   : > { %7732 = vmatprep.mubr.msk.f32.mxu0 %vm225_vm1, %v9363_v59  ;;  %7526 = vmatprep.mubr.msk.f32.mxu1 %vm225_vm1, %v9074_v61  ;;  %v6042_v59 = vld [vmem:[%s9667_s19] sm:$0xf] }
 0x212   : > { %7733 = vmatmul.mubr.msk.f32.gmra.mrb[60].mxu0 %vm225_vm1, %v9371_v52  ;;  %7527 = vmatmul.mubr.msk.f32.gmra.mrb[56].mxu1 %vm225_vm1, %v9082_v63 }
 0x213   : > { %7735 = vmatprep.mubr.msk.f32.mxu0 %vm225_vm1, %v5385_v17  ;;  %7529 = vmatprep.mubr.msk.f32.mxu1 %vm225_vm1, %v9183_v41 }
 0x216   : > { %7736 = vmatmul.mubr.msk.f32.gmra.mrb[62].mxu0 %vm225_vm1, %v5386_v21  ;;  %7530 = vmatmul.mubr.msk.f32.gmra.mrb[58].mxu1 %vm225_vm1, %v9191_v4 }
 0x217   : > { %7746 = vmatprep.mubr.msk.f32.mxu0 %vm225_vm1, %v9781_v22  ;;  %7532 = vmatprep.mubr.msk.f32.mxu1 %vm225_vm1, %v9774_v16 }
 0x21a   : > { %7747 = vmatmul.mubr.msk.f32.vlgmr.msra.gmra.mrb[50].mxu0 %vm225_vm1, %v9123_v26  ;;  %7533 = vmatmul.mubr.msk.f32.gmra.mrb[60].mxu1 %vm225_vm1, %v9210_v50 }
 0x21b   : > { %7963 = vmatpush3.bf16.msra.mxu0 %v9418_v15  ;;  %7749 = vmatprep.mubr.msk.f32.mxu0 %vm225_vm1, %v9131_v1 }
 0x21c   : > { %7965 = vmatprep.subr.bf16.mxu0 %v9472_v39 }
 0x21e   : > { %7750 = vmatmul.mubr.msk.f32.gmra.mrb[52].mxu0 %vm225_vm1, %v9141_v9 }
 0x21f   : > { %7752 = vmatprep.mubr.msk.f32.mxu0 %vm225_vm1, %v9146_v12  ;;  %7967 = vmatpush3.bf16.msra.mxu0 %v9472_v39 }
 0x222   : > { %7753 = vmatmul.mubr.msk.f32.gmra.mrb[54].mxu0 %vm225_vm1, %v9155_v19 }
 0x223   : > { %7755 = vmatprep.mubr.msk.f32.mxu0 %vm225_vm1, %v9159_v24 }
 0x226   : > { %7756 = vmatmul.mubr.msk.f32.gmra.mrb[56].mxu0 %vm225_vm1, %v9167_v38 }
 0x227   : > { %7758 = vmatprep.mubr.msk.f32.mxu0 %vm225_vm1, %v9171_v32 }
 0x22a   : > { %7759 = vmatmul.mubr.msk.f32.gmra.mrb[58].mxu0 %vm225_vm1, %v9179_v33 }
 0x22b   : > { %7761 = vmatprep.mubr.msk.f32.mxu0 %vm225_vm1, %v9440_v58 }
 0x22e   : > { %7762 = vmatmul.mubr.msk.f32.gmra.mrb[60].mxu0 %vm225_vm1, %v9446_v54 }
 0x22f   : > { %7764 = vmatprep.mubr.msk.f32.mxu0 %vm225_vm1, %v5594_v53 }
 0x232   : > { %7765 = vmatmul.mubr.msk.f32.gmra.mrb[62].mxu0 %vm225_vm1, %v5595_v23 }
 0x233   : > { %7775 = vmatprep.mubr.msk.f32.mxu0 %vm225_vm1, %v9215_v14 }
 0x236   : > { %7776 = vmatmul.mubr.msk.f32.vlgmr.msra.gmra.mrb[50].mxu0 %vm225_vm1, %v9232_v27 }
 0x237   : > { %7778 = vmatprep.mubr.msk.f32.mxu0 %vm225_vm1, %v9238_v7 }
 0x23a   : > { %7779 = vmatmul.mubr.msk.f32.gmra.mrb[52].mxu0 %vm225_vm1, %v9249_v55 }
 0x23b   : > { %7781 = vmatprep.mubr.msk.f32.mxu0 %vm225_vm1, %v9775_v31 }
 0x23e   : > { %7782 = vmatmul.mubr.msk.f32.gmra.mrb[54].mxu0 %vm225_vm1, %v9263_v11 }
 0x23f   : > { %7784 = vmatprep.mubr.msk.f32.mxu0 %vm225_vm1, %v9777_v60 }
 0x242   : > { %7785 = vmatmul.mubr.msk.f32.gmra.mrb[56].mxu0 %vm225_vm1, %v9275_v18 }
 0x243   : > { %7787 = vmatprep.mubr.msk.f32.mxu0 %vm225_vm1, %v9279_v20 }
 0x246   : > { %7788 = vmatmul.mubr.msk.f32.gmra.mrb[58].mxu0 %vm225_vm1, %v9778_v13 }
 0x247   : > { %7790 = vmatprep.mubr.msk.f32.mxu0 %vm225_vm1, %v9511_v49 }
 0x24a   : > { %7791 = vmatmul.mubr.msk.f32.gmra.mrb[60].mxu0 %vm225_vm1, %v9519_v57 }
 0x24b   : > { %7793 = vmatprep.mubr.msk.f32.mxu0 %vm225_vm1, %v5803_v48 }
 0x24e   : > { %7794 = vmatmul.mubr.msk.f32.gmra.mrb[62].mxu0 %vm225_vm1, %v5804_v0  ;;  %vm6162_vm1 = vsmask.f32 1280 }
 0x24f   : > { %vm6163_vm2 = vmand %vm6138_vm0, %vm6162_vm1 }
 0x2d5   : > { %v7516_v20 = vpop.f32.mrb[48].mxu1 }
 0x2d6   : > { %v7970_v6 = vadd.f32 %v7516_v20, %v9645_v5  ;;  %v3999_v51 = vpop.f32.mrb[49].mxu1 }
 0x2d7   : > { %v7971_v25 = vadd.f32 %v9645_v5, %v3999_v51 }
 0x2d8   : > { %v4083_v34 = vmax.f32 %v7970_v6, 0.0 }
 0x2d9   : > { %v4082_v30 = vmax.f32 %v7971_v25, 0.0  ;;  %v7519_v35 = vpop.f32.mrb[50].mxu1 }
 0x2da   : > { %4098 = vst.msk [vmem:[#allocation4 + $0x8] sm:$0xff] %vm4096_vm3, %v4083_v34  ;;  %v7972_v44 = vadd.f32 %v7519_v35, %v9645_v5  ;;  %v4009_v45 = vpop.f32.mrb[51].mxu1 }
 0x2db   : > { %4097 = vst.msk [vmem:[#allocation4] sm:$0xff] %vm4096_vm3, %v4082_v30  ;;  %v7973_v46 = vadd.f32 %v9645_v5, %v4009_v45 }
 0x2dc   : > { %v4085_v47 = vmax.f32 %v7972_v44, 0.0 }
 0x2dd   : > { %v4084_v56 = vmax.f32 %v7973_v46, 0.0  ;;  %v7522_v61 = vpop.f32.mrb[52].mxu1 }
 0x2de   : > { %4100 = vst.msk [vmem:[#allocation4 + $0x18] sm:$0xff] %vm4096_vm3, %v4085_v47  ;;  %v7974_v62 = vadd.f32 %v7522_v61, %v9645_v5  ;;  %v4019_v63 = vpop.f32.mrb[53].mxu1 }
 0x2df   : > { %4099 = vst.msk [vmem:[#allocation4 + $0x10] sm:$0xff] %vm4096_vm3, %v4084_v56  ;;  %v7975_v8 = vadd.f32 %v9645_v5, %v4019_v63  ;;  %v6103_v63 = vld [vmem:[%s9667_s19 + $0x8] sm:$0x7] }
 0x2e0   : > { %v4087_v10 = vmax.f32 %v7974_v62, 0.0 }
 0x2e1   : > { %v4086_v26 = vmax.f32 %v7975_v8, 0.0  ;;  %v7525_v1 = vpop.f32.mrb[54].mxu1 }
 0x2e2   : > { %4102 = vst.msk [vmem:[#allocation4 + $0x28] sm:$0xff] %vm4096_vm3, %v4087_v10  ;;  %v7976_v9 = vadd.f32 %v7525_v1, %v9645_v5  ;;  %v6028_v12 = vld [vmem:[#allocation4] ss:$2 sm:$0x7f]  ;;  %v4029_v19 = vpop.f32.mrb[55].mxu1 }
 0x2e3   : > { %4101 = vst.msk [vmem:[#allocation4 + $0x20] sm:$0xff] %vm4096_vm3, %v4086_v26  ;;  %v6030_v24 = vld [vmem:[#allocation4 + $0x1] ss:$2 sm:$0x7f]  ;;  %v7977_v32 = vadd.f32 %v9645_v5, %v4029_v19 }
 0x2e4   : > { %v4089_v38 = vmax.f32 %v7976_v9, 0.0  ;;  %v6031_v14 = vmax.f32 %v6028_v12, %v6030_v24 }
 0x2e5   : > { %v7528_v33 = vpop.f32.mrb[56].mxu1  ;;  %v4088_v7 = vmax.f32 %v7977_v32, 0.0 }
 0x2e6   : > { %v6033_v41 = vld [vmem:[#allocation4 + $0x10] ss:$2 sm:$0x7f]  ;;  %v6035_v4 = vld [vmem:[#allocation4 + $0x11] ss:$2 sm:$0x7f]  ;;  %v7978_v50 = vadd.f32 %v7528_v33, %v9645_v5 }
 0x2e7   : > { %4104 = vst.msk [vmem:[#allocation4 + $0x38] sm:$0xff] %vm4096_vm3, %v4089_v38  ;;  %v6036_v27 = vmax.f32 %v6033_v41, %v6035_v4  ;;  %v4039_v55 = vpop.f32.mrb[57].mxu1  ;;  %4103 = vst.msk [vmem:[#allocation4 + $0x30] sm:$0xff] %vm4096_vm3, %v4088_v7 }
 0x2e8   : > { %v4091_v18 = vmax.f32 %v7978_v50, 0.0  ;;  %v7979_v11 = vadd.f32 %v9645_v5, %v4039_v55 }
 0x2e9   : > { %v6037_v37 = vmax.f32 %v6031_v14, %v6036_v27  ;;  %v7531_v29 = vpop.f32.mrb[58].mxu1 }
 0x2ea   : > { %4106 = vst.msk [vmem:[#allocation4 + $0x48] sm:$0xff] %vm4096_vm3, %v4091_v18  ;;  %v7980_v52 = vadd.f32 %v7531_v29, %v9645_v5  ;;  %v4090_v15 = vmax.f32 %v7979_v11, 0.0  ;;  %v4049_v58 = vpop.f32.mrb[59].mxu1  ;;  %v6046_v28 = vld [vmem:[#allocation4 + $0x20] ss:$2 sm:$0x7f] }
 0x2eb   : > { %v6038_v2 = vpack.c.bf16 %v6037_v37, %v6037_v37  ;;  %v7981_v16 = vadd.f32 %v9645_v5, %v4049_v58  ;;  %v6048_v39 = vld [vmem:[#allocation4 + $0x21] ss:$2 sm:$0x7f] }
 0x2ec   : > { %v4093_v54 = vmax.f32 %v7980_v52, 0.0  ;;  %4105 = vst.msk [vmem:[#allocation4 + $0x40] sm:$0xff] %vm4096_vm3, %v4090_v15  ;;  %v6049_v57 = vmax.f32 %v6046_v28, %v6048_v39 }
 0x2ed   : > { %v6043_v36 = vsel %vm6041_vm6, %v6038_v2, %v6042_v59  ;;  %v7534_v42 = vpop.f32.mrb[60].mxu1  ;;  %v4092_v31 = vmax.f32 %v7981_v16, 0.0  ;;  %vm6223_vm6 = vsmask.f32 256 }
 0x2ee   : > { %6044 = vst [vmem:[%s9667_s19] sm:$0xf] %v6043_v36  ;;  %4108 = vst.msk [vmem:[#allocation4 + $0x58] sm:$0xff] %vm4096_vm3, %v4093_v54  ;;  %v7982_v43 = vadd.f32 %v7534_v42, %v9645_v5  ;;  %v4059_v60 = vpop.f32.mrb[61].mxu1  ;;  %v6051_v49 = vld [vmem:[#allocation4 + $0x30] ss:$2 sm:$0x7f] }
 0x2ef   : > { %v7983_v13 = vadd.f32 %v9645_v5, %v4059_v60  ;;  %v6053_v40 = vld [vmem:[#allocation4 + $0x31] ss:$2 sm:$0x7f]  ;;  %4107 = vst.msk [vmem:[#allocation4 + $0x50] sm:$0xff] %vm4096_vm3, %v4092_v31 }
 0x2f0   : > { %v6054_v3 = vmax.f32 %v6051_v49, %v6053_v40  ;;  %v4095_v17 = vmax.f32 %v7982_v43, 0.0 }
 0x2f1   : > { %v4094_v21 = vmax.f32 %v7983_v13, 0.0 }
 0x2f2   : > { %v6055_v22 = vmax.f32 %v6049_v57, %v6054_v3  ;;  %4110 = vst.msk [vmem:[#allocation4 + $0x68] sm:$0xff] %vm4096_vm3, %v4095_v17 }
 0x2f3   : > { %4109 = vst.msk [vmem:[#allocation4 + $0x60] sm:$0xff] %vm4096_vm3, %v4094_v21  ;;  %v6080_v23 = vld [vmem:[#allocation4 + $0x40] ss:$2 sm:$0x7f] }
 0x2f4   : > { %v6657_v53 = vpack.c.bf16 %v6055_v22, %v6055_v22  ;;  %v6082_v48 = vld [vmem:[#allocation4 + $0x41] ss:$2 sm:$0x7f] }
 0x2f5   : > { %v6083_v30 = vmax.f32 %v6080_v23, %v6082_v48  ;;  %v6074_v44 = vld [vmem:[%s9667_s19] sm:$0x8] }
 0x2f6   : > { %v6061_v0 = vshll.u32 %v6657_v53, 16  ;;  %v6064_v20 = vshrl.u32 %v6657_v53, 16  ;;  %v6085_v6 = vld [vmem:[#allocation4 + $0x50] ss:$2 sm:$0x7f] }
 0x2f7   : > { %v6087_v51 = vld [vmem:[#allocation4 + $0x51] ss:$2 sm:$0x7f] }
 0x2f8   : > { %v6063_v25 = vrot.slane %v6061_v0, 5  ;;  %v6066_v34 = vrot.slane %v6064_v20, 4  ;;  %v6088_v35 = vmax.f32 %v6085_v6, %v6087_v51 }
 0x2fa   : > { %v6067_v45 = vor.u32 %v6066_v34, %v6063_v25  ;;  %v6075_v46 = vsel %vm6073_vm9, %v6063_v25, %v6074_v44  ;;  %v6089_v47 = vmax.f32 %v6083_v30, %v6088_v35  ;;  %v6107_v55 = vld [vmem:[#allocation4 + $0x60] ss:$2 sm:$0x7f]  ;;  %v6109_v11 = vld [vmem:[#allocation4 + $0x61] ss:$2 sm:$0x7f] }
 0x2fb   : > { %6076 = vst [vmem:[%s9667_s19] sm:$0x8] %v6075_v46  ;;  %v6110_v58 = vmax.f32 %v6107_v55, %v6109_v11 }
 0x2fc   : > { %v6068_v56 = vrot.slane %v6067_v45, 4  ;;  %v6658_v61 = vpack.c.bf16 %v6089_v47, %v6089_v47 }
 0x2fe   : > { %6078 = vst.msk [vmem:[%s9667_s19 + $0x4] sm:$0x7] %vm6077_vm10, %v6068_v56  ;;  %v6094_v62 = vrot.slane %v6658_v61, 5 }
 0x300   : > { %v6095_v8 = vrot.slane %v6094_v62, 4  ;;  %6099 = vst.msk [vmem:[%s9667_s19 + $0x4] sm:$0x8] %vm6071_vm7, %v6094_v62  ;;  %vm6199_vm7 = vcmask 516096  }
 0x301   : > { %vm6224_vm8 = vmand %vm6199_vm7, %vm6223_vm6 }
 0x302   : > { %v6104_v10 = vsel %vm6102_vm12, %v6095_v8, %v6103_v63 }
 0x303   : > { %6105 = vst [vmem:[%s9667_s19 + $0x8] sm:$0x7] %v6104_v10 }
 0x309   : > { %v7777_v26 = vpop.f32.mrb[50].mxu0 }
 0x30a   : > { %v7984_v1 = vadd.f32 %v7777_v26, %v9645_v5  ;;  %v5917_v9 = vpop.f32.mrb[51].mxu0  ;;  %v6135_v56 = vld [vmem:[%s9667_s19 + $0x8] sm:$0xc] }
 0x30b   : > { %v7985_v12 = vadd.f32 %v9645_v5, %v5917_v9 }
 0x30c   : > { %v6001_v19 = vmax.f32 %v7984_v1, 0.0 }
 0x30d   : > { %v6000_v24 = vmax.f32 %v7985_v12, 0.0  ;;  %v7780_v38 = vpop.f32.mrb[52].mxu0  ;;  %v6164_v12 = vld [vmem:[%s9667_s19 + $0x10] sm:$0x3] }
 0x30e   : > { %6015 = vst.msk [vmem:[#allocation4 + $0x78] sm:$0xff] %vm4096_vm3, %v6001_v19  ;;  %v7986_v32 = vadd.f32 %v7780_v38, %v9645_v5  ;;  %v5927_v33 = vpop.f32.mrb[53].mxu0 }
 0x30f   : > { %6014 = vst.msk [vmem:[#allocation4 + $0x70] sm:$0xff] %vm4096_vm3, %v6000_v24  ;;  %v7987_v41 = vadd.f32 %v9645_v5, %v5927_v33 }
 0x310   : > { %v6003_v4 = vmax.f32 %v7986_v32, 0.0 }
 0x311   : > { %v6002_v50 = vmax.f32 %v7987_v41, 0.0  ;;  %v7783_v14 = vpop.f32.mrb[54].mxu0 }
 0x312   : > { %6017 = vst.msk [vmem:[#allocation4 + $0x88] sm:$0xff] %vm4096_vm3, %v6003_v4  ;;  %v7988_v27 = vadd.f32 %v7783_v14, %v9645_v5  ;;  %v5937_v7 = vpop.f32.mrb[55].mxu0 }
 0x313   : > { %6016 = vst.msk [vmem:[#allocation4 + $0x80] sm:$0xff] %vm4096_vm3, %v6002_v50  ;;  %v7989_v18 = vadd.f32 %v9645_v5, %v5937_v7 }
 0x314   : > { %v6005_v37 = vmax.f32 %v7988_v27, 0.0 }
 0x315   : > { %v6004_v29 = vmax.f32 %v7989_v18, 0.0  ;;  %v7786_v59 = vpop.f32.mrb[56].mxu0 }
 0x316   : > { %v6112_v52 = vld [vmem:[#allocation4 + $0x70] ss:$2 sm:$0x7f]  ;;  %v6114_v2 = vld [vmem:[#allocation4 + $0x71] ss:$2 sm:$0x7f]  ;;  %v7990_v15 = vadd.f32 %v7786_v59, %v9645_v5 }
 0x317   : > { %6019 = vst.msk [vmem:[#allocation4 + $0x98] sm:$0xff] %vm4096_vm3, %v6005_v37  ;;  %v6115_v54 = vmax.f32 %v6112_v52, %v6114_v2  ;;  %6018 = vst.msk [vmem:[#allocation4 + $0x90] sm:$0xff] %vm4096_vm3, %v6004_v29  ;;  %v5947_v16 = vpop.f32.mrb[57].mxu0 }
 0x318   : > { %v6007_v36 = vmax.f32 %v7990_v15, 0.0  ;;  %v7991_v28 = vadd.f32 %v9645_v5, %v5947_v16 }
 0x319   : > { %v6116_v42 = vmax.f32 %v6110_v58, %v6115_v54  ;;  %v7789_v39 = vpop.f32.mrb[58].mxu0 }
 0x31a   : > { %v6141_v31 = vld [vmem:[#allocation4 + $0x80] ss:$2 sm:$0x7f]  ;;  %6021 = vst.msk [vmem:[#allocation4 + $0xa8] sm:$0xff] %vm4096_vm3, %v6007_v36  ;;  %v7992_v43 = vadd.f32 %v7789_v39, %v9645_v5  ;;  %v6006_v49 = vmax.f32 %v7991_v28, 0.0  ;;  %v5957_v40 = vpop.f32.mrb[59].mxu0 }
 0x31b   : > { %v6659_v60 = vpack.c.bf16 %v6116_v42, %v6116_v42  ;;  %v6143_v13 = vld [vmem:[#allocation4 + $0x81] ss:$2 sm:$0x7f]  ;;  %v7993_v3 = vadd.f32 %v9645_v5, %v5957_v40 }
 0x31c   : > { %v6009_v57 = vmax.f32 %v7992_v43, 0.0  ;;  %6020 = vst.msk [vmem:[#allocation4 + $0xa0] sm:$0xff] %vm4096_vm3, %v6006_v49  ;;  %v6144_v53 = vmax.f32 %v6141_v31, %v6143_v13  ;;  %v6225_v43 = vld [vmem:[%s9667_s19 + $0x18] sm:$0x1] }
 0x31d   : > { %v6122_v17 = vshrl.u32 %v6659_v60, 16  ;;  %v6125_v21 = vshll.u32 %v6659_v60, 16  ;;  %v7792_v22 = vpop.f32.mrb[60].mxu0  ;;  %v6008_v25 = vmax.f32 %v7993_v3, 0.0 }
 0x31e   : > { %v6146_v23 = vld [vmem:[#allocation4 + $0x90] ss:$2 sm:$0x7f]  ;;  %v6148_v48 = vld [vmem:[#allocation4 + $0x91] ss:$2 sm:$0x7f]  ;;  %v7994_v0 = vadd.f32 %v7792_v22, %v9645_v5 }
 0x31f   : > { %6023 = vst.msk [vmem:[#allocation4 + $0xb8] sm:$0xff] %vm4096_vm3, %v6009_v57  ;;  %v6124_v20 = vrot.slane %v6122_v17, 5  ;;  %v6127_v6 = vrot.slane %v6125_v21, 6  ;;  %v6149_v51 = vmax.f32 %v6146_v23, %v6148_v48  ;;  %v5967_v34 = vpop.f32.mrb[61].mxu0  ;;  %6022 = vst.msk [vmem:[#allocation4 + $0xb0] sm:$0xff] %vm4096_vm3, %v6008_v25 }
 0x320   : > { %v6011_v35 = vmax.f32 %v7994_v0, 0.0  ;;  %v7995_v44 = vadd.f32 %v9645_v5, %v5967_v34 }
 0x321   : > { %v6128_v45 = vor.u32 %v6127_v6, %v6124_v20  ;;  %v6150_v46 = vmax.f32 %v6144_v53, %v6149_v51  ;;  %v7795_v47 = vpop.f32.mrb[62].mxu0 }
 0x322   : > { %6025 = vst.msk [vmem:[#allocation4 + $0xc8] sm:$0xff] %vm4096_vm3, %v6011_v35  ;;  %v6010_v61 = vmax.f32 %v7995_v44, 0.0  ;;  %v7996_v62 = vadd.f32 %v7795_v47, %v9645_v5  ;;  %v5977_v63 = vpop.f32.mrb[63].mxu0 }
 0x323   : > { %v6129_v8 = vrot.slane %v6128_v45, 4  ;;  %v6136_v10 = vsel %vm9713_vm15, %v6128_v45, %v6135_v56  ;;  %v6660_v26 = vpack.c.bf16 %v6150_v46, %v6150_v46  ;;  %v7997_v1 = vadd.f32 %v9645_v5, %v5977_v63  ;;  %v6168_v38 = vld [vmem:[#allocation4 + $0xa0] ss:$2 sm:$0x7f] }
 0x324   : > { %6137 = vst [vmem:[%s9667_s19 + $0x8] sm:$0xc] %v6136_v10  ;;  %6024 = vst.msk [vmem:[#allocation4 + $0xc0] sm:$0xff] %vm4096_vm3, %v6010_v61  ;;  %v6013_v19 = vmax.f32 %v7996_v62, 0.0 }
 0x325   : > { %6139 = vst.msk [vmem:[%s9667_s19 + $0xc] sm:$0x3] %vm6138_vm0, %v6129_v8  ;;  %v6155_v9 = vrot.slane %v6660_v26, 6  ;;  %v6012_v24 = vmax.f32 %v7997_v1, 0.0 }
 0x326   : > { %v6170_v32 = vld [vmem:[#allocation4 + $0xa1] ss:$2 sm:$0x7f]  ;;  %6027 = vst.msk [vmem:[#allocation4 + $0xd8] sm:$0xff] %vm4096_vm3, %v6013_v19 }
 0x327   : > { %v6156_v33 = vrot.slane %v6155_v9, 4  ;;  %6160 = vst.msk [vmem:[%s9667_s19 + $0xc] sm:$0xc] %vm6132_vm13, %v6155_v9  ;;  %v6173_v5 = vld [vmem:[#allocation4 + $0xb0] ss:$2 sm:$0x7f]  ;;  %v6171_v50 = vmax.f32 %v6168_v38, %v6170_v32 }
 0x328   : > { %6026 = vst.msk [vmem:[#allocation4 + $0xd0] sm:$0xff] %vm4096_vm3, %v6012_v24  ;;  %v6175_v41 = vld [vmem:[#allocation4 + $0xb1] ss:$2 sm:$0x7f]  ;;  %vm6195_vm3 = vmand %vm6193_vm4, %vm6194_vm5 }
 0x329   : > { %v6165_v4 = vsel %vm6163_vm2, %v6156_v33, %v6164_v12  ;;  %v6176_v14 = vmax.f32 %v6173_v5, %v6175_v41 }
 0x32a   : > { %6166 = vst [vmem:[%s9667_s19 + $0x10] sm:$0x3] %v6165_v4 }
 0x32b   : > { %v6177_v27 = vmax.f32 %v6171_v50, %v6176_v14  ;;  %v6202_v7 = vld [vmem:[#allocation4 + $0xc0] ss:$2 sm:$0x7f]  ;;  %v6204_v55 = vld [vmem:[#allocation4 + $0xc1] ss:$2 sm:$0x7f] }
 0x32c   : > { %v6205_v52 = vmax.f32 %v6202_v7, %v6204_v55 }
 0x32d   : > { %v6661_v18 = vpack.c.bf16 %v6177_v27, %v6177_v27 }
 0x32f   : > { %v6207_v11 = vld [vmem:[#allocation4 + $0xd0] ss:$2 sm:$0x7f]  ;;  %v6209_v37 = vld [vmem:[#allocation4 + $0xd1] ss:$2 sm:$0x7f] }
 0x330   : > { %v6183_v29 = vshrl.u32 %v6661_v18, 16  ;;  %v6186_v59 = vshll.u32 %v6661_v18, 16  ;;  %v6210_v2 = vmax.f32 %v6207_v11, %v6209_v37 }
 0x331   : > { %v6196_v16 = vld [vmem:[%s9667_s19 + $0x10] sm:$0xe] }
 0x332   : > { %v6185_v15 = vrot.slane %v6183_v29, 6  ;;  %v6188_v58 = vrot.slane %v6186_v59, 7  ;;  %v6211_v54 = vmax.f32 %v6205_v52, %v6210_v2 }
 0x334   : > { %v6189_v36 = vor.u32 %v6188_v58, %v6185_v15  ;;  %v6662_v28 = vpack.c.bf16 %v6211_v54, %v6211_v54 }
 0x336   : > { %v6190_v42 = vrot.slane %v6189_v36, 4  ;;  %v6197_v39 = vsel %vm6195_vm3, %v6189_v36, %v6196_v16  ;;  %v6216_v31 = vrot.slane %v6662_v28, 7 }
 0x337   : > { %6198 = vst [vmem:[%s9667_s19 + $0x10] sm:$0xe] %v6197_v39 }
 0x338   : > { %6200 = vst.msk [vmem:[%s9667_s19 + $0x14] sm:$0x1] %vm6199_vm7, %v6190_v42  ;;  %v6217_v60 = vrot.slane %v6216_v31, 4 }
 0x339   : > { %6221 = vst.msk [vmem:[%s9667_s19 + $0x14] sm:$0xe] %vm6193_vm4, %v6216_v31 }
 0x33a   : > { %v6226_v13 = vsel %vm6224_vm8, %v6217_v60, %v6225_v43 }
 0x33b   : > { %6227 = vst [vmem:[%s9667_s19 + $0x18] sm:$0x1] %v6226_v13 }
 0x33c PF: > { %s15_s18 = sadd.s32 1, %s8241_s18  }
 0x33d   : > { %p12_p4 = scmp.ge.s32.totalorder %s15_s18, 4  }
 0x33f   :  { %14 = sbr.rel (!%p12_p4) target bundleno = 1 (0x1), region = 208 }

</bundles_post_ra>
